<compile_context>
chip_gen: v5e
topology: v5e:2x2
jax: 0.10.0
libtpu: 0.0.40
codegen_flags: <defaults>
</compile_context>

<pallas_src>
import functools

import numpy as np
import jax
import jax.numpy as jnp
from jax.experimental import pallas as pl
from jax.experimental.pallas import tpu as pltpu

EPS = 1e-12                      # matches the PyTorch module's eps
MATMUL_DTYPE = jnp.bfloat16      # matmul operand dtype (f32 accumulation)
TM_CAP = 256                     # pixel-tile cap; small so the demo shapes
                                 # exercise the multi-tile path.  Sweep
                                 # 512..2048 at production resolutions.
VMEM_LIMIT = 32 * 1024 * 1024    # safe on v5e/v6e (128 MiB) and v7x (64 MiB)

_CPARAMS = pltpu.CompilerParams(
    dimension_semantics=("parallel",),
    vmem_limit_bytes=VMEM_LIMIT,
)


def _tile_m(M, cap=TM_CAP):
    """Largest pixel tile <= cap that divides M (multiple of 128 when tiled)."""
    if M <= cap:
        return M
    for tm in range(cap - cap % 128, 0, -128):
        if M % tm == 0:
            return tm
    # TODO(synk): mask ragged edge tiles instead of falling back to one block.
    return M


# ----------------------------------------------------------------------------
# Pallas kernels
# ----------------------------------------------------------------------------
def _matmul_kernel(w_ref, x_ref, *rest, use_bias, use_stats, relu):
    # w: (N, K) bf16, x: (K, TM) bf16 -> y: (N, TM) f32 (pixels on lanes).
    if use_stats:
        o_ref, ps_ref, pq_ref = rest[-3:]
        in_rest = rest[:-3]
    else:
        o_ref = rest[-1]
        in_rest = rest[:-1]
    y = jnp.dot(w_ref[...], x_ref[...], preferred_element_type=jnp.float32)
    if use_bias:
        y = y + in_rest[0][...]
    if relu:
        y = jnp.maximum(y, 0.0)
    o_ref[...] = y
    if use_stats:
        # Per-tile per-channel partial sums for a tiling-safe BatchNorm.
        ps_ref[...] = jnp.sum(y, axis=1, keepdims=True)[None]       # (1, N, 1)
        pq_ref[...] = jnp.sum(y * y, axis=1, keepdims=True)[None]   # (1, N, 1)


def _bn_act_kernel(y_ref, ps_ref, pq_ref, g_ref, b_ref, *rest,
                   use_add, relu, inv_count, eps):
    # y: (N, TM); ps/pq: (T, N, 1) partials over all tiles; gamma/beta: (N, 1).
    o_ref = rest[-1]
    mean = jnp.sum(ps_ref[...], axis=0) * inv_count                 # (N, 1)
    msq = jnp.sum(pq_ref[...], axis=0) * inv_count                  # (N, 1)
    var = msq - mean * mean
    z = (y_ref[...] - mean) * jax.lax.rsqrt(var + eps)
    z = z * g_ref[...] + b_ref[...]
    if relu:
        z = jnp.maximum(z, 0.0)
    if use_add:                       # fused residual add
        z = z + rest[0][...]
    o_ref[...] = z


def _add_n_kernel(*refs):
    o_ref = refs[-1]
    acc = refs[0][...]
    for r in refs[1:-1]:
        acc = acc + r[...]
    o_ref[...] = acc


def _mask_mul_kernel(h_ref, x_ref, o_ref):
    # mask = relu(h); out = mask * input   (fused)
    o_ref[...] = jnp.maximum(h_ref[...], 0.0) * x_ref[...]


# ----------------------------------------------------------------------------
# Pallas wrappers
# ----------------------------------------------------------------------------
def pallas_matmul(w, x, bias=None, relu=False, stats=False):
    """(N, K) @ (K, M) -> (N, M); optionally also per-tile BN partial sums."""
    N, K = w.shape
    K2, M = x.shape
    assert K == K2
    tm = _tile_m(M)
    T = M // tm

    in_specs = [
        pl.BlockSpec((N, K), lambda i: (0, 0)),
        pl.BlockSpec((K, tm), lambda i: (0, i)),
    ]
    args = [w.astype(MATMUL_DTYPE), x.astype(MATMUL_DTYPE)]
    if bias is not None:
        in_specs.append(pl.BlockSpec((N, 1), lambda i: (0, 0)))
        args.append(bias.reshape(N, 1).astype(jnp.float32))

    out_shape = [jax.ShapeDtypeStruct((N, M), jnp.float32)]
    out_specs = [pl.BlockSpec((N, tm), lambda i: (0, i))]
    if stats:
        out_shape += [jax.ShapeDtypeStruct((T, N, 1), jnp.float32)] * 2
        out_specs += [pl.BlockSpec((1, N, 1), lambda i: (i, 0, 0))] * 2

    kernel = functools.partial(_matmul_kernel, use_bias=bias is not None,
                               use_stats=stats, relu=relu)
    return pl.pallas_call(
        kernel,
        grid=(T,),
        in_specs=in_specs,
        out_specs=tuple(out_specs) if stats else out_specs[0],
        out_shape=tuple(out_shape) if stats else out_shape[0],
        compiler_params=_CPARAMS,
    )(*args)


def bn_act(y, psum, psq, gamma, beta, *, relu=False, add=None, eps=EPS):
    """Training-mode BatchNorm from per-tile partials, + optional ReLU/add."""
    N, M = y.shape
    T = psum.shape[0]
    tm = _tile_m(M)

    in_specs = [
        pl.BlockSpec((N, tm), lambda i: (0, i)),
        pl.BlockSpec((T, N, 1), lambda i: (0, 0, 0)),
        pl.BlockSpec((T, N, 1), lambda i: (0, 0, 0)),
        pl.BlockSpec((N, 1), lambda i: (0, 0)),
        pl.BlockSpec((N, 1), lambda i: (0, 0)),
    ]
    args = [y, psum, psq,
            gamma.reshape(N, 1).astype(jnp.float32),
            beta.reshape(N, 1).astype(jnp.float32)]
    if add is not None:
        in_specs.append(pl.BlockSpec((N, tm), lambda i: (0, i)))
        args.append(add.astype(jnp.float32))

    kernel = functools.partial(_bn_act_kernel, use_add=add is not None,
                               relu=relu, inv_count=1.0 / M, eps=eps)
    return pl.pallas_call(
        kernel,
        grid=(M // tm,),
        in_specs=in_specs,
        out_specs=pl.BlockSpec((N, tm), lambda i: (0, i)),
        out_shape=jax.ShapeDtypeStruct((N, M), jnp.float32),
        compiler_params=_CPARAMS,
    )(*args)


def _elementwise(kernel, arrays):
    C, M = arrays[0].shape
    tm = _tile_m(M)
    spec = pl.BlockSpec((C, tm), lambda i: (0, i))
    return pl.pallas_call(
        kernel,
        grid=(M // tm,),
        in_specs=[spec] * len(arrays),
        out_specs=spec,
        out_shape=jax.ShapeDtypeStruct((C, M), jnp.float32),
        compiler_params=_CPARAMS,
    )(*[a.astype(jnp.float32) for a in arrays])


def add_n(arrays):
    if len(arrays) == 1:
        return arrays[0]
    return _elementwise(_add_n_kernel, list(arrays))


# ----------------------------------------------------------------------------
# Conv / upsample glue around the Pallas kernels
# ----------------------------------------------------------------------------
def conv1x1_bn(x_cm, w, gamma, beta, *, relu=False, add=None, eps=EPS):
    """1x1 conv (bias skipped: cancelled by batch-stat BN) -> BN -> [ReLU][+add]."""
    N = w.shape[0]
    y, ps, pq = pallas_matmul(w.reshape(N, -1), x_cm, stats=True)
    return bn_act(y, ps, pq, gamma, beta, relu=relu, add=add, eps=eps)


def _im2col(x_cbhw, kh, kw, stride, padding):
    pt, pb, pleft, pr = padding
    x = jnp.pad(x_cbhw, ((0, 0), (0, 0), (pt, pb), (pleft, pr)))
    C, B, H, W = x.shape
    sh, sw = stride
    Ho = (H - kh) // sh + 1
    Wo = (W - kw) // sw + 1
    taps = []
    for i in range(kh):
        for j in range(kw):
            taps.append(x[:, :, i:i + sh * (Ho - 1) + 1:sh,
                            j:j + sw * (Wo - 1) + 1:sw])
    # TODO(synk): replace im2col glue with an in-kernel accumulate-over-taps
    # matmul (grid over kh*kw) to avoid the kh*kw-fold HBM blow-up.
    col = jnp.stack(taps, axis=1).reshape(C * kh * kw, B * Ho * Wo)
    return col, (B, Ho, Wo)


def conv_kxk_bn(x_cbhw, w, gamma, beta, *, relu, stride, padding, eps=EPS):
    Cout = w.shape[0]
    col, (B, Ho, Wo) = _im2col(x_cbhw, w.shape[2], w.shape[3], stride, padding)
    y, ps, pq = pallas_matmul(w.reshape(Cout, -1), col, stats=True)
    z = bn_act(y, ps, pq, gamma, beta, relu=relu, eps=eps)
    return z.reshape(Cout, B, Ho, Wo)


def conv_kxk(x_cbhw, w, bias, *, relu, stride, padding):
    Cout = w.shape[0]
    col, (B, Ho, Wo) = _im2col(x_cbhw, w.shape[2], w.shape[3], stride, padding)
    y = pallas_matmul(w.reshape(Cout, -1), col, bias=bias, relu=relu)
    return y.reshape(Cout, B, Ho, Wo)


def _interp_taps(n_in, factor):
    # PyTorch bilinear, align_corners=False, exact integer scale factor.
    idx0, idx1, frac = [], [], []
    for o in range(n_in * factor):
        src = (o + 0.5) / factor - 0.5
        i0 = int(np.floor(src))
        f = src - i0
        idx0.append(min(max(i0, 0), n_in - 1))
        idx1.append(min(max(i0 + 1, 0), n_in - 1))
        frac.append(f)
    return (np.asarray(idx0, np.int32), np.asarray(idx1, np.int32),
            np.asarray(frac, np.float32))


def _upsample_axis(x, axis, factor):
    # Bilinear (align_corners=False) along one axis: a static 2-tap lerp.
    # TODO(synk): could be its own Pallas kernel (phase-shifted weighted adds);
    # kept as glue since taps/weights are fully static and XLA fuses the lerp.
    if factor == 1:
        return x
    n = x.shape[axis]
    i0, i1, f = _interp_taps(n, factor)
    x0 = jnp.take(x, jnp.asarray(i0), axis=axis)
    x1 = jnp.take(x, jnp.asarray(i1), axis=axis)
    shape = [1] * x.ndim
    shape[axis] = n * factor
    f = jnp.asarray(f).reshape(shape)
    return x0 * (1.0 - f) + x1 * f


def bilinear_upsample(x_cbhw, fh, fw):
    return _upsample_axis(_upsample_axis(x_cbhw, 2, fh), 3, fw)


def center_crop_to(x_cbhw, H, W):
    _, _, Hin, Win = x_cbhw.shape
    pt = (Hin - H) // 2
    pleft = (Win - W) // 2
    return x_cbhw[:, :, pt:pt + H, pleft:pleft + W]


# ----------------------------------------------------------------------------
# Deterministic parameter construction (PyTorch-like shapes / init)
# ----------------------------------------------------------------------------
class KeyGen:
    def __init__(self, seed=0):
        self.key = jax.random.PRNGKey(seed)

    def __call__(self):
        self.key, sub = jax.random.split(self.key)
        return sub


def init_conv(kg, cout, cin, kh=1, kw=1, bias=True):
    fan_in = cin * kh * kw
    bound = 1.0 / np.sqrt(fan_in)
    p = {'w': jax.random.uniform(kg(), (cout, cin, kh, kw), jnp.float32,
                                 -bound, bound)}
    if bias:
        p['b'] = jax.random.uniform(kg(), (cout,), jnp.float32, -bound, bound)
    return p


def init_bn(kg, c):
    return {'gamma': jnp.ones((c,), jnp.float32),
            'beta': jnp.zeros((c,), jnp.float32)}


def init_residual_block(kg, cin, cout, cb, k=(3, 3)):
    # Biases of convs feeding BN exist (PyTorch default) but are skipped in the
    # forward pass because batch-stat BN cancels them exactly.
    p = {'pw_in': init_conv(kg, cb, cin), 'bn_in': init_bn(kg, cb),
         'conv': init_conv(kg, cb, cb, k[0], k[1]), 'bn': init_bn(kg, cb),
         'pw_out': init_conv(kg, cout, cb), 'bn_out': init_bn(kg, cout)}
    if cin != cout:
        p['skip'] = init_conv(kg, cout, cin)
    return p


def init_stacked_residual(kg, cin, cout, cb, k, num_stacks):
    blocks = []
    for idx in range(num_stacks):
        c_in = cin if idx == 0 else cout
        blocks.append(init_residual_block(kg, c_in, cout, cb, k))
    return blocks


def init_upsample_block(kg, cin, cout, factor):
    return {'type': 'up', 'pw': init_conv(kg, cout, cin, bias=False),
            'bn': init_bn(kg, cout), 'factor': factor}


def init_downsample_block(kg, cin, cout, stride):
    return {'type': 'down', 'pw': init_conv(kg, cout, cin, bias=False),
            'bn': init_bn(kg, cout),
            'conv': init_conv(kg, cout, cout, 3, 3, bias=True),
            'stride': stride}


def init_mix_block(kg, in_channels, additional, scale):
    max_in = len(in_channels) - 1
    if additional > 0:
        out_channels = list(in_channels) + [additional]
        max_out = max_in + 1
    else:
        out_channels = list(in_channels)
        max_out = max_in
    blocks = []
    for idx_out in range(max_out + 1):
        row, cout = [], out_channels[idx_out]
        for idx_in in range(max_in + 1):
            cin = in_channels[idx_in]
            if idx_in < idx_out:
                stride = (scale[0] ** (idx_out - idx_in),
                          scale[1] ** (idx_out - idx_in))
                row.append(init_downsample_block(kg, cin, cout, stride))
            elif idx_in > idx_out:
                factor = (scale[0] ** (idx_in - idx_out),
                          scale[1] ** (idx_in - idx_out))
                row.append(init_upsample_block(kg, cin, cout, factor))
            else:
                row.append({'type': 'identity'})
        blocks.append(row)
    return {'blocks': blocks}


def init_sprb(kg, in_channels, additional, cb, k, scale, n_stacks):
    res = []
    for _ in range(n_stacks):
        res.append([init_residual_block(kg, c, c, cb, k) for c in in_channels])
    return {'res': res, 'mix': init_mix_block(kg, in_channels, additional, scale)}


def init_concat_mix(kg, hidden, scale):
    blocks = [{'type': 'identity'}]
    for idx in range(1, len(hidden)):
        factor = (scale[0] ** idx, scale[1] ** idx)
        blocks.append(init_upsample_block(kg, hidden[idx], hidden[idx], factor))
    return {'blocks': blocks}


def init_backbone(kg, hidden, cb, k, scale, num_stacks):
    num_stages = len(hidden)
    stages = []
    for idx in range(num_stages):
        in_ch = hidden[:idx + 1]
        add_ch = 0 if idx == num_stages - 1 else hidden[idx + 1]
        stages.append(init_sprb(kg, in_ch, add_ch, cb, k, scale, num_stacks[idx]))
    return {'stages': stages, 'concat': init_concat_mix(kg, hidden, scale)}


def init_hrnet(seed, in_channels, hidden_channels, bottleneck_channels,
               kernel_size=(3, 3), scale=(2, 2), num_stacks=1,
               in_num_stacks=2, out_num_stacks=2):
    kg = KeyGen(seed)
    if isinstance(num_stacks, int):
        num_stacks = [num_stacks] * len(hidden_channels)
    return {
        'conv2d_in': init_stacked_residual(kg, in_channels, hidden_channels[0],
                                           bottleneck_channels, kernel_size,
                                           in_num_stacks),
        'backbone': init_backbone(kg, hidden_channels, bottleneck_channels,
                                  kernel_size, scale, num_stacks),
        'conv2d_out': init_stacked_residual(kg, sum(hidden_channels),
                                            in_channels, bottleneck_channels,
                                            kernel_size, out_num_stacks),
    }


# ----------------------------------------------------------------------------
# Forward passes (activations in channel-major (C, B, H, W))
# ----------------------------------------------------------------------------
def residual_block_fwd(p, x_cbhw, k=(3, 3), eps=EPS):
    Cin, B, H, W = x_cbhw.shape
    x_cm = x_cbhw.reshape(Cin, -1)
    kh, kw = k
    pt, pleft = (kh - 1) // 2, (kw - 1) // 2
    pb, pr = (kh - 1) - pt, (kw - 1) - pleft
    # 1x1 -> BN -> ReLU
    cb = p['pw_in']['w'].shape[0]
    h = conv1x1_bn(x_cm, p['pw_in']['w'], p['bn_in']['gamma'],
                   p['bn_in']['beta'], relu=True, eps=eps)
    h = h.reshape(cb, B, H, W)
    # kxk (same padding) -> BN -> ReLU
    h = conv_kxk_bn(h, p['conv']['w'], p['bn']['gamma'], p['bn']['beta'],
                    relu=True, stride=(1, 1), padding=(pt, pb, pleft, pr),
                    eps=eps)
    h_cm = h.reshape(h.shape[0], -1)
    # skip path (1x1 conv with bias when channel counts differ)
    if 'skip' in p:
        skip = pallas_matmul(p['skip']['w'].reshape(p['skip']['w'].shape[0], -1),
                             x_cm, bias=p['skip']['b'])
    else:
        skip = x_cm
    # 1x1 -> BN, residual add fused into the BN epilogue
    Cout = p['pw_out']['w'].shape[0]
    out = conv1x1_bn(h_cm, p['pw_out']['w'], p['bn_out']['gamma'],
                     p['bn_out']['beta'], relu=False, add=skip, eps=eps)
    return out.reshape(Cout, B, H, W)


def stacked_residual_fwd(blocks, x, k, eps):
    for bp in blocks:
        x = residual_block_fwd(bp, x, k, eps)
    return x


def upsample_block_fwd(p, x_cbhw, eps=EPS):
    C, B, H, W = x_cbhw.shape
    Cout = p['pw']['w'].shape[0]
    y = conv1x1_bn(x_cbhw.reshape(C, -1), p['pw']['w'], p['bn']['gamma'],
                   p['bn']['beta'], relu=False, eps=eps).reshape(Cout, B, H, W)
    fh, fw = p['factor']
    return bilinear_upsample(y, fh, fw)


def downsample_block_fwd(p, x_cbhw, eps=EPS):
    C, B, H, W = x_cbhw.shape
    Cout = p['pw']['w'].shape[0]
    y = conv1x1_bn(x_cbhw.reshape(C, -1), p['pw']['w'], p['bn']['gamma'],
                   p['bn']['beta'], relu=False, eps=eps).reshape(Cout, B, H, W)
    return conv_kxk(y, p['conv']['w'], p['conv']['b'], relu=True,
                    stride=p['stride'], padding=(1, 1, 1, 1))


def mix_block_fwd(p, xs, eps=EPS):
    out = []
    for row in p['blocks']:
        branches = []
        for idx_in, blk in enumerate(row):
            x = xs[idx_in]
            if blk['type'] == 'identity':
                y = x
            elif blk['type'] == 'up':
                y = upsample_block_fwd(blk, x, eps)
            else:
                y = downsample_block_fwd(blk, x, eps)
            if branches:
                _, _, H0, W0 = branches[0].shape
                y = center_crop_to(y, H0, W0)
            branches.append(y)
        C, B, H, W = branches[0].shape
        acc = add_n([b.reshape(C, -1) for b in branches])   # single fused add
        out.append(acc.reshape(C, B, H, W))
    return out


def sprb_fwd(p, xs, k, eps):
    cur = xs
    for stack in p['res']:
        cur = [residual_block_fwd(bp, x, k, eps) for bp, x in zip(stack, cur)]
    return mix_block_fwd(p['mix'], cur, eps)


def concat_mix_fwd(p, xs, eps):
    outs, H, W = [], None, None
    for idx, blk in enumerate(p['blocks']):
        if blk['type'] == 'identity':
            y = xs[idx]
            _, _, H, W = y.shape
        else:
            y = upsample_block_fwd(blk, xs[idx], eps)
            y = center_crop_to(y, H, W)
        outs.append(y)
    return jnp.concatenate(outs, axis=0)        # channel axis in (C, B, H, W)


def backbone_fwd(p, x, k, eps):
    xs = [x]
    for stage in p['stages']:
        xs = sprb_fwd(stage, xs, k, eps)
    return concat_mix_fwd(p['concat'], xs, eps)


def hrnet_forward(params, x_nchw, kernel_size=(3, 3), eps=EPS):
    # One layout change in, one out: NCHW -> channel-major (C, B, H, W).
    x = jnp.transpose(x_nchw, (1, 0, 2, 3))
    h = stacked_residual_fwd(params['conv2d_in'], x, kernel_size, eps)
    h = backbone_fwd(params['backbone'], h, kernel_size, eps)
    h = stacked_residual_fwd(params['conv2d_out'], h, kernel_size, eps)
    # mask = relu(h); output = mask * input   (single fused Pallas kernel)
    C, B, H, W = x.shape
    out = _elementwise(_mask_mul_kernel, [h.reshape(C, -1), x.reshape(C, -1)])
    return jnp.transpose(out.reshape(C, B, H, W), (1, 0, 2, 3))


# ----------------------------------------------------------------------------
if __name__ == "__main__":
    # Small, deterministic configuration consistent with HRNet.__init__.
    B, IN_CH, H, W = 2, 4, 16, 16
    HIDDEN = [8, 6]
    BOTTLENECK = 5

    params = init_hrnet(seed=0, in_channels=IN_CH, hidden_channels=HIDDEN,
                        bottleneck_channels=BOTTLENECK, kernel_size=(3, 3),
                        scale=(2, 2), num_stacks=1, in_num_stacks=2,
                        out_num_stacks=2)

    x = jax.random.normal(jax.random.PRNGKey(0), (B, IN_CH, H, W), jnp.float32)

    # NOTE: params carries static structure (block types / factors / strides),
    # so it is closed over instead of being passed as a traced jit argument.
    fwd = jax.jit(lambda xx: hrnet_forward(params, xx))
    out = jax.block_until_ready(fwd(x))

    assert out.shape == (B, IN_CH, H, W), out.shape
    assert bool(jnp.all(jnp.isfinite(out)))
    print("KERNEL_OK")
</pallas_src>

<mosaic_0001>
module attributes {stable_mosaic.version = 11 : i64} {
  func.func @_matmul_kernel(%arg0: i32, %arg1: memref<5x4xbf16, #tpu.memory_space<vmem>>, %arg2: memref<4x256xbf16, #tpu.memory_space<vmem>>, %arg3: memref<5x256xf32, #tpu.memory_space<vmem>>, %arg4: memref<1x5x1xf32, #tpu.memory_space<vmem>>, %arg5: memref<1x5x1xf32, #tpu.memory_space<vmem>>) attributes {dimension_semantics = [#tpu.dimension_semantics<parallel>], iteration_bounds = array<i64: 2>, scalar_prefetch = 0 : i64, scratch_operands = 0 : i64, tpu.core_type = #tpu.core_type<tc>, window_params = [{pipeline_mode = #tpu.pipeline_mode<synchronous>, transform_indices = @transform_0, window_bounds = array<i64: 5, 4>}, {transform_indices = @transform_1, window_bounds = array<i64: 4, 256>}, {transform_indices = @transform_2, window_bounds = array<i64: 5, 256>}, {transform_indices = @transform_3, window_bounds = array<i64: 1, 5, 1>}, {transform_indices = @transform_4, window_bounds = array<i64: 1, 5, 1>}]} {
    %c0 = arith.constant 0 : index
    %c0_0 = arith.constant 0 : index
    %0 = vector.load %arg1[%c0, %c0_0] : memref<5x4xbf16, #tpu.memory_space<vmem>>, vector<5x4xbf16>
    %c0_1 = arith.constant 0 : index
    %c0_2 = arith.constant 0 : index
    %1 = vector.load %arg2[%c0_1, %c0_2] : memref<4x256xbf16, #tpu.memory_space<vmem>>, vector<4x256xbf16>
    %cst = arith.constant dense<0.000000e+00> : vector<5x256xf32>
    %2 = tpu.matmul %0, %1, %cst {dimension_numbers = #tpu.dot_dimension_numbers<[1], [0], [0], [1], [0, 0, 1, 1], [], []>} : vector<5x4xbf16>, vector<4x256xbf16>, vector<5x256xf32> -> vector<5x256xf32>
    %c0_3 = arith.constant 0 : index
    %c0_4 = arith.constant 0 : index
    %3 = vector.load %arg3[%c0_3, %c0_4] : memref<5x256xf32, #tpu.memory_space<vmem>>, vector<5x256xf32>
    tpu.vector_store %arg3[%c0_3, %c0_4], %2 {strides = array<i32>} : memref<5x256xf32, #tpu.memory_space<vmem>>, vector<5x256xf32>,
    %cst_5 = arith.constant dense<0.000000e+00> : vector<5xf32>
    %4 = vector.multi_reduction <add>, %2, %cst_5 [1] : vector<5x256xf32> to vector<5xf32>
    %5 = vector.shape_cast %4 : vector<5xf32> to vector<5x1xf32>
    %6 = vector.shape_cast %5 : vector<5x1xf32> to vector<1x5x1xf32>
    %c0_6 = arith.constant 0 : index
    %c0_7 = arith.constant 0 : index
    %c0_8 = arith.constant 0 : index
    %7 = vector.load %arg4[%c0_6, %c0_7, %c0_8] : memref<1x5x1xf32, #tpu.memory_space<vmem>>, vector<1x5x1xf32>
    tpu.vector_store %arg4[%c0_6, %c0_7, %c0_8], %6 {strides = array<i32>} : memref<1x5x1xf32, #tpu.memory_space<vmem>>, vector<1x5x1xf32>,
    %8 = arith.mulf %2, %2 : vector<5x256xf32>
    %cst_9 = arith.constant dense<0.000000e+00> : vector<5xf32>
    %9 = vector.multi_reduction <add>, %8, %cst_9 [1] : vector<5x256xf32> to vector<5xf32>
    %10 = vector.shape_cast %9 : vector<5xf32> to vector<5x1xf32>
    %11 = vector.shape_cast %10 : vector<5x1xf32> to vector<1x5x1xf32>
    %c0_10 = arith.constant 0 : index
    %c0_11 = arith.constant 0 : index
    %c0_12 = arith.constant 0 : index
    %12 = vector.load %arg5[%c0_10, %c0_11, %c0_12] : memref<1x5x1xf32, #tpu.memory_space<vmem>>, vector<1x5x1xf32>
    tpu.vector_store %arg5[%c0_10, %c0_11, %c0_12], %11 {strides = array<i32>} : memref<1x5x1xf32, #tpu.memory_space<vmem>>, vector<1x5x1xf32>,
    return
  }
  func.func @transform_0(%arg0: i32) -> (i32, i32) {
    %c0_i32 = arith.constant 0 : i32
    %c0_i32_0 = arith.constant 0 : i32
    %c0_i32_1 = arith.constant 0 : i32
    return %c0_i32, %c0_i32_0 : i32, i32
  }
  func.func @transform_1(%arg0: i32) -> (i32, i32) {
    %c0_i32 = arith.constant 0 : i32
    %c0_i32_0 = arith.constant 0 : i32
    return %c0_i32, %arg0 : i32, i32
  }
  func.func @transform_2(%arg0: i32) -> (i32, i32) {
    %c0_i32 = arith.constant 0 : i32
    %c0_i32_0 = arith.constant 0 : i32
    return %c0_i32, %arg0 : i32, i32
  }
  func.func @transform_3(%arg0: i32) -> (i32, i32, i32) {
    %c0_i32 = arith.constant 0 : i32
    %c0_i32_0 = arith.constant 0 : i32
    %c0_i32_1 = arith.constant 0 : i32
    return %arg0, %c0_i32, %c0_i32_0 : i32, i32, i32
  }
  func.func @transform_4(%arg0: i32) -> (i32, i32, i32) {
    %c0_i32 = arith.constant 0 : i32
    %c0_i32_0 = arith.constant 0 : i32
    %c0_i32_1 = arith.constant 0 : i32
    return %arg0, %c0_i32, %c0_i32_0 : i32, i32, i32
  }
}

module attributes {stable_mosaic.version = 11 : i64} {
  func.func @_bn_act_kernel(%arg0: i32, %arg1: memref<5x256xf32, #tpu.memory_space<vmem>>, %arg2: memref<2x5x1xf32, #tpu.memory_space<vmem>>, %arg3: memref<2x5x1xf32, #tpu.memory_space<vmem>>, %arg4: memref<5x1xf32, #tpu.memory_space<vmem>>, %arg5: memref<5x1xf32, #tpu.memory_space<vmem>>, %arg6: memref<5x256xf32, #tpu.memory_space<vmem>>) attributes {dimension_semantics = [#tpu.dimension_semantics<parallel>], iteration_bounds = array<i64: 2>, scalar_prefetch = 0 : i64, scratch_operands = 0 : i64, tpu.core_type = #tpu.core_type<tc>, window_params = [{transform_indices = @transform_0, window_bounds = array<i64: 5, 256>}, {pipeline_mode = #tpu.pipeline_mode<synchronous>, transform_indices = @transform_1, window_bounds = array<i64: 2, 5, 1>}, {pipeline_mode = #tpu.pipeline_mode<synchronous>, transform_indices = @transform_2, window_bounds = array<i64: 2, 5, 1>}, {pipeline_mode = #tpu.pipeline_mode<synchronous>, transform_indices = @transform_3, window_bounds = array<i64: 5, 1>}, {pipeline_mode = #tpu.pipeline_mode<synchronous>, transform_indices = @transform_4, window_bounds = array<i64: 5, 1>}, {transform_indices = @transform_5, window_bounds = array<i64: 5, 256>}]} {
    %c0 = arith.constant 0 : index
    %c0_0 = arith.constant 0 : index
    %c0_1 = arith.constant 0 : index
    %0 = vector.load %arg2[%c0, %c0_0, %c0_1] : memref<2x5x1xf32, #tpu.memory_space<vmem>>, vector<2x5x1xf32>
    %cst = arith.constant dense<0.000000e+00> : vector<5x1xf32>
    %1 = vector.multi_reduction <add>, %0, %cst [0] : vector<2x5x1xf32> to vector<5x1xf32>
    %cst_2 = arith.constant 0.001953125 : f32
    %2 = vector.broadcast %cst_2 : f32 to vector<5x1xf32>
    %3 = arith.mulf %1, %2 : vector<5x1xf32>
    %c0_3 = arith.constant 0 : index
    %c0_4 = arith.constant 0 : index
    %c0_5 = arith.constant 0 : index
    %4 = vector.load %arg3[%c0_3, %c0_4, %c0_5] : memref<2x5x1xf32, #tpu.memory_space<vmem>>, vector<2x5x1xf32>
    %cst_6 = arith.constant dense<0.000000e+00> : vector<5x1xf32>
    %5 = vector.multi_reduction <add>, %4, %cst_6 [0] : vector<2x5x1xf32> to vector<5x1xf32>
    %cst_7 = arith.constant 0.001953125 : f32
    %6 = vector.broadcast %cst_7 : f32 to vector<5x1xf32>
    %7 = arith.mulf %5, %6 : vector<5x1xf32>
    %8 = arith.mulf %3, %3 : vector<5x1xf32>
    %9 = arith.subf %7, %8 : vector<5x1xf32>
    %c0_8 = arith.constant 0 : index
    %c0_9 = arith.constant 0 : index
    %10 = vector.load %arg1[%c0_8, %c0_9] : memref<5x256xf32, #tpu.memory_space<vmem>>, vector<5x256xf32>
    %11 = vector.broadcast %3 : vector<5x1xf32> to vector<5x256xf32>
    %12 = arith.subf %10, %11 : vector<5x256xf32>
    %cst_10 = arith.constant 9.99999996E-13 : f32
    %13 = vector.broadcast %cst_10 : f32 to vector<5x1xf32>
    %14 = arith.addf %9, %13 : vector<5x1xf32>
    %15 = math.rsqrt %14 : vector<5x1xf32>
    %16 = vector.broadcast %15 : vector<5x1xf32> to vector<5x256xf32>
    %17 = arith.mulf %12, %16 : vector<5x256xf32>
    %c0_11 = arith.constant 0 : index
    %c0_12 = arith.constant 0 : index
    %18 = vector.load %arg4[%c0_11, %c0_12] : memref<5x1xf32, #tpu.memory_space<vmem>>, vector<5x1xf32>
    %19 = vector.broadcast %18 : vector<5x1xf32> to vector<5x256xf32>
    %20 = arith.mulf %17, %19 : vector<5x256xf32>
    %c0_13 = arith.constant 0 : index
    %c0_14 = arith.constant 0 : index
    %21 = vector.load %arg5[%c0_13, %c0_14] : memref<5x1xf32, #tpu.memory_space<vmem>>, vector<5x1xf32>
    %22 = vector.broadcast %21 : vector<5x1xf32> to vector<5x256xf32>
    %23 = arith.addf %20, %22 : vector<5x256xf32>
    %cst_15 = arith.constant 0.000000e+00 : f32
    %24 = vector.broadcast %cst_15 : f32 to vector<5x256xf32>
    %25 = arith.maximumf %23, %24 : vector<5x256xf32>
    %c0_16 = arith.constant 0 : index
    %c0_17 = arith.constant 0 : index
    %26 = vector.load %arg6[%c0_16, %c0_17] : memref<5x256xf32, #tpu.memory_space<vmem>>, vector<5x256xf32>
    tpu.vector_store %arg6[%c0_16, %c0_17], %25 {strides = array<i32>} : memref<5x256xf32, #tpu.memory_space<vmem>>, vector<5x256xf32>,
    return
  }
  func.func @transform_0(%arg0: i32) -> (i32, i32) {
    %c0_i32 = arith.constant 0 : i32
    %c0_i32_0 = arith.constant 0 : i32
    return %c0_i32, %arg0 : i32, i32
  }
  func.func @transform_1(%arg0: i32) -> (i32, i32, i32) {
    %c0_i32 = arith.constant 0 : i32
    %c0_i32_0 = arith.constant 0 : i32
    %c0_i32_1 = arith.constant 0 : i32
    %c0_i32_2 = arith.constant 0 : i32
    return %c0_i32, %c0_i32_0, %c0_i32_1 : i32, i32, i32
  }
  func.func @transform_2(%arg0: i32) -> (i32, i32, i32) {
    %c0_i32 = arith.constant 0 : i32
    %c0_i32_0 = arith.constant 0 : i32
    %c0_i32_1 = arith.constant 0 : i32
    %c0_i32_2 = arith.constant 0 : i32
    return %c0_i32, %c0_i32_0, %c0_i32_1 : i32, i32, i32
  }
  func.func @transform_3(%arg0: i32) -> (i32, i32) {
    %c0_i32 = arith.constant 0 : i32
    %c0_i32_0 = arith.constant 0 : i32
    %c0_i32_1 = arith.constant 0 : i32
    return %c0_i32, %c0_i32_0 : i32, i32
  }
  func.func @transform_4(%arg0: i32) -> (i32, i32) {
    %c0_i32 = arith.constant 0 : i32
    %c0_i32_0 = arith.constant 0 : i32
    %c0_i32_1 = arith.constant 0 : i32
    return %c0_i32, %c0_i32_0 : i32, i32
  }
  func.func @transform_5(%arg0: i32) -> (i32, i32) {
    %c0_i32 = arith.constant 0 : i32
    %c0_i32_0 = arith.constant 0 : i32
    return %c0_i32, %arg0 : i32, i32
  }
}

module attributes {stable_mosaic.version = 11 : i64} {
  func.func @_matmul_kernel(%arg0: i32, %arg1: memref<8x4xbf16, #tpu.memory_space<vmem>>, %arg2: memref<4x256xbf16, #tpu.memory_space<vmem>>, %arg3: memref<8x1xf32, #tpu.memory_space<vmem>>, %arg4: memref<8x256xf32, #tpu.memory_space<vmem>>) attributes {dimension_semantics = [#tpu.dimension_semantics<parallel>], iteration_bounds = array<i64: 2>, scalar_prefetch = 0 : i64, scratch_operands = 0 : i64, tpu.core_type = #tpu.core_type<tc>, window_params = [{pipeline_mode = #tpu.pipeline_mode<synchronous>, transform_indices = @transform_0, window_bounds = array<i64: 8, 4>}, {transform_indices = @transform_1, window_bounds = array<i64: 4, 256>}, {pipeline_mode = #tpu.pipeline_mode<synchronous>, transform_indices = @transform_2, window_bounds = array<i64: 8, 1>}, {transform_indices = @transform_3, window_bounds = array<i64: 8, 256>}]} {
    %c0 = arith.constant 0 : index
    %c0_0 = arith.constant 0 : index
    %0 = vector.load %arg1[%c0, %c0_0] : memref<8x4xbf16, #tpu.memory_space<vmem>>, vector<8x4xbf16>
    %c0_1 = arith.constant 0 : index
    %c0_2 = arith.constant 0 : index
    %1 = vector.load %arg2[%c0_1, %c0_2] : memref<4x256xbf16, #tpu.memory_space<vmem>>, vector<4x256xbf16>
    %cst = arith.constant dense<0.000000e+00> : vector<8x256xf32>
    %2 = tpu.matmul %0, %1, %cst {dimension_numbers = #tpu.dot_dimension_numbers<[1], [0], [0], [1], [0, 0, 1, 1], [], []>} : vector<8x4xbf16>, vector<4x256xbf16>, vector<8x256xf32> -> vector<8x256xf32>
    %c0_3 = arith.constant 0 : index
    %c0_4 = arith.constant 0 : index
    %3 = vector.load %arg3[%c0_3, %c0_4] : memref<8x1xf32, #tpu.memory_space<vmem>>, vector<8x1xf32>
    %4 = vector.broadcast %3 : vector<8x1xf32> to vector<8x256xf32>
    %5 = arith.addf %2, %4 : vector<8x256xf32>
    %c0_5 = arith.constant 0 : index
    %c0_6 = arith.constant 0 : index
    %6 = vector.load %arg4[%c0_5, %c0_6] : memref<8x256xf32, #tpu.memory_space<vmem>>, vector<8x256xf32>
    tpu.vector_store %arg4[%c0_5, %c0_6], %5 {strides = array<i32>} : memref<8x256xf32, #tpu.memory_space<vmem>>, vector<8x256xf32>,
    return
  }
  func.func @transform_0(%arg0: i32) -> (i32, i32) {
    %c0_i32 = arith.constant 0 : i32
    %c0_i32_0 = arith.constant 0 : i32
    %c0_i32_1 = arith.constant 0 : i32
    return %c0_i32, %c0_i32_0 : i32, i32
  }
  func.func @transform_1(%arg0: i32) -> (i32, i32) {
    %c0_i32 = arith.constant 0 : i32
    %c0_i32_0 = arith.constant 0 : i32
    return %c0_i32, %arg0 : i32, i32
  }
  func.func @transform_2(%arg0: i32) -> (i32, i32) {
    %c0_i32 = arith.constant 0 : i32
    %c0_i32_0 = arith.constant 0 : i32
    %c0_i32_1 = arith.constant 0 : i32
    return %c0_i32, %c0_i32_0 : i32, i32
  }
  func.func @transform_3(%arg0: i32) -> (i32, i32) {
    %c0_i32 = arith.constant 0 : i32
    %c0_i32_0 = arith.constant 0 : i32
    return %c0_i32, %arg0 : i32, i32
  }
}

module attributes {stable_mosaic.version = 11 : i64} {
  func.func @_matmul_kernel(%arg0: i32, %arg1: memref<8x5xbf16, #tpu.memory_space<vmem>>, %arg2: memref<5x256xbf16, #tpu.memory_space<vmem>>, %arg3: memref<8x256xf32, #tpu.memory_space<vmem>>, %arg4: memref<1x8x1xf32, #tpu.memory_space<vmem>>, %arg5: memref<1x8x1xf32, #tpu.memory_space<vmem>>) attributes {dimension_semantics = [#tpu.dimension_semantics<parallel>], iteration_bounds = array<i64: 2>, scalar_prefetch = 0 : i64, scratch_operands = 0 : i64, tpu.core_type = #tpu.core_type<tc>, window_params = [{pipeline_mode = #tpu.pipeline_mode<synchronous>, transform_indices = @transform_0, window_bounds = array<i64: 8, 5>}, {transform_indices = @transform_1, window_bounds = array<i64: 5, 256>}, {transform_indices = @transform_2, window_bounds = array<i64: 8, 256>}, {transform_indices = @transform_3, window_bounds = array<i64: 1, 8, 1>}, {transform_indices = @transform_4, window_bounds = array<i64: 1, 8, 1>}]} {
    %c0 = arith.constant 0 : index
    %c0_0 = arith.constant 0 : index
    %0 = vector.load %arg1[%c0, %c0_0] : memref<8x5xbf16, #tpu.memory_space<vmem>>, vector<8x5xbf16>
    %c0_1 = arith.constant 0 : index
    %c0_2 = arith.constant 0 : index
    %1 = vector.load %arg2[%c0_1, %c0_2] : memref<5x256xbf16, #tpu.memory_space<vmem>>, vector<5x256xbf16>
    %cst = arith.constant dense<0.000000e+00> : vector<8x256xf32>
    %2 = tpu.matmul %0, %1, %cst {dimension_numbers = #tpu.dot_dimension_numbers<[1], [0], [0], [1], [0, 0, 1, 1], [], []>} : vector<8x5xbf16>, vector<5x256xbf16>, vector<8x256xf32> -> vector<8x256xf32>
    %c0_3 = arith.constant 0 : index
    %c0_4 = arith.constant 0 : index
    %3 = vector.load %arg3[%c0_3, %c0_4] : memref<8x256xf32, #tpu.memory_space<vmem>>, vector<8x256xf32>
    tpu.vector_store %arg3[%c0_3, %c0_4], %2 {strides = array<i32>} : memref<8x256xf32, #tpu.memory_space<vmem>>, vector<8x256xf32>,
    %cst_5 = arith.constant dense<0.000000e+00> : vector<8xf32>
    %4 = vector.multi_reduction <add>, %2, %cst_5 [1] : vector<8x256xf32> to vector<8xf32>
    %5 = vector.shape_cast %4 : vector<8xf32> to vector<8x1xf32>
    %6 = vector.shape_cast %5 : vector<8x1xf32> to vector<1x8x1xf32>
    %c0_6 = arith.constant 0 : index
    %c0_7 = arith.constant 0 : index
    %c0_8 = arith.constant 0 : index
    %7 = vector.load %arg4[%c0_6, %c0_7, %c0_8] : memref<1x8x1xf32, #tpu.memory_space<vmem>>, vector<1x8x1xf32>
    tpu.vector_store %arg4[%c0_6, %c0_7, %c0_8], %6 {strides = array<i32>} : memref<1x8x1xf32, #tpu.memory_space<vmem>>, vector<1x8x1xf32>,
    %8 = arith.mulf %2, %2 : vector<8x256xf32>
    %cst_9 = arith.constant dense<0.000000e+00> : vector<8xf32>
    %9 = vector.multi_reduction <add>, %8, %cst_9 [1] : vector<8x256xf32> to vector<8xf32>
    %10 = vector.shape_cast %9 : vector<8xf32> to vector<8x1xf32>
    %11 = vector.shape_cast %10 : vector<8x1xf32> to vector<1x8x1xf32>
    %c0_10 = arith.constant 0 : index
    %c0_11 = arith.constant 0 : index
    %c0_12 = arith.constant 0 : index
    %12 = vector.load %arg5[%c0_10, %c0_11, %c0_12] : memref<1x8x1xf32, #tpu.memory_space<vmem>>, vector<1x8x1xf32>
    tpu.vector_store %arg5[%c0_10, %c0_11, %c0_12], %11 {strides = array<i32>} : memref<1x8x1xf32, #tpu.memory_space<vmem>>, vector<1x8x1xf32>,
    return
  }
  func.func @transform_0(%arg0: i32) -> (i32, i32) {
    %c0_i32 = arith.constant 0 : i32
    %c0_i32_0 = arith.constant 0 : i32
    %c0_i32_1 = arith.constant 0 : i32
    return %c0_i32, %c0_i32_0 : i32, i32
  }
  func.func @transform_1(%arg0: i32) -> (i32, i32) {
    %c0_i32 = arith.constant 0 : i32
    %c0_i32_0 = arith.constant 0 : i32
    return %c0_i32, %arg0 : i32, i32
  }
  func.func @transform_2(%arg0: i32) -> (i32, i32) {
    %c0_i32 = arith.constant 0 : i32
    %c0_i32_0 = arith.constant 0 : i32
    return %c0_i32, %arg0 : i32, i32
  }
  func.func @transform_3(%arg0: i32) -> (i32, i32, i32) {
    %c0_i32 = arith.constant 0 : i32
    %c0_i32_0 = arith.constant 0 : i32
    %c0_i32_1 = arith.constant 0 : i32
    return %arg0, %c0_i32, %c0_i32_0 : i32, i32, i32
  }
  func.func @transform_4(%arg0: i32) -> (i32, i32, i32) {
    %c0_i32 = arith.constant 0 : i32
    %c0_i32_0 = arith.constant 0 : i32
    %c0_i32_1 = arith.constant 0 : i32
    return %arg0, %c0_i32, %c0_i32_0 : i32, i32, i32
  }
}

module attributes {stable_mosaic.version = 11 : i64} {
  func.func @_matmul_kernel(%arg0: i32, %arg1: memref<5x45xbf16, #tpu.memory_space<vmem>>, %arg2: memref<45x256xbf16, #tpu.memory_space<vmem>>, %arg3: memref<5x256xf32, #tpu.memory_space<vmem>>, %arg4: memref<1x5x1xf32, #tpu.memory_space<vmem>>, %arg5: memref<1x5x1xf32, #tpu.memory_space<vmem>>) attributes {dimension_semantics = [#tpu.dimension_semantics<parallel>], iteration_bounds = array<i64: 2>, scalar_prefetch = 0 : i64, scratch_operands = 0 : i64, tpu.core_type = #tpu.core_type<tc>, window_params = [{pipeline_mode = #tpu.pipeline_mode<synchronous>, transform_indices = @transform_0, window_bounds = array<i64: 5, 45>}, {transform_indices = @transform_1, window_bounds = array<i64: 45, 256>}, {transform_indices = @transform_2, window_bounds = array<i64: 5, 256>}, {transform_indices = @transform_3, window_bounds = array<i64: 1, 5, 1>}, {transform_indices = @transform_4, window_bounds = array<i64: 1, 5, 1>}]} {
    %c0 = arith.constant 0 : index
    %c0_0 = arith.constant 0 : index
    %0 = vector.load %arg1[%c0, %c0_0] : memref<5x45xbf16, #tpu.memory_space<vmem>>, vector<5x45xbf16>
    %c0_1 = arith.constant 0 : index
    %c0_2 = arith.constant 0 : index
    %1 = vector.load %arg2[%c0_1, %c0_2] : memref<45x256xbf16, #tpu.memory_space<vmem>>, vector<45x256xbf16>
    %cst = arith.constant dense<0.000000e+00> : vector<5x256xf32>
    %2 = tpu.matmul %0, %1, %cst {dimension_numbers = #tpu.dot_dimension_numbers<[1], [0], [0], [1], [0, 0, 1, 1], [], []>} : vector<5x45xbf16>, vector<45x256xbf16>, vector<5x256xf32> -> vector<5x256xf32>
    %c0_3 = arith.constant 0 : index
    %c0_4 = arith.constant 0 : index
    %3 = vector.load %arg3[%c0_3, %c0_4] : memref<5x256xf32, #tpu.memory_space<vmem>>, vector<5x256xf32>
    tpu.vector_store %arg3[%c0_3, %c0_4], %2 {strides = array<i32>} : memref<5x256xf32, #tpu.memory_space<vmem>>, vector<5x256xf32>,
    %cst_5 = arith.constant dense<0.000000e+00> : vector<5xf32>
    %4 = vector.multi_reduction <add>, %2, %cst_5 [1] : vector<5x256xf32> to vector<5xf32>
    %5 = vector.shape_cast %4 : vector<5xf32> to vector<5x1xf32>
    %6 = vector.shape_cast %5 : vector<5x1xf32> to vector<1x5x1xf32>
    %c0_6 = arith.constant 0 : index
    %c0_7 = arith.constant 0 : index
    %c0_8 = arith.constant 0 : index
    %7 = vector.load %arg4[%c0_6, %c0_7, %c0_8] : memref<1x5x1xf32, #tpu.memory_space<vmem>>, vector<1x5x1xf32>
    tpu.vector_store %arg4[%c0_6, %c0_7, %c0_8], %6 {strides = array<i32>} : memref<1x5x1xf32, #tpu.memory_space<vmem>>, vector<1x5x1xf32>,
    %8 = arith.mulf %2, %2 : vector<5x256xf32>
    %cst_9 = arith.constant dense<0.000000e+00> : vector<5xf32>
    %9 = vector.multi_reduction <add>, %8, %cst_9 [1] : vector<5x256xf32> to vector<5xf32>
    %10 = vector.shape_cast %9 : vector<5xf32> to vector<5x1xf32>
    %11 = vector.shape_cast %10 : vector<5x1xf32> to vector<1x5x1xf32>
    %c0_10 = arith.constant 0 : index
    %c0_11 = arith.constant 0 : index
    %c0_12 = arith.constant 0 : index
    %12 = vector.load %arg5[%c0_10, %c0_11, %c0_12] : memref<1x5x1xf32, #tpu.memory_space<vmem>>, vector<1x5x1xf32>
    tpu.vector_store %arg5[%c0_10, %c0_11, %c0_12], %11 {strides = array<i32>} : memref<1x5x1xf32, #tpu.memory_space<vmem>>, vector<1x5x1xf32>,
    return
  }
  func.func @transform_0(%arg0: i32) -> (i32, i32) {
    %c0_i32 = arith.constant 0 : i32
    %c0_i32_0 = arith.constant 0 : i32
    %c0_i32_1 = arith.constant 0 : i32
    return %c0_i32, %c0_i32_0 : i32, i32
  }
  func.func @transform_1(%arg0: i32) -> (i32, i32) {
    %c0_i32 = arith.constant 0 : i32
    %c0_i32_0 = arith.constant 0 : i32
    return %c0_i32, %arg0 : i32, i32
  }
  func.func @transform_2(%arg0: i32) -> (i32, i32) {
    %c0_i32 = arith.constant 0 : i32
    %c0_i32_0 = arith.constant 0 : i32
    return %c0_i32, %arg0 : i32, i32
  }
  func.func @transform_3(%arg0: i32) -> (i32, i32, i32) {
    %c0_i32 = arith.constant 0 : i32
    %c0_i32_0 = arith.constant 0 : i32
    %c0_i32_1 = arith.constant 0 : i32
    return %arg0, %c0_i32, %c0_i32_0 : i32, i32, i32
  }
  func.func @transform_4(%arg0: i32) -> (i32, i32, i32) {
    %c0_i32 = arith.constant 0 : i32
    %c0_i32_0 = arith.constant 0 : i32
    %c0_i32_1 = arith.constant 0 : i32
    return %arg0, %c0_i32, %c0_i32_0 : i32, i32, i32
  }
}

module attributes {stable_mosaic.version = 11 : i64} {
  func.func @_bn_act_kernel(%arg0: i32, %arg1: memref<8x256xf32, #tpu.memory_space<vmem>>, %arg2: memref<2x8x1xf32, #tpu.memory_space<vmem>>, %arg3: memref<2x8x1xf32, #tpu.memory_space<vmem>>, %arg4: memref<8x1xf32, #tpu.memory_space<vmem>>, %arg5: memref<8x1xf32, #tpu.memory_space<vmem>>, %arg6: memref<8x256xf32, #tpu.memory_space<vmem>>, %arg7: memref<8x256xf32, #tpu.memory_space<vmem>>) attributes {dimension_semantics = [#tpu.dimension_semantics<parallel>], iteration_bounds = array<i64: 2>, scalar_prefetch = 0 : i64, scratch_operands = 0 : i64, tpu.core_type = #tpu.core_type<tc>, window_params = [{transform_indices = @transform_0, window_bounds = array<i64: 8, 256>}, {pipeline_mode = #tpu.pipeline_mode<synchronous>, transform_indices = @transform_1, window_bounds = array<i64: 2, 8, 1>}, {pipeline_mode = #tpu.pipeline_mode<synchronous>, transform_indices = @transform_2, window_bounds = array<i64: 2, 8, 1>}, {pipeline_mode = #tpu.pipeline_mode<synchronous>, transform_indices = @transform_3, window_bounds = array<i64: 8, 1>}, {pipeline_mode = #tpu.pipeline_mode<synchronous>, transform_indices = @transform_4, window_bounds = array<i64: 8, 1>}, {transform_indices = @transform_5, window_bounds = array<i64: 8, 256>}, {transform_indices = @transform_6, window_bounds = array<i64: 8, 256>}]} {
    %c0 = arith.constant 0 : index
    %c0_0 = arith.constant 0 : index
    %c0_1 = arith.constant 0 : index
    %0 = vector.load %arg2[%c0, %c0_0, %c0_1] : memref<2x8x1xf32, #tpu.memory_space<vmem>>, vector<2x8x1xf32>
    %cst = arith.constant dense<0.000000e+00> : vector<8x1xf32>
    %1 = vector.multi_reduction <add>, %0, %cst [0] : vector<2x8x1xf32> to vector<8x1xf32>
    %cst_2 = arith.constant 0.001953125 : f32
    %2 = vector.broadcast %cst_2 : f32 to vector<8x1xf32>
    %3 = arith.mulf %1, %2 : vector<8x1xf32>
    %c0_3 = arith.constant 0 : index
    %c0_4 = arith.constant 0 : index
    %c0_5 = arith.constant 0 : index
    %4 = vector.load %arg3[%c0_3, %c0_4, %c0_5] : memref<2x8x1xf32, #tpu.memory_space<vmem>>, vector<2x8x1xf32>
    %cst_6 = arith.constant dense<0.000000e+00> : vector<8x1xf32>
    %5 = vector.multi_reduction <add>, %4, %cst_6 [0] : vector<2x8x1xf32> to vector<8x1xf32>
    %cst_7 = arith.constant 0.001953125 : f32
    %6 = vector.broadcast %cst_7 : f32 to vector<8x1xf32>
    %7 = arith.mulf %5, %6 : vector<8x1xf32>
    %8 = arith.mulf %3, %3 : vector<8x1xf32>
    %9 = arith.subf %7, %8 : vector<8x1xf32>
    %c0_8 = arith.constant 0 : index
    %c0_9 = arith.constant 0 : index
    %10 = vector.load %arg1[%c0_8, %c0_9] : memref<8x256xf32, #tpu.memory_space<vmem>>, vector<8x256xf32>
    %11 = vector.broadcast %3 : vector<8x1xf32> to vector<8x256xf32>
    %12 = arith.subf %10, %11 : vector<8x256xf32>
    %cst_10 = arith.constant 9.99999996E-13 : f32
    %13 = vector.broadcast %cst_10 : f32 to vector<8x1xf32>
    %14 = arith.addf %9, %13 : vector<8x1xf32>
    %15 = math.rsqrt %14 : vector<8x1xf32>
    %16 = vector.broadcast %15 : vector<8x1xf32> to vector<8x256xf32>
    %17 = arith.mulf %12, %16 : vector<8x256xf32>
    %c0_11 = arith.constant 0 : index
    %c0_12 = arith.constant 0 : index
    %18 = vector.load %arg4[%c0_11, %c0_12] : memref<8x1xf32, #tpu.memory_space<vmem>>, vector<8x1xf32>
    %19 = vector.broadcast %18 : vector<8x1xf32> to vector<8x256xf32>
    %20 = arith.mulf %17, %19 : vector<8x256xf32>
    %c0_13 = arith.constant 0 : index
    %c0_14 = arith.constant 0 : index
    %21 = vector.load %arg5[%c0_13, %c0_14] : memref<8x1xf32, #tpu.memory_space<vmem>>, vector<8x1xf32>
    %22 = vector.broadcast %21 : vector<8x1xf32> to vector<8x256xf32>
    %23 = arith.addf %20, %22 : vector<8x256xf32>
    %c0_15 = arith.constant 0 : index
    %c0_16 = arith.constant 0 : index
    %24 = vector.load %arg6[%c0_15, %c0_16] : memref<8x256xf32, #tpu.memory_space<vmem>>, vector<8x256xf32>
    %25 = arith.addf %23, %24 : vector<8x256xf32>
    %c0_17 = arith.constant 0 : index
    %c0_18 = arith.constant 0 : index
    %26 = vector.load %arg7[%c0_17, %c0_18] : memref<8x256xf32, #tpu.memory_space<vmem>>, vector<8x256xf32>
    tpu.vector_store %arg7[%c0_17, %c0_18], %25 {strides = array<i32>} : memref<8x256xf32, #tpu.memory_space<vmem>>, vector<8x256xf32>,
    return
  }
  func.func @transform_0(%arg0: i32) -> (i32, i32) {
    %c0_i32 = arith.constant 0 : i32
    %c0_i32_0 = arith.constant 0 : i32
    return %c0_i32, %arg0 : i32, i32
  }
  func.func @transform_1(%arg0: i32) -> (i32, i32, i32) {
    %c0_i32 = arith.constant 0 : i32
    %c0_i32_0 = arith.constant 0 : i32
    %c0_i32_1 = arith.constant 0 : i32
    %c0_i32_2 = arith.constant 0 : i32
    return %c0_i32, %c0_i32_0, %c0_i32_1 : i32, i32, i32
  }
  func.func @transform_2(%arg0: i32) -> (i32, i32, i32) {
    %c0_i32 = arith.constant 0 : i32
    %c0_i32_0 = arith.constant 0 : i32
    %c0_i32_1 = arith.constant 0 : i32
    %c0_i32_2 = arith.constant 0 : i32
    return %c0_i32, %c0_i32_0, %c0_i32_1 : i32, i32, i32
  }
  func.func @transform_3(%arg0: i32) -> (i32, i32) {
    %c0_i32 = arith.constant 0 : i32
    %c0_i32_0 = arith.constant 0 : i32
    %c0_i32_1 = arith.constant 0 : i32
    return %c0_i32, %c0_i32_0 : i32, i32
  }
  func.func @transform_4(%arg0: i32) -> (i32, i32) {
    %c0_i32 = arith.constant 0 : i32
    %c0_i32_0 = arith.constant 0 : i32
    %c0_i32_1 = arith.constant 0 : i32
    return %c0_i32, %c0_i32_0 : i32, i32
  }
  func.func @transform_5(%arg0: i32) -> (i32, i32) {
    %c0_i32 = arith.constant 0 : i32
    %c0_i32_0 = arith.constant 0 : i32
    return %c0_i32, %arg0 : i32, i32
  }
  func.func @transform_6(%arg0: i32) -> (i32, i32) {
    %c0_i32 = arith.constant 0 : i32
    %c0_i32_0 = arith.constant 0 : i32
    return %c0_i32, %arg0 : i32, i32
  }
}

module attributes {stable_mosaic.version = 11 : i64} {
  func.func @_matmul_kernel(%arg0: i32, %arg1: memref<5x8xbf16, #tpu.memory_space<vmem>>, %arg2: memref<8x256xbf16, #tpu.memory_space<vmem>>, %arg3: memref<5x256xf32, #tpu.memory_space<vmem>>, %arg4: memref<1x5x1xf32, #tpu.memory_space<vmem>>, %arg5: memref<1x5x1xf32, #tpu.memory_space<vmem>>) attributes {dimension_semantics = [#tpu.dimension_semantics<parallel>], iteration_bounds = array<i64: 2>, scalar_prefetch = 0 : i64, scratch_operands = 0 : i64, tpu.core_type = #tpu.core_type<tc>, window_params = [{pipeline_mode = #tpu.pipeline_mode<synchronous>, transform_indices = @transform_0, window_bounds = array<i64: 5, 8>}, {transform_indices = @transform_1, window_bounds = array<i64: 8, 256>}, {transform_indices = @transform_2, window_bounds = array<i64: 5, 256>}, {transform_indices = @transform_3, window_bounds = array<i64: 1, 5, 1>}, {transform_indices = @transform_4, window_bounds = array<i64: 1, 5, 1>}]} {
    %c0 = arith.constant 0 : index
    %c0_0 = arith.constant 0 : index
    %0 = vector.load %arg1[%c0, %c0_0] : memref<5x8xbf16, #tpu.memory_space<vmem>>, vector<5x8xbf16>
    %c0_1 = arith.constant 0 : index
    %c0_2 = arith.constant 0 : index
    %1 = vector.load %arg2[%c0_1, %c0_2] : memref<8x256xbf16, #tpu.memory_space<vmem>>, vector<8x256xbf16>
    %cst = arith.constant dense<0.000000e+00> : vector<5x256xf32>
    %2 = tpu.matmul %0, %1, %cst {dimension_numbers = #tpu.dot_dimension_numbers<[1], [0], [0], [1], [0, 0, 1, 1], [], []>} : vector<5x8xbf16>, vector<8x256xbf16>, vector<5x256xf32> -> vector<5x256xf32>
    %c0_3 = arith.constant 0 : index
    %c0_4 = arith.constant 0 : index
    %3 = vector.load %arg3[%c0_3, %c0_4] : memref<5x256xf32, #tpu.memory_space<vmem>>, vector<5x256xf32>
    tpu.vector_store %arg3[%c0_3, %c0_4], %2 {strides = array<i32>} : memref<5x256xf32, #tpu.memory_space<vmem>>, vector<5x256xf32>,
    %cst_5 = arith.constant dense<0.000000e+00> : vector<5xf32>
    %4 = vector.multi_reduction <add>, %2, %cst_5 [1] : vector<5x256xf32> to vector<5xf32>
    %5 = vector.shape_cast %4 : vector<5xf32> to vector<5x1xf32>
    %6 = vector.shape_cast %5 : vector<5x1xf32> to vector<1x5x1xf32>
    %c0_6 = arith.constant 0 : index
    %c0_7 = arith.constant 0 : index
    %c0_8 = arith.constant 0 : index
    %7 = vector.load %arg4[%c0_6, %c0_7, %c0_8] : memref<1x5x1xf32, #tpu.memory_space<vmem>>, vector<1x5x1xf32>
    tpu.vector_store %arg4[%c0_6, %c0_7, %c0_8], %6 {strides = array<i32>} : memref<1x5x1xf32, #tpu.memory_space<vmem>>, vector<1x5x1xf32>,
    %8 = arith.mulf %2, %2 : vector<5x256xf32>
    %cst_9 = arith.constant dense<0.000000e+00> : vector<5xf32>
    %9 = vector.multi_reduction <add>, %8, %cst_9 [1] : vector<5x256xf32> to vector<5xf32>
    %10 = vector.shape_cast %9 : vector<5xf32> to vector<5x1xf32>
    %11 = vector.shape_cast %10 : vector<5x1xf32> to vector<1x5x1xf32>
    %c0_10 = arith.constant 0 : index
    %c0_11 = arith.constant 0 : index
    %c0_12 = arith.constant 0 : index
    %12 = vector.load %arg5[%c0_10, %c0_11, %c0_12] : memref<1x5x1xf32, #tpu.memory_space<vmem>>, vector<1x5x1xf32>
    tpu.vector_store %arg5[%c0_10, %c0_11, %c0_12], %11 {strides = array<i32>} : memref<1x5x1xf32, #tpu.memory_space<vmem>>, vector<1x5x1xf32>,
    return
  }
  func.func @transform_0(%arg0: i32) -> (i32, i32) {
    %c0_i32 = arith.constant 0 : i32
    %c0_i32_0 = arith.constant 0 : i32
    %c0_i32_1 = arith.constant 0 : i32
    return %c0_i32, %c0_i32_0 : i32, i32
  }
  func.func @transform_1(%arg0: i32) -> (i32, i32) {
    %c0_i32 = arith.constant 0 : i32
    %c0_i32_0 = arith.constant 0 : i32
    return %c0_i32, %arg0 : i32, i32
  }
  func.func @transform_2(%arg0: i32) -> (i32, i32) {
    %c0_i32 = arith.constant 0 : i32
    %c0_i32_0 = arith.constant 0 : i32
    return %c0_i32, %arg0 : i32, i32
  }
  func.func @transform_3(%arg0: i32) -> (i32, i32, i32) {
    %c0_i32 = arith.constant 0 : i32
    %c0_i32_0 = arith.constant 0 : i32
    %c0_i32_1 = arith.constant 0 : i32
    return %arg0, %c0_i32, %c0_i32_0 : i32, i32, i32
  }
  func.func @transform_4(%arg0: i32) -> (i32, i32, i32) {
    %c0_i32 = arith.constant 0 : i32
    %c0_i32_0 = arith.constant 0 : i32
    %c0_i32_1 = arith.constant 0 : i32
    return %arg0, %c0_i32, %c0_i32_0 : i32, i32, i32
  }
}

module attributes {stable_mosaic.version = 11 : i64} {
  func.func @_matmul_kernel(%arg0: i32, %arg1: memref<6x8xbf16, #tpu.memory_space<vmem>>, %arg2: memref<8x256xbf16, #tpu.memory_space<vmem>>, %arg3: memref<6x256xf32, #tpu.memory_space<vmem>>, %arg4: memref<1x6x1xf32, #tpu.memory_space<vmem>>, %arg5: memref<1x6x1xf32, #tpu.memory_space<vmem>>) attributes {dimension_semantics = [#tpu.dimension_semantics<parallel>], iteration_bounds = array<i64: 2>, scalar_prefetch = 0 : i64, scratch_operands = 0 : i64, tpu.core_type = #tpu.core_type<tc>, window_params = [{pipeline_mode = #tpu.pipeline_mode<synchronous>, transform_indices = @transform_0, window_bounds = array<i64: 6, 8>}, {transform_indices = @transform_1, window_bounds = array<i64: 8, 256>}, {transform_indices = @transform_2, window_bounds = array<i64: 6, 256>}, {transform_indices = @transform_3, window_bounds = array<i64: 1, 6, 1>}, {transform_indices = @transform_4, window_bounds = array<i64: 1, 6, 1>}]} {
    %c0 = arith.constant 0 : index
    %c0_0 = arith.constant 0 : index
    %0 = vector.load %arg1[%c0, %c0_0] : memref<6x8xbf16, #tpu.memory_space<vmem>>, vector<6x8xbf16>
    %c0_1 = arith.constant 0 : index
    %c0_2 = arith.constant 0 : index
    %1 = vector.load %arg2[%c0_1, %c0_2] : memref<8x256xbf16, #tpu.memory_space<vmem>>, vector<8x256xbf16>
    %cst = arith.constant dense<0.000000e+00> : vector<6x256xf32>
    %2 = tpu.matmul %0, %1, %cst {dimension_numbers = #tpu.dot_dimension_numbers<[1], [0], [0], [1], [0, 0, 1, 1], [], []>} : vector<6x8xbf16>, vector<8x256xbf16>, vector<6x256xf32> -> vector<6x256xf32>
    %c0_3 = arith.constant 0 : index
    %c0_4 = arith.constant 0 : index
    %3 = vector.load %arg3[%c0_3, %c0_4] : memref<6x256xf32, #tpu.memory_space<vmem>>, vector<6x256xf32>
    tpu.vector_store %arg3[%c0_3, %c0_4], %2 {strides = array<i32>} : memref<6x256xf32, #tpu.memory_space<vmem>>, vector<6x256xf32>,
    %cst_5 = arith.constant dense<0.000000e+00> : vector<6xf32>
    %4 = vector.multi_reduction <add>, %2, %cst_5 [1] : vector<6x256xf32> to vector<6xf32>
    %5 = vector.shape_cast %4 : vector<6xf32> to vector<6x1xf32>
    %6 = vector.shape_cast %5 : vector<6x1xf32> to vector<1x6x1xf32>
    %c0_6 = arith.constant 0 : index
    %c0_7 = arith.constant 0 : index
    %c0_8 = arith.constant 0 : index
    %7 = vector.load %arg4[%c0_6, %c0_7, %c0_8] : memref<1x6x1xf32, #tpu.memory_space<vmem>>, vector<1x6x1xf32>
    tpu.vector_store %arg4[%c0_6, %c0_7, %c0_8], %6 {strides = array<i32>} : memref<1x6x1xf32, #tpu.memory_space<vmem>>, vector<1x6x1xf32>,
    %8 = arith.mulf %2, %2 : vector<6x256xf32>
    %cst_9 = arith.constant dense<0.000000e+00> : vector<6xf32>
    %9 = vector.multi_reduction <add>, %8, %cst_9 [1] : vector<6x256xf32> to vector<6xf32>
    %10 = vector.shape_cast %9 : vector<6xf32> to vector<6x1xf32>
    %11 = vector.shape_cast %10 : vector<6x1xf32> to vector<1x6x1xf32>
    %c0_10 = arith.constant 0 : index
    %c0_11 = arith.constant 0 : index
    %c0_12 = arith.constant 0 : index
    %12 = vector.load %arg5[%c0_10, %c0_11, %c0_12] : memref<1x6x1xf32, #tpu.memory_space<vmem>>, vector<1x6x1xf32>
    tpu.vector_store %arg5[%c0_10, %c0_11, %c0_12], %11 {strides = array<i32>} : memref<1x6x1xf32, #tpu.memory_space<vmem>>, vector<1x6x1xf32>,
    return
  }
  func.func @transform_0(%arg0: i32) -> (i32, i32) {
    %c0_i32 = arith.constant 0 : i32
    %c0_i32_0 = arith.constant 0 : i32
    %c0_i32_1 = arith.constant 0 : i32
    return %c0_i32, %c0_i32_0 : i32, i32
  }
  func.func @transform_1(%arg0: i32) -> (i32, i32) {
    %c0_i32 = arith.constant 0 : i32
    %c0_i32_0 = arith.constant 0 : i32
    return %c0_i32, %arg0 : i32, i32
  }
  func.func @transform_2(%arg0: i32) -> (i32, i32) {
    %c0_i32 = arith.constant 0 : i32
    %c0_i32_0 = arith.constant 0 : i32
    return %c0_i32, %arg0 : i32, i32
  }
  func.func @transform_3(%arg0: i32) -> (i32, i32, i32) {
    %c0_i32 = arith.constant 0 : i32
    %c0_i32_0 = arith.constant 0 : i32
    %c0_i32_1 = arith.constant 0 : i32
    return %arg0, %c0_i32, %c0_i32_0 : i32, i32, i32
  }
  func.func @transform_4(%arg0: i32) -> (i32, i32, i32) {
    %c0_i32 = arith.constant 0 : i32
    %c0_i32_0 = arith.constant 0 : i32
    %c0_i32_1 = arith.constant 0 : i32
    return %arg0, %c0_i32, %c0_i32_0 : i32, i32, i32
  }
}

module attributes {stable_mosaic.version = 11 : i64} {
  func.func @_bn_act_kernel(%arg0: i32, %arg1: memref<6x256xf32, #tpu.memory_space<vmem>>, %arg2: memref<2x6x1xf32, #tpu.memory_space<vmem>>, %arg3: memref<2x6x1xf32, #tpu.memory_space<vmem>>, %arg4: memref<6x1xf32, #tpu.memory_space<vmem>>, %arg5: memref<6x1xf32, #tpu.memory_space<vmem>>, %arg6: memref<6x256xf32, #tpu.memory_space<vmem>>) attributes {dimension_semantics = [#tpu.dimension_semantics<parallel>], iteration_bounds = array<i64: 2>, scalar_prefetch = 0 : i64, scratch_operands = 0 : i64, tpu.core_type = #tpu.core_type<tc>, window_params = [{transform_indices = @transform_0, window_bounds = array<i64: 6, 256>}, {pipeline_mode = #tpu.pipeline_mode<synchronous>, transform_indices = @transform_1, window_bounds = array<i64: 2, 6, 1>}, {pipeline_mode = #tpu.pipeline_mode<synchronous>, transform_indices = @transform_2, window_bounds = array<i64: 2, 6, 1>}, {pipeline_mode = #tpu.pipeline_mode<synchronous>, transform_indices = @transform_3, window_bounds = array<i64: 6, 1>}, {pipeline_mode = #tpu.pipeline_mode<synchronous>, transform_indices = @transform_4, window_bounds = array<i64: 6, 1>}, {transform_indices = @transform_5, window_bounds = array<i64: 6, 256>}]} {
    %c0 = arith.constant 0 : index
    %c0_0 = arith.constant 0 : index
    %c0_1 = arith.constant 0 : index
    %0 = vector.load %arg2[%c0, %c0_0, %c0_1] : memref<2x6x1xf32, #tpu.memory_space<vmem>>, vector<2x6x1xf32>
    %cst = arith.constant dense<0.000000e+00> : vector<6x1xf32>
    %1 = vector.multi_reduction <add>, %0, %cst [0] : vector<2x6x1xf32> to vector<6x1xf32>
    %cst_2 = arith.constant 0.001953125 : f32
    %2 = vector.broadcast %cst_2 : f32 to vector<6x1xf32>
    %3 = arith.mulf %1, %2 : vector<6x1xf32>
    %c0_3 = arith.constant 0 : index
    %c0_4 = arith.constant 0 : index
    %c0_5 = arith.constant 0 : index
    %4 = vector.load %arg3[%c0_3, %c0_4, %c0_5] : memref<2x6x1xf32, #tpu.memory_space<vmem>>, vector<2x6x1xf32>
    %cst_6 = arith.constant dense<0.000000e+00> : vector<6x1xf32>
    %5 = vector.multi_reduction <add>, %4, %cst_6 [0] : vector<2x6x1xf32> to vector<6x1xf32>
    %cst_7 = arith.constant 0.001953125 : f32
    %6 = vector.broadcast %cst_7 : f32 to vector<6x1xf32>
    %7 = arith.mulf %5, %6 : vector<6x1xf32>
    %8 = arith.mulf %3, %3 : vector<6x1xf32>
    %9 = arith.subf %7, %8 : vector<6x1xf32>
    %c0_8 = arith.constant 0 : index
    %c0_9 = arith.constant 0 : index
    %10 = vector.load %arg1[%c0_8, %c0_9] : memref<6x256xf32, #tpu.memory_space<vmem>>, vector<6x256xf32>
    %11 = vector.broadcast %3 : vector<6x1xf32> to vector<6x256xf32>
    %12 = arith.subf %10, %11 : vector<6x256xf32>
    %cst_10 = arith.constant 9.99999996E-13 : f32
    %13 = vector.broadcast %cst_10 : f32 to vector<6x1xf32>
    %14 = arith.addf %9, %13 : vector<6x1xf32>
    %15 = math.rsqrt %14 : vector<6x1xf32>
    %16 = vector.broadcast %15 : vector<6x1xf32> to vector<6x256xf32>
    %17 = arith.mulf %12, %16 : vector<6x256xf32>
    %c0_11 = arith.constant 0 : index
    %c0_12 = arith.constant 0 : index
    %18 = vector.load %arg4[%c0_11, %c0_12] : memref<6x1xf32, #tpu.memory_space<vmem>>, vector<6x1xf32>
    %19 = vector.broadcast %18 : vector<6x1xf32> to vector<6x256xf32>
    %20 = arith.mulf %17, %19 : vector<6x256xf32>
    %c0_13 = arith.constant 0 : index
    %c0_14 = arith.constant 0 : index
    %21 = vector.load %arg5[%c0_13, %c0_14] : memref<6x1xf32, #tpu.memory_space<vmem>>, vector<6x1xf32>
    %22 = vector.broadcast %21 : vector<6x1xf32> to vector<6x256xf32>
    %23 = arith.addf %20, %22 : vector<6x256xf32>
    %c0_15 = arith.constant 0 : index
    %c0_16 = arith.constant 0 : index
    %24 = vector.load %arg6[%c0_15, %c0_16] : memref<6x256xf32, #tpu.memory_space<vmem>>, vector<6x256xf32>
    tpu.vector_store %arg6[%c0_15, %c0_16], %23 {strides = array<i32>} : memref<6x256xf32, #tpu.memory_space<vmem>>, vector<6x256xf32>,
    return
  }
  func.func @transform_0(%arg0: i32) -> (i32, i32) {
    %c0_i32 = arith.constant 0 : i32
    %c0_i32_0 = arith.constant 0 : i32
    return %c0_i32, %arg0 : i32, i32
  }
  func.func @transform_1(%arg0: i32) -> (i32, i32, i32) {
    %c0_i32 = arith.constant 0 : i32
    %c0_i32_0 = arith.constant 0 : i32
    %c0_i32_1 = arith.constant 0 : i32
    %c0_i32_2 = arith.constant 0 : i32
    return %c0_i32, %c0_i32_0, %c0_i32_1 : i32, i32, i32
  }
  func.func @transform_2(%arg0: i32) -> (i32, i32, i32) {
    %c0_i32 = arith.constant 0 : i32
    %c0_i32_0 = arith.constant 0 : i32
    %c0_i32_1 = arith.constant 0 : i32
    %c0_i32_2 = arith.constant 0 : i32
    return %c0_i32, %c0_i32_0, %c0_i32_1 : i32, i32, i32
  }
  func.func @transform_3(%arg0: i32) -> (i32, i32) {
    %c0_i32 = arith.constant 0 : i32
    %c0_i32_0 = arith.constant 0 : i32
    %c0_i32_1 = arith.constant 0 : i32
    return %c0_i32, %c0_i32_0 : i32, i32
  }
  func.func @transform_4(%arg0: i32) -> (i32, i32) {
    %c0_i32 = arith.constant 0 : i32
    %c0_i32_0 = arith.constant 0 : i32
    %c0_i32_1 = arith.constant 0 : i32
    return %c0_i32, %c0_i32_0 : i32, i32
  }
  func.func @transform_5(%arg0: i32) -> (i32, i32) {
    %c0_i32 = arith.constant 0 : i32
    %c0_i32_0 = arith.constant 0 : i32
    return %c0_i32, %arg0 : i32, i32
  }
}

module attributes {stable_mosaic.version = 11 : i64} {
  func.func @_matmul_kernel(%arg0: i32, %arg1: memref<6x54xbf16, #tpu.memory_space<vmem>>, %arg2: memref<54x128xbf16, #tpu.memory_space<vmem>>, %arg3: memref<6x1xf32, #tpu.memory_space<vmem>>, %arg4: memref<6x128xf32, #tpu.memory_space<vmem>>) attributes {dimension_semantics = [#tpu.dimension_semantics<parallel>], iteration_bounds = array<i64: 1>, scalar_prefetch = 0 : i64, scratch_operands = 0 : i64, tpu.core_type = #tpu.core_type<tc>, window_params = [{pipeline_mode = #tpu.pipeline_mode<synchronous>, transform_indices = @transform_0, window_bounds = array<i64: 6, 54>}, {transform_indices = @transform_1, window_bounds = array<i64: 54, 128>}, {pipeline_mode = #tpu.pipeline_mode<synchronous>, transform_indices = @transform_2, window_bounds = array<i64: 6, 1>}, {transform_indices = @transform_3, window_bounds = array<i64: 6, 128>}]} {
    %c0 = arith.constant 0 : index
    %c0_0 = arith.constant 0 : index
    %0 = vector.load %arg1[%c0, %c0_0] : memref<6x54xbf16, #tpu.memory_space<vmem>>, vector<6x54xbf16>
    %c0_1 = arith.constant 0 : index
    %c0_2 = arith.constant 0 : index
    %1 = vector.load %arg2[%c0_1, %c0_2] : memref<54x128xbf16, #tpu.memory_space<vmem>>, vector<54x128xbf16>
    %cst = arith.constant dense<0.000000e+00> : vector<6x128xf32>
    %2 = tpu.matmul %0, %1, %cst {dimension_numbers = #tpu.dot_dimension_numbers<[1], [0], [0], [1], [0, 0, 1, 1], [], []>} : vector<6x54xbf16>, vector<54x128xbf16>, vector<6x128xf32> -> vector<6x128xf32>
    %c0_3 = arith.constant 0 : index
    %c0_4 = arith.constant 0 : index
    %3 = vector.load %arg3[%c0_3, %c0_4] : memref<6x1xf32, #tpu.memory_space<vmem>>, vector<6x1xf32>
    %4 = vector.broadcast %3 : vector<6x1xf32> to vector<6x128xf32>
    %5 = arith.addf %2, %4 : vector<6x128xf32>
    %cst_5 = arith.constant 0.000000e+00 : f32
    %6 = vector.broadcast %cst_5 : f32 to vector<6x128xf32>
    %7 = arith.maximumf %5, %6 : vector<6x128xf32>
    %c0_6 = arith.constant 0 : index
    %c0_7 = arith.constant 0 : index
    %8 = vector.load %arg4[%c0_6, %c0_7] : memref<6x128xf32, #tpu.memory_space<vmem>>, vector<6x128xf32>
    tpu.vector_store %arg4[%c0_6, %c0_7], %7 {strides = array<i32>} : memref<6x128xf32, #tpu.memory_space<vmem>>, vector<6x128xf32>,
    return
  }
  func.func @transform_0(%arg0: i32) -> (i32, i32) {
    %c0_i32 = arith.constant 0 : i32
    %c0_i32_0 = arith.constant 0 : i32
    %c0_i32_1 = arith.constant 0 : i32
    return %c0_i32, %c0_i32_0 : i32, i32
  }
  func.func @transform_1(%arg0: i32) -> (i32, i32) {
    %c0_i32 = arith.constant 0 : i32
    %c0_i32_0 = arith.constant 0 : i32
    return %c0_i32, %arg0 : i32, i32
  }
  func.func @transform_2(%arg0: i32) -> (i32, i32) {
    %c0_i32 = arith.constant 0 : i32
    %c0_i32_0 = arith.constant 0 : i32
    %c0_i32_1 = arith.constant 0 : i32
    return %c0_i32, %c0_i32_0 : i32, i32
  }
  func.func @transform_3(%arg0: i32) -> (i32, i32) {
    %c0_i32 = arith.constant 0 : i32
    %c0_i32_0 = arith.constant 0 : i32
    return %c0_i32, %arg0 : i32, i32
  }
}

module attributes {stable_mosaic.version = 11 : i64} {
  func.func @_matmul_kernel(%arg0: i32, %arg1: memref<5x6xbf16, #tpu.memory_space<vmem>>, %arg2: memref<6x128xbf16, #tpu.memory_space<vmem>>, %arg3: memref<5x128xf32, #tpu.memory_space<vmem>>, %arg4: memref<1x5x1xf32, #tpu.memory_space<vmem>>, %arg5: memref<1x5x1xf32, #tpu.memory_space<vmem>>) attributes {dimension_semantics = [#tpu.dimension_semantics<parallel>], iteration_bounds = array<i64: 1>, scalar_prefetch = 0 : i64, scratch_operands = 0 : i64, tpu.core_type = #tpu.core_type<tc>, window_params = [{pipeline_mode = #tpu.pipeline_mode<synchronous>, transform_indices = @transform_0, window_bounds = array<i64: 5, 6>}, {transform_indices = @transform_1, window_bounds = array<i64: 6, 128>}, {transform_indices = @transform_2, window_bounds = array<i64: 5, 128>}, {transform_indices = @transform_3, window_bounds = array<i64: 1, 5, 1>}, {transform_indices = @transform_4, window_bounds = array<i64: 1, 5, 1>}]} {
    %c0 = arith.constant 0 : index
    %c0_0 = arith.constant 0 : index
    %0 = vector.load %arg1[%c0, %c0_0] : memref<5x6xbf16, #tpu.memory_space<vmem>>, vector<5x6xbf16>
    %c0_1 = arith.constant 0 : index
    %c0_2 = arith.constant 0 : index
    %1 = vector.load %arg2[%c0_1, %c0_2] : memref<6x128xbf16, #tpu.memory_space<vmem>>, vector<6x128xbf16>
    %cst = arith.constant dense<0.000000e+00> : vector<5x128xf32>
    %2 = tpu.matmul %0, %1, %cst {dimension_numbers = #tpu.dot_dimension_numbers<[1], [0], [0], [1], [0, 0, 1, 1], [], []>} : vector<5x6xbf16>, vector<6x128xbf16>, vector<5x128xf32> -> vector<5x128xf32>
    %c0_3 = arith.constant 0 : index
    %c0_4 = arith.constant 0 : index
    %3 = vector.load %arg3[%c0_3, %c0_4] : memref<5x128xf32, #tpu.memory_space<vmem>>, vector<5x128xf32>
    tpu.vector_store %arg3[%c0_3, %c0_4], %2 {strides = array<i32>} : memref<5x128xf32, #tpu.memory_space<vmem>>, vector<5x128xf32>,
    %cst_5 = arith.constant dense<0.000000e+00> : vector<5xf32>
    %4 = vector.multi_reduction <add>, %2, %cst_5 [1] : vector<5x128xf32> to vector<5xf32>
    %5 = vector.shape_cast %4 : vector<5xf32> to vector<5x1xf32>
    %6 = vector.shape_cast %5 : vector<5x1xf32> to vector<1x5x1xf32>
    %c0_6 = arith.constant 0 : index
    %c0_7 = arith.constant 0 : index
    %c0_8 = arith.constant 0 : index
    %7 = vector.load %arg4[%c0_6, %c0_7, %c0_8] : memref<1x5x1xf32, #tpu.memory_space<vmem>>, vector<1x5x1xf32>
    tpu.vector_store %arg4[%c0_6, %c0_7, %c0_8], %6 {strides = array<i32>} : memref<1x5x1xf32, #tpu.memory_space<vmem>>, vector<1x5x1xf32>,
    %8 = arith.mulf %2, %2 : vector<5x128xf32>
    %cst_9 = arith.constant dense<0.000000e+00> : vector<5xf32>
    %9 = vector.multi_reduction <add>, %8, %cst_9 [1] : vector<5x128xf32> to vector<5xf32>
    %10 = vector.shape_cast %9 : vector<5xf32> to vector<5x1xf32>
    %11 = vector.shape_cast %10 : vector<5x1xf32> to vector<1x5x1xf32>
    %c0_10 = arith.constant 0 : index
    %c0_11 = arith.constant 0 : index
    %c0_12 = arith.constant 0 : index
    %12 = vector.load %arg5[%c0_10, %c0_11, %c0_12] : memref<1x5x1xf32, #tpu.memory_space<vmem>>, vector<1x5x1xf32>
    tpu.vector_store %arg5[%c0_10, %c0_11, %c0_12], %11 {strides = array<i32>} : memref<1x5x1xf32, #tpu.memory_space<vmem>>, vector<1x5x1xf32>,
    return
  }
  func.func @transform_0(%arg0: i32) -> (i32, i32) {
    %c0_i32 = arith.constant 0 : i32
    %c0_i32_0 = arith.constant 0 : i32
    %c0_i32_1 = arith.constant 0 : i32
    return %c0_i32, %c0_i32_0 : i32, i32
  }
  func.func @transform_1(%arg0: i32) -> (i32, i32) {
    %c0_i32 = arith.constant 0 : i32
    %c0_i32_0 = arith.constant 0 : i32
    return %c0_i32, %arg0 : i32, i32
  }
  func.func @transform_2(%arg0: i32) -> (i32, i32) {
    %c0_i32 = arith.constant 0 : i32
    %c0_i32_0 = arith.constant 0 : i32
    return %c0_i32, %arg0 : i32, i32
  }
  func.func @transform_3(%arg0: i32) -> (i32, i32, i32) {
    %c0_i32 = arith.constant 0 : i32
    %c0_i32_0 = arith.constant 0 : i32
    %c0_i32_1 = arith.constant 0 : i32
    return %arg0, %c0_i32, %c0_i32_0 : i32, i32, i32
  }
  func.func @transform_4(%arg0: i32) -> (i32, i32, i32) {
    %c0_i32 = arith.constant 0 : i32
    %c0_i32_0 = arith.constant 0 : i32
    %c0_i32_1 = arith.constant 0 : i32
    return %arg0, %c0_i32, %c0_i32_0 : i32, i32, i32
  }
}

module attributes {stable_mosaic.version = 11 : i64} {
  func.func @_bn_act_kernel(%arg0: i32, %arg1: memref<5x128xf32, #tpu.memory_space<vmem>>, %arg2: memref<1x5x1xf32, #tpu.memory_space<vmem>>, %arg3: memref<1x5x1xf32, #tpu.memory_space<vmem>>, %arg4: memref<5x1xf32, #tpu.memory_space<vmem>>, %arg5: memref<5x1xf32, #tpu.memory_space<vmem>>, %arg6: memref<5x128xf32, #tpu.memory_space<vmem>>) attributes {dimension_semantics = [#tpu.dimension_semantics<parallel>], iteration_bounds = array<i64: 1>, scalar_prefetch = 0 : i64, scratch_operands = 0 : i64, tpu.core_type = #tpu.core_type<tc>, window_params = [{transform_indices = @transform_0, window_bounds = array<i64: 5, 128>}, {pipeline_mode = #tpu.pipeline_mode<synchronous>, transform_indices = @transform_1, window_bounds = array<i64: 1, 5, 1>}, {pipeline_mode = #tpu.pipeline_mode<synchronous>, transform_indices = @transform_2, window_bounds = array<i64: 1, 5, 1>}, {pipeline_mode = #tpu.pipeline_mode<synchronous>, transform_indices = @transform_3, window_bounds = array<i64: 5, 1>}, {pipeline_mode = #tpu.pipeline_mode<synchronous>, transform_indices = @transform_4, window_bounds = array<i64: 5, 1>}, {transform_indices = @transform_5, window_bounds = array<i64: 5, 128>}]} {
    %c0 = arith.constant 0 : index
    %c0_0 = arith.constant 0 : index
    %c0_1 = arith.constant 0 : index
    %0 = vector.load %arg2[%c0, %c0_0, %c0_1] : memref<1x5x1xf32, #tpu.memory_space<vmem>>, vector<1x5x1xf32>
    %cst = arith.constant dense<0.000000e+00> : vector<5x1xf32>
    %1 = vector.multi_reduction <add>, %0, %cst [0] : vector<1x5x1xf32> to vector<5x1xf32>
    %cst_2 = arith.constant 7.812500e-03 : f32
    %2 = vector.broadcast %cst_2 : f32 to vector<5x1xf32>
    %3 = arith.mulf %1, %2 : vector<5x1xf32>
    %c0_3 = arith.constant 0 : index
    %c0_4 = arith.constant 0 : index
    %c0_5 = arith.constant 0 : index
    %4 = vector.load %arg3[%c0_3, %c0_4, %c0_5] : memref<1x5x1xf32, #tpu.memory_space<vmem>>, vector<1x5x1xf32>
    %cst_6 = arith.constant dense<0.000000e+00> : vector<5x1xf32>
    %5 = vector.multi_reduction <add>, %4, %cst_6 [0] : vector<1x5x1xf32> to vector<5x1xf32>
    %cst_7 = arith.constant 7.812500e-03 : f32
    %6 = vector.broadcast %cst_7 : f32 to vector<5x1xf32>
    %7 = arith.mulf %5, %6 : vector<5x1xf32>
    %8 = arith.mulf %3, %3 : vector<5x1xf32>
    %9 = arith.subf %7, %8 : vector<5x1xf32>
    %c0_8 = arith.constant 0 : index
    %c0_9 = arith.constant 0 : index
    %10 = vector.load %arg1[%c0_8, %c0_9] : memref<5x128xf32, #tpu.memory_space<vmem>>, vector<5x128xf32>
    %11 = vector.broadcast %3 : vector<5x1xf32> to vector<5x128xf32>
    %12 = arith.subf %10, %11 : vector<5x128xf32>
    %cst_10 = arith.constant 9.99999996E-13 : f32
    %13 = vector.broadcast %cst_10 : f32 to vector<5x1xf32>
    %14 = arith.addf %9, %13 : vector<5x1xf32>
    %15 = math.rsqrt %14 : vector<5x1xf32>
    %16 = vector.broadcast %15 : vector<5x1xf32> to vector<5x128xf32>
    %17 = arith.mulf %12, %16 : vector<5x128xf32>
    %c0_11 = arith.constant 0 : index
    %c0_12 = arith.constant 0 : index
    %18 = vector.load %arg4[%c0_11, %c0_12] : memref<5x1xf32, #tpu.memory_space<vmem>>, vector<5x1xf32>
    %19 = vector.broadcast %18 : vector<5x1xf32> to vector<5x128xf32>
    %20 = arith.mulf %17, %19 : vector<5x128xf32>
    %c0_13 = arith.constant 0 : index
    %c0_14 = arith.constant 0 : index
    %21 = vector.load %arg5[%c0_13, %c0_14] : memref<5x1xf32, #tpu.memory_space<vmem>>, vector<5x1xf32>
    %22 = vector.broadcast %21 : vector<5x1xf32> to vector<5x128xf32>
    %23 = arith.addf %20, %22 : vector<5x128xf32>
    %cst_15 = arith.constant 0.000000e+00 : f32
    %24 = vector.broadcast %cst_15 : f32 to vector<5x128xf32>
    %25 = arith.maximumf %23, %24 : vector<5x128xf32>
    %c0_16 = arith.constant 0 : index
    %c0_17 = arith.constant 0 : index
    %26 = vector.load %arg6[%c0_16, %c0_17] : memref<5x128xf32, #tpu.memory_space<vmem>>, vector<5x128xf32>
    tpu.vector_store %arg6[%c0_16, %c0_17], %25 {strides = array<i32>} : memref<5x128xf32, #tpu.memory_space<vmem>>, vector<5x128xf32>,
    return
  }
  func.func @transform_0(%arg0: i32) -> (i32, i32) {
    %c0_i32 = arith.constant 0 : i32
    %c0_i32_0 = arith.constant 0 : i32
    return %c0_i32, %arg0 : i32, i32
  }
  func.func @transform_1(%arg0: i32) -> (i32, i32, i32) {
    %c0_i32 = arith.constant 0 : i32
    %c0_i32_0 = arith.constant 0 : i32
    %c0_i32_1 = arith.constant 0 : i32
    %c0_i32_2 = arith.constant 0 : i32
    return %c0_i32, %c0_i32_0, %c0_i32_1 : i32, i32, i32
  }
  func.func @transform_2(%arg0: i32) -> (i32, i32, i32) {
    %c0_i32 = arith.constant 0 : i32
    %c0_i32_0 = arith.constant 0 : i32
    %c0_i32_1 = arith.constant 0 : i32
    %c0_i32_2 = arith.constant 0 : i32
    return %c0_i32, %c0_i32_0, %c0_i32_1 : i32, i32, i32
  }
  func.func @transform_3(%arg0: i32) -> (i32, i32) {
    %c0_i32 = arith.constant 0 : i32
    %c0_i32_0 = arith.constant 0 : i32
    %c0_i32_1 = arith.constant 0 : i32
    return %c0_i32, %c0_i32_0 : i32, i32
  }
  func.func @transform_4(%arg0: i32) -> (i32, i32) {
    %c0_i32 = arith.constant 0 : i32
    %c0_i32_0 = arith.constant 0 : i32
    %c0_i32_1 = arith.constant 0 : i32
    return %c0_i32, %c0_i32_0 : i32, i32
  }
  func.func @transform_5(%arg0: i32) -> (i32, i32) {
    %c0_i32 = arith.constant 0 : i32
    %c0_i32_0 = arith.constant 0 : i32
    return %c0_i32, %arg0 : i32, i32
  }
}

module attributes {stable_mosaic.version = 11 : i64} {
  func.func @_bn_act_kernel(%arg0: i32, %arg1: memref<6x128xf32, #tpu.memory_space<vmem>>, %arg2: memref<1x6x1xf32, #tpu.memory_space<vmem>>, %arg3: memref<1x6x1xf32, #tpu.memory_space<vmem>>, %arg4: memref<6x1xf32, #tpu.memory_space<vmem>>, %arg5: memref<6x1xf32, #tpu.memory_space<vmem>>, %arg6: memref<6x128xf32, #tpu.memory_space<vmem>>, %arg7: memref<6x128xf32, #tpu.memory_space<vmem>>) attributes {dimension_semantics = [#tpu.dimension_semantics<parallel>], iteration_bounds = array<i64: 1>, scalar_prefetch = 0 : i64, scratch_operands = 0 : i64, tpu.core_type = #tpu.core_type<tc>, window_params = [{transform_indices = @transform_0, window_bounds = array<i64: 6, 128>}, {pipeline_mode = #tpu.pipeline_mode<synchronous>, transform_indices = @transform_1, window_bounds = array<i64: 1, 6, 1>}, {pipeline_mode = #tpu.pipeline_mode<synchronous>, transform_indices = @transform_2, window_bounds = array<i64: 1, 6, 1>}, {pipeline_mode = #tpu.pipeline_mode<synchronous>, transform_indices = @transform_3, window_bounds = array<i64: 6, 1>}, {pipeline_mode = #tpu.pipeline_mode<synchronous>, transform_indices = @transform_4, window_bounds = array<i64: 6, 1>}, {transform_indices = @transform_5, window_bounds = array<i64: 6, 128>}, {transform_indices = @transform_6, window_bounds = array<i64: 6, 128>}]} {
    %c0 = arith.constant 0 : index
    %c0_0 = arith.constant 0 : index
    %c0_1 = arith.constant 0 : index
    %0 = vector.load %arg2[%c0, %c0_0, %c0_1] : memref<1x6x1xf32, #tpu.memory_space<vmem>>, vector<1x6x1xf32>
    %cst = arith.constant dense<0.000000e+00> : vector<6x1xf32>
    %1 = vector.multi_reduction <add>, %0, %cst [0] : vector<1x6x1xf32> to vector<6x1xf32>
    %cst_2 = arith.constant 7.812500e-03 : f32
    %2 = vector.broadcast %cst_2 : f32 to vector<6x1xf32>
    %3 = arith.mulf %1, %2 : vector<6x1xf32>
    %c0_3 = arith.constant 0 : index
    %c0_4 = arith.constant 0 : index
    %c0_5 = arith.constant 0 : index
    %4 = vector.load %arg3[%c0_3, %c0_4, %c0_5] : memref<1x6x1xf32, #tpu.memory_space<vmem>>, vector<1x6x1xf32>
    %cst_6 = arith.constant dense<0.000000e+00> : vector<6x1xf32>
    %5 = vector.multi_reduction <add>, %4, %cst_6 [0] : vector<1x6x1xf32> to vector<6x1xf32>
    %cst_7 = arith.constant 7.812500e-03 : f32
    %6 = vector.broadcast %cst_7 : f32 to vector<6x1xf32>
    %7 = arith.mulf %5, %6 : vector<6x1xf32>
    %8 = arith.mulf %3, %3 : vector<6x1xf32>
    %9 = arith.subf %7, %8 : vector<6x1xf32>
    %c0_8 = arith.constant 0 : index
    %c0_9 = arith.constant 0 : index
    %10 = vector.load %arg1[%c0_8, %c0_9] : memref<6x128xf32, #tpu.memory_space<vmem>>, vector<6x128xf32>
    %11 = vector.broadcast %3 : vector<6x1xf32> to vector<6x128xf32>
    %12 = arith.subf %10, %11 : vector<6x128xf32>
    %cst_10 = arith.constant 9.99999996E-13 : f32
    %13 = vector.broadcast %cst_10 : f32 to vector<6x1xf32>
    %14 = arith.addf %9, %13 : vector<6x1xf32>
    %15 = math.rsqrt %14 : vector<6x1xf32>
    %16 = vector.broadcast %15 : vector<6x1xf32> to vector<6x128xf32>
    %17 = arith.mulf %12, %16 : vector<6x128xf32>
    %c0_11 = arith.constant 0 : index
    %c0_12 = arith.constant 0 : index
    %18 = vector.load %arg4[%c0_11, %c0_12] : memref<6x1xf32, #tpu.memory_space<vmem>>, vector<6x1xf32>
    %19 = vector.broadcast %18 : vector<6x1xf32> to vector<6x128xf32>
    %20 = arith.mulf %17, %19 : vector<6x128xf32>
    %c0_13 = arith.constant 0 : index
    %c0_14 = arith.constant 0 : index
    %21 = vector.load %arg5[%c0_13, %c0_14] : memref<6x1xf32, #tpu.memory_space<vmem>>, vector<6x1xf32>
    %22 = vector.broadcast %21 : vector<6x1xf32> to vector<6x128xf32>
    %23 = arith.addf %20, %22 : vector<6x128xf32>
    %c0_15 = arith.constant 0 : index
    %c0_16 = arith.constant 0 : index
    %24 = vector.load %arg6[%c0_15, %c0_16] : memref<6x128xf32, #tpu.memory_space<vmem>>, vector<6x128xf32>
    %25 = arith.addf %23, %24 : vector<6x128xf32>
    %c0_17 = arith.constant 0 : index
    %c0_18 = arith.constant 0 : index
    %26 = vector.load %arg7[%c0_17, %c0_18] : memref<6x128xf32, #tpu.memory_space<vmem>>, vector<6x128xf32>
    tpu.vector_store %arg7[%c0_17, %c0_18], %25 {strides = array<i32>} : memref<6x128xf32, #tpu.memory_space<vmem>>, vector<6x128xf32>,
    return
  }
  func.func @transform_0(%arg0: i32) -> (i32, i32) {
    %c0_i32 = arith.constant 0 : i32
    %c0_i32_0 = arith.constant 0 : i32
    return %c0_i32, %arg0 : i32, i32
  }
  func.func @transform_1(%arg0: i32) -> (i32, i32, i32) {
    %c0_i32 = arith.constant 0 : i32
    %c0_i32_0 = arith.constant 0 : i32
    %c0_i32_1 = arith.constant 0 : i32
    %c0_i32_2 = arith.constant 0 : i32
    return %c0_i32, %c0_i32_0, %c0_i32_1 : i32, i32, i32
  }
  func.func @transform_2(%arg0: i32) -> (i32, i32, i32) {
    %c0_i32 = arith.constant 0 : i32
    %c0_i32_0 = arith.constant 0 : i32
    %c0_i32_1 = arith.constant 0 : i32
    %c0_i32_2 = arith.constant 0 : i32
    return %c0_i32, %c0_i32_0, %c0_i32_1 : i32, i32, i32
  }
  func.func @transform_3(%arg0: i32) -> (i32, i32) {
    %c0_i32 = arith.constant 0 : i32
    %c0_i32_0 = arith.constant 0 : i32
    %c0_i32_1 = arith.constant 0 : i32
    return %c0_i32, %c0_i32_0 : i32, i32
  }
  func.func @transform_4(%arg0: i32) -> (i32, i32) {
    %c0_i32 = arith.constant 0 : i32
    %c0_i32_0 = arith.constant 0 : i32
    %c0_i32_1 = arith.constant 0 : i32
    return %c0_i32, %c0_i32_0 : i32, i32
  }
  func.func @transform_5(%arg0: i32) -> (i32, i32) {
    %c0_i32 = arith.constant 0 : i32
    %c0_i32_0 = arith.constant 0 : i32
    return %c0_i32, %arg0 : i32, i32
  }
  func.func @transform_6(%arg0: i32) -> (i32, i32) {
    %c0_i32 = arith.constant 0 : i32
    %c0_i32_0 = arith.constant 0 : i32
    return %c0_i32, %arg0 : i32, i32
  }
}

module attributes {stable_mosaic.version = 11 : i64} {
  func.func @_matmul_kernel(%arg0: i32, %arg1: memref<5x45xbf16, #tpu.memory_space<vmem>>, %arg2: memref<45x128xbf16, #tpu.memory_space<vmem>>, %arg3: memref<5x128xf32, #tpu.memory_space<vmem>>, %arg4: memref<1x5x1xf32, #tpu.memory_space<vmem>>, %arg5: memref<1x5x1xf32, #tpu.memory_space<vmem>>) attributes {dimension_semantics = [#tpu.dimension_semantics<parallel>], iteration_bounds = array<i64: 1>, scalar_prefetch = 0 : i64, scratch_operands = 0 : i64, tpu.core_type = #tpu.core_type<tc>, window_params = [{pipeline_mode = #tpu.pipeline_mode<synchronous>, transform_indices = @transform_0, window_bounds = array<i64: 5, 45>}, {transform_indices = @transform_1, window_bounds = array<i64: 45, 128>}, {transform_indices = @transform_2, window_bounds = array<i64: 5, 128>}, {transform_indices = @transform_3, window_bounds = array<i64: 1, 5, 1>}, {transform_indices = @transform_4, window_bounds = array<i64: 1, 5, 1>}]} {
    %c0 = arith.constant 0 : index
    %c0_0 = arith.constant 0 : index
    %0 = vector.load %arg1[%c0, %c0_0] : memref<5x45xbf16, #tpu.memory_space<vmem>>, vector<5x45xbf16>
    %c0_1 = arith.constant 0 : index
    %c0_2 = arith.constant 0 : index
    %1 = vector.load %arg2[%c0_1, %c0_2] : memref<45x128xbf16, #tpu.memory_space<vmem>>, vector<45x128xbf16>
    %cst = arith.constant dense<0.000000e+00> : vector<5x128xf32>
    %2 = tpu.matmul %0, %1, %cst {dimension_numbers = #tpu.dot_dimension_numbers<[1], [0], [0], [1], [0, 0, 1, 1], [], []>} : vector<5x45xbf16>, vector<45x128xbf16>, vector<5x128xf32> -> vector<5x128xf32>
    %c0_3 = arith.constant 0 : index
    %c0_4 = arith.constant 0 : index
    %3 = vector.load %arg3[%c0_3, %c0_4] : memref<5x128xf32, #tpu.memory_space<vmem>>, vector<5x128xf32>
    tpu.vector_store %arg3[%c0_3, %c0_4], %2 {strides = array<i32>} : memref<5x128xf32, #tpu.memory_space<vmem>>, vector<5x128xf32>,
    %cst_5 = arith.constant dense<0.000000e+00> : vector<5xf32>
    %4 = vector.multi_reduction <add>, %2, %cst_5 [1] : vector<5x128xf32> to vector<5xf32>
    %5 = vector.shape_cast %4 : vector<5xf32> to vector<5x1xf32>
    %6 = vector.shape_cast %5 : vector<5x1xf32> to vector<1x5x1xf32>
    %c0_6 = arith.constant 0 : index
    %c0_7 = arith.constant 0 : index
    %c0_8 = arith.constant 0 : index
    %7 = vector.load %arg4[%c0_6, %c0_7, %c0_8] : memref<1x5x1xf32, #tpu.memory_space<vmem>>, vector<1x5x1xf32>
    tpu.vector_store %arg4[%c0_6, %c0_7, %c0_8], %6 {strides = array<i32>} : memref<1x5x1xf32, #tpu.memory_space<vmem>>, vector<1x5x1xf32>,
    %8 = arith.mulf %2, %2 : vector<5x128xf32>
    %cst_9 = arith.constant dense<0.000000e+00> : vector<5xf32>
    %9 = vector.multi_reduction <add>, %8, %cst_9 [1] : vector<5x128xf32> to vector<5xf32>
    %10 = vector.shape_cast %9 : vector<5xf32> to vector<5x1xf32>
    %11 = vector.shape_cast %10 : vector<5x1xf32> to vector<1x5x1xf32>
    %c0_10 = arith.constant 0 : index
    %c0_11 = arith.constant 0 : index
    %c0_12 = arith.constant 0 : index
    %12 = vector.load %arg5[%c0_10, %c0_11, %c0_12] : memref<1x5x1xf32, #tpu.memory_space<vmem>>, vector<1x5x1xf32>
    tpu.vector_store %arg5[%c0_10, %c0_11, %c0_12], %11 {strides = array<i32>} : memref<1x5x1xf32, #tpu.memory_space<vmem>>, vector<1x5x1xf32>,
    return
  }
  func.func @transform_0(%arg0: i32) -> (i32, i32) {
    %c0_i32 = arith.constant 0 : i32
    %c0_i32_0 = arith.constant 0 : i32
    %c0_i32_1 = arith.constant 0 : i32
    return %c0_i32, %c0_i32_0 : i32, i32
  }
  func.func @transform_1(%arg0: i32) -> (i32, i32) {
    %c0_i32 = arith.constant 0 : i32
    %c0_i32_0 = arith.constant 0 : i32
    return %c0_i32, %arg0 : i32, i32
  }
  func.func @transform_2(%arg0: i32) -> (i32, i32) {
    %c0_i32 = arith.constant 0 : i32
    %c0_i32_0 = arith.constant 0 : i32
    return %c0_i32, %arg0 : i32, i32
  }
  func.func @transform_3(%arg0: i32) -> (i32, i32, i32) {
    %c0_i32 = arith.constant 0 : i32
    %c0_i32_0 = arith.constant 0 : i32
    %c0_i32_1 = arith.constant 0 : i32
    return %arg0, %c0_i32, %c0_i32_0 : i32, i32, i32
  }
  func.func @transform_4(%arg0: i32) -> (i32, i32, i32) {
    %c0_i32 = arith.constant 0 : i32
    %c0_i32_0 = arith.constant 0 : i32
    %c0_i32_1 = arith.constant 0 : i32
    return %arg0, %c0_i32, %c0_i32_0 : i32, i32, i32
  }
}

module attributes {stable_mosaic.version = 11 : i64} {
  func.func @_matmul_kernel(%arg0: i32, %arg1: memref<6x5xbf16, #tpu.memory_space<vmem>>, %arg2: memref<5x128xbf16, #tpu.memory_space<vmem>>, %arg3: memref<6x128xf32, #tpu.memory_space<vmem>>, %arg4: memref<1x6x1xf32, #tpu.memory_space<vmem>>, %arg5: memref<1x6x1xf32, #tpu.memory_space<vmem>>) attributes {dimension_semantics = [#tpu.dimension_semantics<parallel>], iteration_bounds = array<i64: 1>, scalar_prefetch = 0 : i64, scratch_operands = 0 : i64, tpu.core_type = #tpu.core_type<tc>, window_params = [{pipeline_mode = #tpu.pipeline_mode<synchronous>, transform_indices = @transform_0, window_bounds = array<i64: 6, 5>}, {transform_indices = @transform_1, window_bounds = array<i64: 5, 128>}, {transform_indices = @transform_2, window_bounds = array<i64: 6, 128>}, {transform_indices = @transform_3, window_bounds = array<i64: 1, 6, 1>}, {transform_indices = @transform_4, window_bounds = array<i64: 1, 6, 1>}]} {
    %c0 = arith.constant 0 : index
    %c0_0 = arith.constant 0 : index
    %0 = vector.load %arg1[%c0, %c0_0] : memref<6x5xbf16, #tpu.memory_space<vmem>>, vector<6x5xbf16>
    %c0_1 = arith.constant 0 : index
    %c0_2 = arith.constant 0 : index
    %1 = vector.load %arg2[%c0_1, %c0_2] : memref<5x128xbf16, #tpu.memory_space<vmem>>, vector<5x128xbf16>
    %cst = arith.constant dense<0.000000e+00> : vector<6x128xf32>
    %2 = tpu.matmul %0, %1, %cst {dimension_numbers = #tpu.dot_dimension_numbers<[1], [0], [0], [1], [0, 0, 1, 1], [], []>} : vector<6x5xbf16>, vector<5x128xbf16>, vector<6x128xf32> -> vector<6x128xf32>
    %c0_3 = arith.constant 0 : index
    %c0_4 = arith.constant 0 : index
    %3 = vector.load %arg3[%c0_3, %c0_4] : memref<6x128xf32, #tpu.memory_space<vmem>>, vector<6x128xf32>
    tpu.vector_store %arg3[%c0_3, %c0_4], %2 {strides = array<i32>} : memref<6x128xf32, #tpu.memory_space<vmem>>, vector<6x128xf32>,
    %cst_5 = arith.constant dense<0.000000e+00> : vector<6xf32>
    %4 = vector.multi_reduction <add>, %2, %cst_5 [1] : vector<6x128xf32> to vector<6xf32>
    %5 = vector.shape_cast %4 : vector<6xf32> to vector<6x1xf32>
    %6 = vector.shape_cast %5 : vector<6x1xf32> to vector<1x6x1xf32>
    %c0_6 = arith.constant 0 : index
    %c0_7 = arith.constant 0 : index
    %c0_8 = arith.constant 0 : index
    %7 = vector.load %arg4[%c0_6, %c0_7, %c0_8] : memref<1x6x1xf32, #tpu.memory_space<vmem>>, vector<1x6x1xf32>
    tpu.vector_store %arg4[%c0_6, %c0_7, %c0_8], %6 {strides = array<i32>} : memref<1x6x1xf32, #tpu.memory_space<vmem>>, vector<1x6x1xf32>,
    %8 = arith.mulf %2, %2 : vector<6x128xf32>
    %cst_9 = arith.constant dense<0.000000e+00> : vector<6xf32>
    %9 = vector.multi_reduction <add>, %8, %cst_9 [1] : vector<6x128xf32> to vector<6xf32>
    %10 = vector.shape_cast %9 : vector<6xf32> to vector<6x1xf32>
    %11 = vector.shape_cast %10 : vector<6x1xf32> to vector<1x6x1xf32>
    %c0_10 = arith.constant 0 : index
    %c0_11 = arith.constant 0 : index
    %c0_12 = arith.constant 0 : index
    %12 = vector.load %arg5[%c0_10, %c0_11, %c0_12] : memref<1x6x1xf32, #tpu.memory_space<vmem>>, vector<1x6x1xf32>
    tpu.vector_store %arg5[%c0_10, %c0_11, %c0_12], %11 {strides = array<i32>} : memref<1x6x1xf32, #tpu.memory_space<vmem>>, vector<1x6x1xf32>,
    return
  }
  func.func @transform_0(%arg0: i32) -> (i32, i32) {
    %c0_i32 = arith.constant 0 : i32
    %c0_i32_0 = arith.constant 0 : i32
    %c0_i32_1 = arith.constant 0 : i32
    return %c0_i32, %c0_i32_0 : i32, i32
  }
  func.func @transform_1(%arg0: i32) -> (i32, i32) {
    %c0_i32 = arith.constant 0 : i32
    %c0_i32_0 = arith.constant 0 : i32
    return %c0_i32, %arg0 : i32, i32
  }
  func.func @transform_2(%arg0: i32) -> (i32, i32) {
    %c0_i32 = arith.constant 0 : i32
    %c0_i32_0 = arith.constant 0 : i32
    return %c0_i32, %arg0 : i32, i32
  }
  func.func @transform_3(%arg0: i32) -> (i32, i32, i32) {
    %c0_i32 = arith.constant 0 : i32
    %c0_i32_0 = arith.constant 0 : i32
    %c0_i32_1 = arith.constant 0 : i32
    return %arg0, %c0_i32, %c0_i32_0 : i32, i32, i32
  }
  func.func @transform_4(%arg0: i32) -> (i32, i32, i32) {
    %c0_i32 = arith.constant 0 : i32
    %c0_i32_0 = arith.constant 0 : i32
    %c0_i32_1 = arith.constant 0 : i32
    return %arg0, %c0_i32, %c0_i32_0 : i32, i32, i32
  }
}

module attributes {stable_mosaic.version = 11 : i64} {
  func.func @_matmul_kernel(%arg0: i32, %arg1: memref<6x6xbf16, #tpu.memory_space<vmem>>, %arg2: memref<6x128xbf16, #tpu.memory_space<vmem>>, %arg3: memref<6x128xf32, #tpu.memory_space<vmem>>, %arg4: memref<1x6x1xf32, #tpu.memory_space<vmem>>, %arg5: memref<1x6x1xf32, #tpu.memory_space<vmem>>) attributes {dimension_semantics = [#tpu.dimension_semantics<parallel>], iteration_bounds = array<i64: 1>, scalar_prefetch = 0 : i64, scratch_operands = 0 : i64, tpu.core_type = #tpu.core_type<tc>, window_params = [{pipeline_mode = #tpu.pipeline_mode<synchronous>, transform_indices = @transform_0, window_bounds = array<i64: 6, 6>}, {transform_indices = @transform_1, window_bounds = array<i64: 6, 128>}, {transform_indices = @transform_2, window_bounds = array<i64: 6, 128>}, {transform_indices = @transform_3, window_bounds = array<i64: 1, 6, 1>}, {transform_indices = @transform_4, window_bounds = array<i64: 1, 6, 1>}]} {
    %c0 = arith.constant 0 : index
    %c0_0 = arith.constant 0 : index
    %0 = vector.load %arg1[%c0, %c0_0] : memref<6x6xbf16, #tpu.memory_space<vmem>>, vector<6x6xbf16>
    %c0_1 = arith.constant 0 : index
    %c0_2 = arith.constant 0 : index
    %1 = vector.load %arg2[%c0_1, %c0_2] : memref<6x128xbf16, #tpu.memory_space<vmem>>, vector<6x128xbf16>
    %cst = arith.constant dense<0.000000e+00> : vector<6x128xf32>
    %2 = tpu.matmul %0, %1, %cst {dimension_numbers = #tpu.dot_dimension_numbers<[1], [0], [0], [1], [0, 0, 1, 1], [], []>} : vector<6x6xbf16>, vector<6x128xbf16>, vector<6x128xf32> -> vector<6x128xf32>
    %c0_3 = arith.constant 0 : index
    %c0_4 = arith.constant 0 : index
    %3 = vector.load %arg3[%c0_3, %c0_4] : memref<6x128xf32, #tpu.memory_space<vmem>>, vector<6x128xf32>
    tpu.vector_store %arg3[%c0_3, %c0_4], %2 {strides = array<i32>} : memref<6x128xf32, #tpu.memory_space<vmem>>, vector<6x128xf32>,
    %cst_5 = arith.constant dense<0.000000e+00> : vector<6xf32>
    %4 = vector.multi_reduction <add>, %2, %cst_5 [1] : vector<6x128xf32> to vector<6xf32>
    %5 = vector.shape_cast %4 : vector<6xf32> to vector<6x1xf32>
    %6 = vector.shape_cast %5 : vector<6x1xf32> to vector<1x6x1xf32>
    %c0_6 = arith.constant 0 : index
    %c0_7 = arith.constant 0 : index
    %c0_8 = arith.constant 0 : index
    %7 = vector.load %arg4[%c0_6, %c0_7, %c0_8] : memref<1x6x1xf32, #tpu.memory_space<vmem>>, vector<1x6x1xf32>
    tpu.vector_store %arg4[%c0_6, %c0_7, %c0_8], %6 {strides = array<i32>} : memref<1x6x1xf32, #tpu.memory_space<vmem>>, vector<1x6x1xf32>,
    %8 = arith.mulf %2, %2 : vector<6x128xf32>
    %cst_9 = arith.constant dense<0.000000e+00> : vector<6xf32>
    %9 = vector.multi_reduction <add>, %8, %cst_9 [1] : vector<6x128xf32> to vector<6xf32>
    %10 = vector.shape_cast %9 : vector<6xf32> to vector<6x1xf32>
    %11 = vector.shape_cast %10 : vector<6x1xf32> to vector<1x6x1xf32>
    %c0_10 = arith.constant 0 : index
    %c0_11 = arith.constant 0 : index
    %c0_12 = arith.constant 0 : index
    %12 = vector.load %arg5[%c0_10, %c0_11, %c0_12] : memref<1x6x1xf32, #tpu.memory_space<vmem>>, vector<1x6x1xf32>
    tpu.vector_store %arg5[%c0_10, %c0_11, %c0_12], %11 {strides = array<i32>} : memref<1x6x1xf32, #tpu.memory_space<vmem>>, vector<1x6x1xf32>,
    return
  }
  func.func @transform_0(%arg0: i32) -> (i32, i32) {
    %c0_i32 = arith.constant 0 : i32
    %c0_i32_0 = arith.constant 0 : i32
    %c0_i32_1 = arith.constant 0 : i32
    return %c0_i32, %c0_i32_0 : i32, i32
  }
  func.func @transform_1(%arg0: i32) -> (i32, i32) {
    %c0_i32 = arith.constant 0 : i32
    %c0_i32_0 = arith.constant 0 : i32
    return %c0_i32, %arg0 : i32, i32
  }
  func.func @transform_2(%arg0: i32) -> (i32, i32) {
    %c0_i32 = arith.constant 0 : i32
    %c0_i32_0 = arith.constant 0 : i32
    return %c0_i32, %arg0 : i32, i32
  }
  func.func @transform_3(%arg0: i32) -> (i32, i32, i32) {
    %c0_i32 = arith.constant 0 : i32
    %c0_i32_0 = arith.constant 0 : i32
    %c0_i32_1 = arith.constant 0 : i32
    return %arg0, %c0_i32, %c0_i32_0 : i32, i32, i32
  }
  func.func @transform_4(%arg0: i32) -> (i32, i32, i32) {
    %c0_i32 = arith.constant 0 : i32
    %c0_i32_0 = arith.constant 0 : i32
    %c0_i32_1 = arith.constant 0 : i32
    return %arg0, %c0_i32, %c0_i32_0 : i32, i32, i32
  }
}

module attributes {stable_mosaic.version = 11 : i64} {
  func.func @_add_n_kernel(%arg0: i32, %arg1: memref<6x128xf32, #tpu.memory_space<vmem>>, %arg2: memref<6x128xf32, #tpu.memory_space<vmem>>, %arg3: memref<6x128xf32, #tpu.memory_space<vmem>>) attributes {dimension_semantics = [#tpu.dimension_semantics<parallel>], iteration_bounds = array<i64: 1>, scalar_prefetch = 0 : i64, scratch_operands = 0 : i64, tpu.core_type = #tpu.core_type<tc>, window_params = [{transform_indices = @transform_0, window_bounds = array<i64: 6, 128>}, {transform_indices = @transform_1, window_bounds = array<i64: 6, 128>}, {transform_indices = @transform_2, window_bounds = array<i64: 6, 128>}]} {
    %c0 = arith.constant 0 : index
    %c0_0 = arith.constant 0 : index
    %0 = vector.load %arg1[%c0, %c0_0] : memref<6x128xf32, #tpu.memory_space<vmem>>, vector<6x128xf32>
    %c0_1 = arith.constant 0 : index
    %c0_2 = arith.constant 0 : index
    %1 = vector.load %arg2[%c0_1, %c0_2] : memref<6x128xf32, #tpu.memory_space<vmem>>, vector<6x128xf32>
    %2 = arith.addf %0, %1 : vector<6x128xf32>
    %c0_3 = arith.constant 0 : index
    %c0_4 = arith.constant 0 : index
    %3 = vector.load %arg3[%c0_3, %c0_4] : memref<6x128xf32, #tpu.memory_space<vmem>>, vector<6x128xf32>
    tpu.vector_store %arg3[%c0_3, %c0_4], %2 {strides = array<i32>} : memref<6x128xf32, #tpu.memory_space<vmem>>, vector<6x128xf32>,
    return
  }
  func.func @transform_0(%arg0: i32) -> (i32, i32) {
    %c0_i32 = arith.constant 0 : i32
    %c0_i32_0 = arith.constant 0 : i32
    return %c0_i32, %arg0 : i32, i32
  }
  func.func @transform_1(%arg0: i32) -> (i32, i32) {
    %c0_i32 = arith.constant 0 : i32
    %c0_i32_0 = arith.constant 0 : i32
    return %c0_i32, %arg0 : i32, i32
  }
  func.func @transform_2(%arg0: i32) -> (i32, i32) {
    %c0_i32 = arith.constant 0 : i32
    %c0_i32_0 = arith.constant 0 : i32
    return %c0_i32, %arg0 : i32, i32
  }
}

module attributes {stable_mosaic.version = 11 : i64} {
  func.func @_bn_act_kernel(%arg0: i32, %arg1: memref<6x128xf32, #tpu.memory_space<vmem>>, %arg2: memref<1x6x1xf32, #tpu.memory_space<vmem>>, %arg3: memref<1x6x1xf32, #tpu.memory_space<vmem>>, %arg4: memref<6x1xf32, #tpu.memory_space<vmem>>, %arg5: memref<6x1xf32, #tpu.memory_space<vmem>>, %arg6: memref<6x128xf32, #tpu.memory_space<vmem>>) attributes {dimension_semantics = [#tpu.dimension_semantics<parallel>], iteration_bounds = array<i64: 1>, scalar_prefetch = 0 : i64, scratch_operands = 0 : i64, tpu.core_type = #tpu.core_type<tc>, window_params = [{transform_indices = @transform_0, window_bounds = array<i64: 6, 128>}, {pipeline_mode = #tpu.pipeline_mode<synchronous>, transform_indices = @transform_1, window_bounds = array<i64: 1, 6, 1>}, {pipeline_mode = #tpu.pipeline_mode<synchronous>, transform_indices = @transform_2, window_bounds = array<i64: 1, 6, 1>}, {pipeline_mode = #tpu.pipeline_mode<synchronous>, transform_indices = @transform_3, window_bounds = array<i64: 6, 1>}, {pipeline_mode = #tpu.pipeline_mode<synchronous>, transform_indices = @transform_4, window_bounds = array<i64: 6, 1>}, {transform_indices = @transform_5, window_bounds = array<i64: 6, 128>}]} {
    %c0 = arith.constant 0 : index
    %c0_0 = arith.constant 0 : index
    %c0_1 = arith.constant 0 : index
    %0 = vector.load %arg2[%c0, %c0_0, %c0_1] : memref<1x6x1xf32, #tpu.memory_space<vmem>>, vector<1x6x1xf32>
    %cst = arith.constant dense<0.000000e+00> : vector<6x1xf32>
    %1 = vector.multi_reduction <add>, %0, %cst [0] : vector<1x6x1xf32> to vector<6x1xf32>
    %cst_2 = arith.constant 7.812500e-03 : f32
    %2 = vector.broadcast %cst_2 : f32 to vector<6x1xf32>
    %3 = arith.mulf %1, %2 : vector<6x1xf32>
    %c0_3 = arith.constant 0 : index
    %c0_4 = arith.constant 0 : index
    %c0_5 = arith.constant 0 : index
    %4 = vector.load %arg3[%c0_3, %c0_4, %c0_5] : memref<1x6x1xf32, #tpu.memory_space<vmem>>, vector<1x6x1xf32>
    %cst_6 = arith.constant dense<0.000000e+00> : vector<6x1xf32>
    %5 = vector.multi_reduction <add>, %4, %cst_6 [0] : vector<1x6x1xf32> to vector<6x1xf32>
    %cst_7 = arith.constant 7.812500e-03 : f32
    %6 = vector.broadcast %cst_7 : f32 to vector<6x1xf32>
    %7 = arith.mulf %5, %6 : vector<6x1xf32>
    %8 = arith.mulf %3, %3 : vector<6x1xf32>
    %9 = arith.subf %7, %8 : vector<6x1xf32>
    %c0_8 = arith.constant 0 : index
    %c0_9 = arith.constant 0 : index
    %10 = vector.load %arg1[%c0_8, %c0_9] : memref<6x128xf32, #tpu.memory_space<vmem>>, vector<6x128xf32>
    %11 = vector.broadcast %3 : vector<6x1xf32> to vector<6x128xf32>
    %12 = arith.subf %10, %11 : vector<6x128xf32>
    %cst_10 = arith.constant 9.99999996E-13 : f32
    %13 = vector.broadcast %cst_10 : f32 to vector<6x1xf32>
    %14 = arith.addf %9, %13 : vector<6x1xf32>
    %15 = math.rsqrt %14 : vector<6x1xf32>
    %16 = vector.broadcast %15 : vector<6x1xf32> to vector<6x128xf32>
    %17 = arith.mulf %12, %16 : vector<6x128xf32>
    %c0_11 = arith.constant 0 : index
    %c0_12 = arith.constant 0 : index
    %18 = vector.load %arg4[%c0_11, %c0_12] : memref<6x1xf32, #tpu.memory_space<vmem>>, vector<6x1xf32>
    %19 = vector.broadcast %18 : vector<6x1xf32> to vector<6x128xf32>
    %20 = arith.mulf %17, %19 : vector<6x128xf32>
    %c0_13 = arith.constant 0 : index
    %c0_14 = arith.constant 0 : index
    %21 = vector.load %arg5[%c0_13, %c0_14] : memref<6x1xf32, #tpu.memory_space<vmem>>, vector<6x1xf32>
    %22 = vector.broadcast %21 : vector<6x1xf32> to vector<6x128xf32>
    %23 = arith.addf %20, %22 : vector<6x128xf32>
    %c0_15 = arith.constant 0 : index
    %c0_16 = arith.constant 0 : index
    %24 = vector.load %arg6[%c0_15, %c0_16] : memref<6x128xf32, #tpu.memory_space<vmem>>, vector<6x128xf32>
    tpu.vector_store %arg6[%c0_15, %c0_16], %23 {strides = array<i32>} : memref<6x128xf32, #tpu.memory_space<vmem>>, vector<6x128xf32>,
    return
  }
  func.func @transform_0(%arg0: i32) -> (i32, i32) {
    %c0_i32 = arith.constant 0 : i32
    %c0_i32_0 = arith.constant 0 : i32
    return %c0_i32, %arg0 : i32, i32
  }
  func.func @transform_1(%arg0: i32) -> (i32, i32, i32) {
    %c0_i32 = arith.constant 0 : i32
    %c0_i32_0 = arith.constant 0 : i32
    %c0_i32_1 = arith.constant 0 : i32
    %c0_i32_2 = arith.constant 0 : i32
    return %c0_i32, %c0_i32_0, %c0_i32_1 : i32, i32, i32
  }
  func.func @transform_2(%arg0: i32) -> (i32, i32, i32) {
    %c0_i32 = arith.constant 0 : i32
    %c0_i32_0 = arith.constant 0 : i32
    %c0_i32_1 = arith.constant 0 : i32
    %c0_i32_2 = arith.constant 0 : i32
    return %c0_i32, %c0_i32_0, %c0_i32_1 : i32, i32, i32
  }
  func.func @transform_3(%arg0: i32) -> (i32, i32) {
    %c0_i32 = arith.constant 0 : i32
    %c0_i32_0 = arith.constant 0 : i32
    %c0_i32_1 = arith.constant 0 : i32
    return %c0_i32, %c0_i32_0 : i32, i32
  }
  func.func @transform_4(%arg0: i32) -> (i32, i32) {
    %c0_i32 = arith.constant 0 : i32
    %c0_i32_0 = arith.constant 0 : i32
    %c0_i32_1 = arith.constant 0 : i32
    return %c0_i32, %c0_i32_0 : i32, i32
  }
  func.func @transform_5(%arg0: i32) -> (i32, i32) {
    %c0_i32 = arith.constant 0 : i32
    %c0_i32_0 = arith.constant 0 : i32
    return %c0_i32, %arg0 : i32, i32
  }
}

module attributes {stable_mosaic.version = 11 : i64} {
  func.func @_matmul_kernel(%arg0: i32, %arg1: memref<8x6xbf16, #tpu.memory_space<vmem>>, %arg2: memref<6x128xbf16, #tpu.memory_space<vmem>>, %arg3: memref<8x128xf32, #tpu.memory_space<vmem>>, %arg4: memref<1x8x1xf32, #tpu.memory_space<vmem>>, %arg5: memref<1x8x1xf32, #tpu.memory_space<vmem>>) attributes {dimension_semantics = [#tpu.dimension_semantics<parallel>], iteration_bounds = array<i64: 1>, scalar_prefetch = 0 : i64, scratch_operands = 0 : i64, tpu.core_type = #tpu.core_type<tc>, window_params = [{pipeline_mode = #tpu.pipeline_mode<synchronous>, transform_indices = @transform_0, window_bounds = array<i64: 8, 6>}, {transform_indices = @transform_1, window_bounds = array<i64: 6, 128>}, {transform_indices = @transform_2, window_bounds = array<i64: 8, 128>}, {transform_indices = @transform_3, window_bounds = array<i64: 1, 8, 1>}, {transform_indices = @transform_4, window_bounds = array<i64: 1, 8, 1>}]} {
    %c0 = arith.constant 0 : index
    %c0_0 = arith.constant 0 : index
    %0 = vector.load %arg1[%c0, %c0_0] : memref<8x6xbf16, #tpu.memory_space<vmem>>, vector<8x6xbf16>
    %c0_1 = arith.constant 0 : index
    %c0_2 = arith.constant 0 : index
    %1 = vector.load %arg2[%c0_1, %c0_2] : memref<6x128xbf16, #tpu.memory_space<vmem>>, vector<6x128xbf16>
    %cst = arith.constant dense<0.000000e+00> : vector<8x128xf32>
    %2 = tpu.matmul %0, %1, %cst {dimension_numbers = #tpu.dot_dimension_numbers<[1], [0], [0], [1], [0, 0, 1, 1], [], []>} : vector<8x6xbf16>, vector<6x128xbf16>, vector<8x128xf32> -> vector<8x128xf32>
    %c0_3 = arith.constant 0 : index
    %c0_4 = arith.constant 0 : index
    %3 = vector.load %arg3[%c0_3, %c0_4] : memref<8x128xf32, #tpu.memory_space<vmem>>, vector<8x128xf32>
    tpu.vector_store %arg3[%c0_3, %c0_4], %2 {strides = array<i32>} : memref<8x128xf32, #tpu.memory_space<vmem>>, vector<8x128xf32>,
    %cst_5 = arith.constant dense<0.000000e+00> : vector<8xf32>
    %4 = vector.multi_reduction <add>, %2, %cst_5 [1] : vector<8x128xf32> to vector<8xf32>
    %5 = vector.shape_cast %4 : vector<8xf32> to vector<8x1xf32>
    %6 = vector.shape_cast %5 : vector<8x1xf32> to vector<1x8x1xf32>
    %c0_6 = arith.constant 0 : index
    %c0_7 = arith.constant 0 : index
    %c0_8 = arith.constant 0 : index
    %7 = vector.load %arg4[%c0_6, %c0_7, %c0_8] : memref<1x8x1xf32, #tpu.memory_space<vmem>>, vector<1x8x1xf32>
    tpu.vector_store %arg4[%c0_6, %c0_7, %c0_8], %6 {strides = array<i32>} : memref<1x8x1xf32, #tpu.memory_space<vmem>>, vector<1x8x1xf32>,
    %8 = arith.mulf %2, %2 : vector<8x128xf32>
    %cst_9 = arith.constant dense<0.000000e+00> : vector<8xf32>
    %9 = vector.multi_reduction <add>, %8, %cst_9 [1] : vector<8x128xf32> to vector<8xf32>
    %10 = vector.shape_cast %9 : vector<8xf32> to vector<8x1xf32>
    %11 = vector.shape_cast %10 : vector<8x1xf32> to vector<1x8x1xf32>
    %c0_10 = arith.constant 0 : index
    %c0_11 = arith.constant 0 : index
    %c0_12 = arith.constant 0 : index
    %12 = vector.load %arg5[%c0_10, %c0_11, %c0_12] : memref<1x8x1xf32, #tpu.memory_space<vmem>>, vector<1x8x1xf32>
    tpu.vector_store %arg5[%c0_10, %c0_11, %c0_12], %11 {strides = array<i32>} : memref<1x8x1xf32, #tpu.memory_space<vmem>>, vector<1x8x1xf32>,
    return
  }
  func.func @transform_0(%arg0: i32) -> (i32, i32) {
    %c0_i32 = arith.constant 0 : i32
    %c0_i32_0 = arith.constant 0 : i32
    %c0_i32_1 = arith.constant 0 : i32
    return %c0_i32, %c0_i32_0 : i32, i32
  }
  func.func @transform_1(%arg0: i32) -> (i32, i32) {
    %c0_i32 = arith.constant 0 : i32
    %c0_i32_0 = arith.constant 0 : i32
    return %c0_i32, %arg0 : i32, i32
  }
  func.func @transform_2(%arg0: i32) -> (i32, i32) {
    %c0_i32 = arith.constant 0 : i32
    %c0_i32_0 = arith.constant 0 : i32
    return %c0_i32, %arg0 : i32, i32
  }
  func.func @transform_3(%arg0: i32) -> (i32, i32, i32) {
    %c0_i32 = arith.constant 0 : i32
    %c0_i32_0 = arith.constant 0 : i32
    %c0_i32_1 = arith.constant 0 : i32
    return %arg0, %c0_i32, %c0_i32_0 : i32, i32, i32
  }
  func.func @transform_4(%arg0: i32) -> (i32, i32, i32) {
    %c0_i32 = arith.constant 0 : i32
    %c0_i32_0 = arith.constant 0 : i32
    %c0_i32_1 = arith.constant 0 : i32
    return %arg0, %c0_i32, %c0_i32_0 : i32, i32, i32
  }
}

module attributes {stable_mosaic.version = 11 : i64} {
  func.func @_bn_act_kernel(%arg0: i32, %arg1: memref<8x128xf32, #tpu.memory_space<vmem>>, %arg2: memref<1x8x1xf32, #tpu.memory_space<vmem>>, %arg3: memref<1x8x1xf32, #tpu.memory_space<vmem>>, %arg4: memref<8x1xf32, #tpu.memory_space<vmem>>, %arg5: memref<8x1xf32, #tpu.memory_space<vmem>>, %arg6: memref<8x128xf32, #tpu.memory_space<vmem>>) attributes {dimension_semantics = [#tpu.dimension_semantics<parallel>], iteration_bounds = array<i64: 1>, scalar_prefetch = 0 : i64, scratch_operands = 0 : i64, tpu.core_type = #tpu.core_type<tc>, window_params = [{transform_indices = @transform_0, window_bounds = array<i64: 8, 128>}, {pipeline_mode = #tpu.pipeline_mode<synchronous>, transform_indices = @transform_1, window_bounds = array<i64: 1, 8, 1>}, {pipeline_mode = #tpu.pipeline_mode<synchronous>, transform_indices = @transform_2, window_bounds = array<i64: 1, 8, 1>}, {pipeline_mode = #tpu.pipeline_mode<synchronous>, transform_indices = @transform_3, window_bounds = array<i64: 8, 1>}, {pipeline_mode = #tpu.pipeline_mode<synchronous>, transform_indices = @transform_4, window_bounds = array<i64: 8, 1>}, {transform_indices = @transform_5, window_bounds = array<i64: 8, 128>}]} {
    %c0 = arith.constant 0 : index
    %c0_0 = arith.constant 0 : index
    %c0_1 = arith.constant 0 : index
    %0 = vector.load %arg2[%c0, %c0_0, %c0_1] : memref<1x8x1xf32, #tpu.memory_space<vmem>>, vector<1x8x1xf32>
    %cst = arith.constant dense<0.000000e+00> : vector<8x1xf32>
    %1 = vector.multi_reduction <add>, %0, %cst [0] : vector<1x8x1xf32> to vector<8x1xf32>
    %cst_2 = arith.constant 7.812500e-03 : f32
    %2 = vector.broadcast %cst_2 : f32 to vector<8x1xf32>
    %3 = arith.mulf %1, %2 : vector<8x1xf32>
    %c0_3 = arith.constant 0 : index
    %c0_4 = arith.constant 0 : index
    %c0_5 = arith.constant 0 : index
    %4 = vector.load %arg3[%c0_3, %c0_4, %c0_5] : memref<1x8x1xf32, #tpu.memory_space<vmem>>, vector<1x8x1xf32>
    %cst_6 = arith.constant dense<0.000000e+00> : vector<8x1xf32>
    %5 = vector.multi_reduction <add>, %4, %cst_6 [0] : vector<1x8x1xf32> to vector<8x1xf32>
    %cst_7 = arith.constant 7.812500e-03 : f32
    %6 = vector.broadcast %cst_7 : f32 to vector<8x1xf32>
    %7 = arith.mulf %5, %6 : vector<8x1xf32>
    %8 = arith.mulf %3, %3 : vector<8x1xf32>
    %9 = arith.subf %7, %8 : vector<8x1xf32>
    %c0_8 = arith.constant 0 : index
    %c0_9 = arith.constant 0 : index
    %10 = vector.load %arg1[%c0_8, %c0_9] : memref<8x128xf32, #tpu.memory_space<vmem>>, vector<8x128xf32>
    %11 = vector.broadcast %3 : vector<8x1xf32> to vector<8x128xf32>
    %12 = arith.subf %10, %11 : vector<8x128xf32>
    %cst_10 = arith.constant 9.99999996E-13 : f32
    %13 = vector.broadcast %cst_10 : f32 to vector<8x1xf32>
    %14 = arith.addf %9, %13 : vector<8x1xf32>
    %15 = math.rsqrt %14 : vector<8x1xf32>
    %16 = vector.broadcast %15 : vector<8x1xf32> to vector<8x128xf32>
    %17 = arith.mulf %12, %16 : vector<8x128xf32>
    %c0_11 = arith.constant 0 : index
    %c0_12 = arith.constant 0 : index
    %18 = vector.load %arg4[%c0_11, %c0_12] : memref<8x1xf32, #tpu.memory_space<vmem>>, vector<8x1xf32>
    %19 = vector.broadcast %18 : vector<8x1xf32> to vector<8x128xf32>
    %20 = arith.mulf %17, %19 : vector<8x128xf32>
    %c0_13 = arith.constant 0 : index
    %c0_14 = arith.constant 0 : index
    %21 = vector.load %arg5[%c0_13, %c0_14] : memref<8x1xf32, #tpu.memory_space<vmem>>, vector<8x1xf32>
    %22 = vector.broadcast %21 : vector<8x1xf32> to vector<8x128xf32>
    %23 = arith.addf %20, %22 : vector<8x128xf32>
    %c0_15 = arith.constant 0 : index
    %c0_16 = arith.constant 0 : index
    %24 = vector.load %arg6[%c0_15, %c0_16] : memref<8x128xf32, #tpu.memory_space<vmem>>, vector<8x128xf32>
    tpu.vector_store %arg6[%c0_15, %c0_16], %23 {strides = array<i32>} : memref<8x128xf32, #tpu.memory_space<vmem>>, vector<8x128xf32>,
    return
  }
  func.func @transform_0(%arg0: i32) -> (i32, i32) {
    %c0_i32 = arith.constant 0 : i32
    %c0_i32_0 = arith.constant 0 : i32
    return %c0_i32, %arg0 : i32, i32
  }
  func.func @transform_1(%arg0: i32) -> (i32, i32, i32) {
    %c0_i32 = arith.constant 0 : i32
    %c0_i32_0 = arith.constant 0 : i32
    %c0_i32_1 = arith.constant 0 : i32
    %c0_i32_2 = arith.constant 0 : i32
    return %c0_i32, %c0_i32_0, %c0_i32_1 : i32, i32, i32
  }
  func.func @transform_2(%arg0: i32) -> (i32, i32, i32) {
    %c0_i32 = arith.constant 0 : i32
    %c0_i32_0 = arith.constant 0 : i32
    %c0_i32_1 = arith.constant 0 : i32
    %c0_i32_2 = arith.constant 0 : i32
    return %c0_i32, %c0_i32_0, %c0_i32_1 : i32, i32, i32
  }
  func.func @transform_3(%arg0: i32) -> (i32, i32) {
    %c0_i32 = arith.constant 0 : i32
    %c0_i32_0 = arith.constant 0 : i32
    %c0_i32_1 = arith.constant 0 : i32
    return %c0_i32, %c0_i32_0 : i32, i32
  }
  func.func @transform_4(%arg0: i32) -> (i32, i32) {
    %c0_i32 = arith.constant 0 : i32
    %c0_i32_0 = arith.constant 0 : i32
    %c0_i32_1 = arith.constant 0 : i32
    return %c0_i32, %c0_i32_0 : i32, i32
  }
  func.func @transform_5(%arg0: i32) -> (i32, i32) {
    %c0_i32 = arith.constant 0 : i32
    %c0_i32_0 = arith.constant 0 : i32
    return %c0_i32, %arg0 : i32, i32
  }
}

module attributes {stable_mosaic.version = 11 : i64} {
  func.func @_add_n_kernel(%arg0: i32, %arg1: memref<8x256xf32, #tpu.memory_space<vmem>>, %arg2: memref<8x256xf32, #tpu.memory_space<vmem>>, %arg3: memref<8x256xf32, #tpu.memory_space<vmem>>) attributes {dimension_semantics = [#tpu.dimension_semantics<parallel>], iteration_bounds = array<i64: 2>, scalar_prefetch = 0 : i64, scratch_operands = 0 : i64, tpu.core_type = #tpu.core_type<tc>, window_params = [{transform_indices = @transform_0, window_bounds = array<i64: 8, 256>}, {transform_indices = @transform_1, window_bounds = array<i64: 8, 256>}, {transform_indices = @transform_2, window_bounds = array<i64: 8, 256>}]} {
    %c0 = arith.constant 0 : index
    %c0_0 = arith.constant 0 : index
    %0 = vector.load %arg1[%c0, %c0_0] : memref<8x256xf32, #tpu.memory_space<vmem>>, vector<8x256xf32>
    %c0_1 = arith.constant 0 : index
    %c0_2 = arith.constant 0 : index
    %1 = vector.load %arg2[%c0_1, %c0_2] : memref<8x256xf32, #tpu.memory_space<vmem>>, vector<8x256xf32>
    %2 = arith.addf %0, %1 : vector<8x256xf32>
    %c0_3 = arith.constant 0 : index
    %c0_4 = arith.constant 0 : index
    %3 = vector.load %arg3[%c0_3, %c0_4] : memref<8x256xf32, #tpu.memory_space<vmem>>, vector<8x256xf32>
    tpu.vector_store %arg3[%c0_3, %c0_4], %2 {strides = array<i32>} : memref<8x256xf32, #tpu.memory_space<vmem>>, vector<8x256xf32>,
    return
  }
  func.func @transform_0(%arg0: i32) -> (i32, i32) {
    %c0_i32 = arith.constant 0 : i32
    %c0_i32_0 = arith.constant 0 : i32
    return %c0_i32, %arg0 : i32, i32
  }
  func.func @transform_1(%arg0: i32) -> (i32, i32) {
    %c0_i32 = arith.constant 0 : i32
    %c0_i32_0 = arith.constant 0 : i32
    return %c0_i32, %arg0 : i32, i32
  }
  func.func @transform_2(%arg0: i32) -> (i32, i32) {
    %c0_i32 = arith.constant 0 : i32
    %c0_i32_0 = arith.constant 0 : i32
    return %c0_i32, %arg0 : i32, i32
  }
}

module attributes {stable_mosaic.version = 11 : i64} {
  func.func @_matmul_kernel(%arg0: i32, %arg1: memref<5x14xbf16, #tpu.memory_space<vmem>>, %arg2: memref<14x256xbf16, #tpu.memory_space<vmem>>, %arg3: memref<5x256xf32, #tpu.memory_space<vmem>>, %arg4: memref<1x5x1xf32, #tpu.memory_space<vmem>>, %arg5: memref<1x5x1xf32, #tpu.memory_space<vmem>>) attributes {dimension_semantics = [#tpu.dimension_semantics<parallel>], iteration_bounds = array<i64: 2>, scalar_prefetch = 0 : i64, scratch_operands = 0 : i64, tpu.core_type = #tpu.core_type<tc>, window_params = [{pipeline_mode = #tpu.pipeline_mode<synchronous>, transform_indices = @transform_0, window_bounds = array<i64: 5, 14>}, {transform_indices = @transform_1, window_bounds = array<i64: 14, 256>}, {transform_indices = @transform_2, window_bounds = array<i64: 5, 256>}, {transform_indices = @transform_3, window_bounds = array<i64: 1, 5, 1>}, {transform_indices = @transform_4, window_bounds = array<i64: 1, 5, 1>}]} {
    %c0 = arith.constant 0 : index
    %c0_0 = arith.constant 0 : index
    %0 = vector.load %arg1[%c0, %c0_0] : memref<5x14xbf16, #tpu.memory_space<vmem>>, vector<5x14xbf16>
    %c0_1 = arith.constant 0 : index
    %c0_2 = arith.constant 0 : index
    %1 = vector.load %arg2[%c0_1, %c0_2] : memref<14x256xbf16, #tpu.memory_space<vmem>>, vector<14x256xbf16>
    %cst = arith.constant dense<0.000000e+00> : vector<5x256xf32>
    %2 = tpu.matmul %0, %1, %cst {dimension_numbers = #tpu.dot_dimension_numbers<[1], [0], [0], [1], [0, 0, 1, 1], [], []>} : vector<5x14xbf16>, vector<14x256xbf16>, vector<5x256xf32> -> vector<5x256xf32>
    %c0_3 = arith.constant 0 : index
    %c0_4 = arith.constant 0 : index
    %3 = vector.load %arg3[%c0_3, %c0_4] : memref<5x256xf32, #tpu.memory_space<vmem>>, vector<5x256xf32>
    tpu.vector_store %arg3[%c0_3, %c0_4], %2 {strides = array<i32>} : memref<5x256xf32, #tpu.memory_space<vmem>>, vector<5x256xf32>,
    %cst_5 = arith.constant dense<0.000000e+00> : vector<5xf32>
    %4 = vector.multi_reduction <add>, %2, %cst_5 [1] : vector<5x256xf32> to vector<5xf32>
    %5 = vector.shape_cast %4 : vector<5xf32> to vector<5x1xf32>
    %6 = vector.shape_cast %5 : vector<5x1xf32> to vector<1x5x1xf32>
    %c0_6 = arith.constant 0 : index
    %c0_7 = arith.constant 0 : index
    %c0_8 = arith.constant 0 : index
    %7 = vector.load %arg4[%c0_6, %c0_7, %c0_8] : memref<1x5x1xf32, #tpu.memory_space<vmem>>, vector<1x5x1xf32>
    tpu.vector_store %arg4[%c0_6, %c0_7, %c0_8], %6 {strides = array<i32>} : memref<1x5x1xf32, #tpu.memory_space<vmem>>, vector<1x5x1xf32>,
    %8 = arith.mulf %2, %2 : vector<5x256xf32>
    %cst_9 = arith.constant dense<0.000000e+00> : vector<5xf32>
    %9 = vector.multi_reduction <add>, %8, %cst_9 [1] : vector<5x256xf32> to vector<5xf32>
    %10 = vector.shape_cast %9 : vector<5xf32> to vector<5x1xf32>
    %11 = vector.shape_cast %10 : vector<5x1xf32> to vector<1x5x1xf32>
    %c0_10 = arith.constant 0 : index
    %c0_11 = arith.constant 0 : index
    %c0_12 = arith.constant 0 : index
    %12 = vector.load %arg5[%c0_10, %c0_11, %c0_12] : memref<1x5x1xf32, #tpu.memory_space<vmem>>, vector<1x5x1xf32>
    tpu.vector_store %arg5[%c0_10, %c0_11, %c0_12], %11 {strides = array<i32>} : memref<1x5x1xf32, #tpu.memory_space<vmem>>, vector<1x5x1xf32>,
    return
  }
  func.func @transform_0(%arg0: i32) -> (i32, i32) {
    %c0_i32 = arith.constant 0 : i32
    %c0_i32_0 = arith.constant 0 : i32
    %c0_i32_1 = arith.constant 0 : i32
    return %c0_i32, %c0_i32_0 : i32, i32
  }
  func.func @transform_1(%arg0: i32) -> (i32, i32) {
    %c0_i32 = arith.constant 0 : i32
    %c0_i32_0 = arith.constant 0 : i32
    return %c0_i32, %arg0 : i32, i32
  }
  func.func @transform_2(%arg0: i32) -> (i32, i32) {
    %c0_i32 = arith.constant 0 : i32
    %c0_i32_0 = arith.constant 0 : i32
    return %c0_i32, %arg0 : i32, i32
  }
  func.func @transform_3(%arg0: i32) -> (i32, i32, i32) {
    %c0_i32 = arith.constant 0 : i32
    %c0_i32_0 = arith.constant 0 : i32
    %c0_i32_1 = arith.constant 0 : i32
    return %arg0, %c0_i32, %c0_i32_0 : i32, i32, i32
  }
  func.func @transform_4(%arg0: i32) -> (i32, i32, i32) {
    %c0_i32 = arith.constant 0 : i32
    %c0_i32_0 = arith.constant 0 : i32
    %c0_i32_1 = arith.constant 0 : i32
    return %arg0, %c0_i32, %c0_i32_0 : i32, i32, i32
  }
}

module attributes {stable_mosaic.version = 11 : i64} {
  func.func @_matmul_kernel(%arg0: i32, %arg1: memref<4x5xbf16, #tpu.memory_space<vmem>>, %arg2: memref<5x256xbf16, #tpu.memory_space<vmem>>, %arg3: memref<4x256xf32, #tpu.memory_space<vmem>>, %arg4: memref<1x4x1xf32, #tpu.memory_space<vmem>>, %arg5: memref<1x4x1xf32, #tpu.memory_space<vmem>>) attributes {dimension_semantics = [#tpu.dimension_semantics<parallel>], iteration_bounds = array<i64: 2>, scalar_prefetch = 0 : i64, scratch_operands = 0 : i64, tpu.core_type = #tpu.core_type<tc>, window_params = [{pipeline_mode = #tpu.pipeline_mode<synchronous>, transform_indices = @transform_0, window_bounds = array<i64: 4, 5>}, {transform_indices = @transform_1, window_bounds = array<i64: 5, 256>}, {transform_indices = @transform_2, window_bounds = array<i64: 4, 256>}, {transform_indices = @transform_3, window_bounds = array<i64: 1, 4, 1>}, {transform_indices = @transform_4, window_bounds = array<i64: 1, 4, 1>}]} {
    %c0 = arith.constant 0 : index
    %c0_0 = arith.constant 0 : index
    %0 = vector.load %arg1[%c0, %c0_0] : memref<4x5xbf16, #tpu.memory_space<vmem>>, vector<4x5xbf16>
    %c0_1 = arith.constant 0 : index
    %c0_2 = arith.constant 0 : index
    %1 = vector.load %arg2[%c0_1, %c0_2] : memref<5x256xbf16, #tpu.memory_space<vmem>>, vector<5x256xbf16>
    %cst = arith.constant dense<0.000000e+00> : vector<4x256xf32>
    %2 = tpu.matmul %0, %1, %cst {dimension_numbers = #tpu.dot_dimension_numbers<[1], [0], [0], [1], [0, 0, 1, 1], [], []>} : vector<4x5xbf16>, vector<5x256xbf16>, vector<4x256xf32> -> vector<4x256xf32>
    %c0_3 = arith.constant 0 : index
    %c0_4 = arith.constant 0 : index
    %3 = vector.load %arg3[%c0_3, %c0_4] : memref<4x256xf32, #tpu.memory_space<vmem>>, vector<4x256xf32>
    tpu.vector_store %arg3[%c0_3, %c0_4], %2 {strides = array<i32>} : memref<4x256xf32, #tpu.memory_space<vmem>>, vector<4x256xf32>,
    %cst_5 = arith.constant dense<0.000000e+00> : vector<4xf32>
    %4 = vector.multi_reduction <add>, %2, %cst_5 [1] : vector<4x256xf32> to vector<4xf32>
    %5 = vector.shape_cast %4 : vector<4xf32> to vector<4x1xf32>
    %6 = vector.shape_cast %5 : vector<4x1xf32> to vector<1x4x1xf32>
    %c0_6 = arith.constant 0 : index
    %c0_7 = arith.constant 0 : index
    %c0_8 = arith.constant 0 : index
    %7 = vector.load %arg4[%c0_6, %c0_7, %c0_8] : memref<1x4x1xf32, #tpu.memory_space<vmem>>, vector<1x4x1xf32>
    tpu.vector_store %arg4[%c0_6, %c0_7, %c0_8], %6 {strides = array<i32>} : memref<1x4x1xf32, #tpu.memory_space<vmem>>, vector<1x4x1xf32>,
    %8 = arith.mulf %2, %2 : vector<4x256xf32>
    %cst_9 = arith.constant dense<0.000000e+00> : vector<4xf32>
    %9 = vector.multi_reduction <add>, %8, %cst_9 [1] : vector<4x256xf32> to vector<4xf32>
    %10 = vector.shape_cast %9 : vector<4xf32> to vector<4x1xf32>
    %11 = vector.shape_cast %10 : vector<4x1xf32> to vector<1x4x1xf32>
    %c0_10 = arith.constant 0 : index
    %c0_11 = arith.constant 0 : index
    %c0_12 = arith.constant 0 : index
    %12 = vector.load %arg5[%c0_10, %c0_11, %c0_12] : memref<1x4x1xf32, #tpu.memory_space<vmem>>, vector<1x4x1xf32>
    tpu.vector_store %arg5[%c0_10, %c0_11, %c0_12], %11 {strides = array<i32>} : memref<1x4x1xf32, #tpu.memory_space<vmem>>, vector<1x4x1xf32>,
    return
  }
  func.func @transform_0(%arg0: i32) -> (i32, i32) {
    %c0_i32 = arith.constant 0 : i32
    %c0_i32_0 = arith.constant 0 : i32
    %c0_i32_1 = arith.constant 0 : i32
    return %c0_i32, %c0_i32_0 : i32, i32
  }
  func.func @transform_1(%arg0: i32) -> (i32, i32) {
    %c0_i32 = arith.constant 0 : i32
    %c0_i32_0 = arith.constant 0 : i32
    return %c0_i32, %arg0 : i32, i32
  }
  func.func @transform_2(%arg0: i32) -> (i32, i32) {
    %c0_i32 = arith.constant 0 : i32
    %c0_i32_0 = arith.constant 0 : i32
    return %c0_i32, %arg0 : i32, i32
  }
  func.func @transform_3(%arg0: i32) -> (i32, i32, i32) {
    %c0_i32 = arith.constant 0 : i32
    %c0_i32_0 = arith.constant 0 : i32
    %c0_i32_1 = arith.constant 0 : i32
    return %arg0, %c0_i32, %c0_i32_0 : i32, i32, i32
  }
  func.func @transform_4(%arg0: i32) -> (i32, i32, i32) {
    %c0_i32 = arith.constant 0 : i32
    %c0_i32_0 = arith.constant 0 : i32
    %c0_i32_1 = arith.constant 0 : i32
    return %arg0, %c0_i32, %c0_i32_0 : i32, i32, i32
  }
}

module attributes {stable_mosaic.version = 11 : i64} {
  func.func @_matmul_kernel(%arg0: i32, %arg1: memref<4x14xbf16, #tpu.memory_space<vmem>>, %arg2: memref<14x256xbf16, #tpu.memory_space<vmem>>, %arg3: memref<4x1xf32, #tpu.memory_space<vmem>>, %arg4: memref<4x256xf32, #tpu.memory_space<vmem>>) attributes {dimension_semantics = [#tpu.dimension_semantics<parallel>], iteration_bounds = array<i64: 2>, scalar_prefetch = 0 : i64, scratch_operands = 0 : i64, tpu.core_type = #tpu.core_type<tc>, window_params = [{pipeline_mode = #tpu.pipeline_mode<synchronous>, transform_indices = @transform_0, window_bounds = array<i64: 4, 14>}, {transform_indices = @transform_1, window_bounds = array<i64: 14, 256>}, {pipeline_mode = #tpu.pipeline_mode<synchronous>, transform_indices = @transform_2, window_bounds = array<i64: 4, 1>}, {transform_indices = @transform_3, window_bounds = array<i64: 4, 256>}]} {
    %c0 = arith.constant 0 : index
    %c0_0 = arith.constant 0 : index
    %0 = vector.load %arg1[%c0, %c0_0] : memref<4x14xbf16, #tpu.memory_space<vmem>>, vector<4x14xbf16>
    %c0_1 = arith.constant 0 : index
    %c0_2 = arith.constant 0 : index
    %1 = vector.load %arg2[%c0_1, %c0_2] : memref<14x256xbf16, #tpu.memory_space<vmem>>, vector<14x256xbf16>
    %cst = arith.constant dense<0.000000e+00> : vector<4x256xf32>
    %2 = tpu.matmul %0, %1, %cst {dimension_numbers = #tpu.dot_dimension_numbers<[1], [0], [0], [1], [0, 0, 1, 1], [], []>} : vector<4x14xbf16>, vector<14x256xbf16>, vector<4x256xf32> -> vector<4x256xf32>
    %c0_3 = arith.constant 0 : index
    %c0_4 = arith.constant 0 : index
    %3 = vector.load %arg3[%c0_3, %c0_4] : memref<4x1xf32, #tpu.memory_space<vmem>>, vector<4x1xf32>
    %4 = vector.broadcast %3 : vector<4x1xf32> to vector<4x256xf32>
    %5 = arith.addf %2, %4 : vector<4x256xf32>
    %c0_5 = arith.constant 0 : index
    %c0_6 = arith.constant 0 : index
    %6 = vector.load %arg4[%c0_5, %c0_6] : memref<4x256xf32, #tpu.memory_space<vmem>>, vector<4x256xf32>
    tpu.vector_store %arg4[%c0_5, %c0_6], %5 {strides = array<i32>} : memref<4x256xf32, #tpu.memory_space<vmem>>, vector<4x256xf32>,
    return
  }
  func.func @transform_0(%arg0: i32) -> (i32, i32) {
    %c0_i32 = arith.constant 0 : i32
    %c0_i32_0 = arith.constant 0 : i32
    %c0_i32_1 = arith.constant 0 : i32
    return %c0_i32, %c0_i32_0 : i32, i32
  }
  func.func @transform_1(%arg0: i32) -> (i32, i32) {
    %c0_i32 = arith.constant 0 : i32
    %c0_i32_0 = arith.constant 0 : i32
    return %c0_i32, %arg0 : i32, i32
  }
  func.func @transform_2(%arg0: i32) -> (i32, i32) {
    %c0_i32 = arith.constant 0 : i32
    %c0_i32_0 = arith.constant 0 : i32
    %c0_i32_1 = arith.constant 0 : i32
    return %c0_i32, %c0_i32_0 : i32, i32
  }
  func.func @transform_3(%arg0: i32) -> (i32, i32) {
    %c0_i32 = arith.constant 0 : i32
    %c0_i32_0 = arith.constant 0 : i32
    return %c0_i32, %arg0 : i32, i32
  }
}

module attributes {stable_mosaic.version = 11 : i64} {
  func.func @_bn_act_kernel(%arg0: i32, %arg1: memref<4x256xf32, #tpu.memory_space<vmem>>, %arg2: memref<2x4x1xf32, #tpu.memory_space<vmem>>, %arg3: memref<2x4x1xf32, #tpu.memory_space<vmem>>, %arg4: memref<4x1xf32, #tpu.memory_space<vmem>>, %arg5: memref<4x1xf32, #tpu.memory_space<vmem>>, %arg6: memref<4x256xf32, #tpu.memory_space<vmem>>, %arg7: memref<4x256xf32, #tpu.memory_space<vmem>>) attributes {dimension_semantics = [#tpu.dimension_semantics<parallel>], iteration_bounds = array<i64: 2>, scalar_prefetch = 0 : i64, scratch_operands = 0 : i64, tpu.core_type = #tpu.core_type<tc>, window_params = [{transform_indices = @transform_0, window_bounds = array<i64: 4, 256>}, {pipeline_mode = #tpu.pipeline_mode<synchronous>, transform_indices = @transform_1, window_bounds = array<i64: 2, 4, 1>}, {pipeline_mode = #tpu.pipeline_mode<synchronous>, transform_indices = @transform_2, window_bounds = array<i64: 2, 4, 1>}, {pipeline_mode = #tpu.pipeline_mode<synchronous>, transform_indices = @transform_3, window_bounds = array<i64: 4, 1>}, {pipeline_mode = #tpu.pipeline_mode<synchronous>, transform_indices = @transform_4, window_bounds = array<i64: 4, 1>}, {transform_indices = @transform_5, window_bounds = array<i64: 4, 256>}, {transform_indices = @transform_6, window_bounds = array<i64: 4, 256>}]} {
    %c0 = arith.constant 0 : index
    %c0_0 = arith.constant 0 : index
    %c0_1 = arith.constant 0 : index
    %0 = vector.load %arg2[%c0, %c0_0, %c0_1] : memref<2x4x1xf32, #tpu.memory_space<vmem>>, vector<2x4x1xf32>
    %cst = arith.constant dense<0.000000e+00> : vector<4x1xf32>
    %1 = vector.multi_reduction <add>, %0, %cst [0] : vector<2x4x1xf32> to vector<4x1xf32>
    %cst_2 = arith.constant 0.001953125 : f32
    %2 = vector.broadcast %cst_2 : f32 to vector<4x1xf32>
    %3 = arith.mulf %1, %2 : vector<4x1xf32>
    %c0_3 = arith.constant 0 : index
    %c0_4 = arith.constant 0 : index
    %c0_5 = arith.constant 0 : index
    %4 = vector.load %arg3[%c0_3, %c0_4, %c0_5] : memref<2x4x1xf32, #tpu.memory_space<vmem>>, vector<2x4x1xf32>
    %cst_6 = arith.constant dense<0.000000e+00> : vector<4x1xf32>
    %5 = vector.multi_reduction <add>, %4, %cst_6 [0] : vector<2x4x1xf32> to vector<4x1xf32>
    %cst_7 = arith.constant 0.001953125 : f32
    %6 = vector.broadcast %cst_7 : f32 to vector<4x1xf32>
    %7 = arith.mulf %5, %6 : vector<4x1xf32>
    %8 = arith.mulf %3, %3 : vector<4x1xf32>
    %9 = arith.subf %7, %8 : vector<4x1xf32>
    %c0_8 = arith.constant 0 : index
    %c0_9 = arith.constant 0 : index
    %10 = vector.load %arg1[%c0_8, %c0_9] : memref<4x256xf32, #tpu.memory_space<vmem>>, vector<4x256xf32>
    %11 = vector.broadcast %3 : vector<4x1xf32> to vector<4x256xf32>
    %12 = arith.subf %10, %11 : vector<4x256xf32>
    %cst_10 = arith.constant 9.99999996E-13 : f32
    %13 = vector.broadcast %cst_10 : f32 to vector<4x1xf32>
    %14 = arith.addf %9, %13 : vector<4x1xf32>
    %15 = math.rsqrt %14 : vector<4x1xf32>
    %16 = vector.broadcast %15 : vector<4x1xf32> to vector<4x256xf32>
    %17 = arith.mulf %12, %16 : vector<4x256xf32>
    %c0_11 = arith.constant 0 : index
    %c0_12 = arith.constant 0 : index
    %18 = vector.load %arg4[%c0_11, %c0_12] : memref<4x1xf32, #tpu.memory_space<vmem>>, vector<4x1xf32>
    %19 = vector.broadcast %18 : vector<4x1xf32> to vector<4x256xf32>
    %20 = arith.mulf %17, %19 : vector<4x256xf32>
    %c0_13 = arith.constant 0 : index
    %c0_14 = arith.constant 0 : index
    %21 = vector.load %arg5[%c0_13, %c0_14] : memref<4x1xf32, #tpu.memory_space<vmem>>, vector<4x1xf32>
    %22 = vector.broadcast %21 : vector<4x1xf32> to vector<4x256xf32>
    %23 = arith.addf %20, %22 : vector<4x256xf32>
    %c0_15 = arith.constant 0 : index
    %c0_16 = arith.constant 0 : index
    %24 = vector.load %arg6[%c0_15, %c0_16] : memref<4x256xf32, #tpu.memory_space<vmem>>, vector<4x256xf32>
    %25 = arith.addf %23, %24 : vector<4x256xf32>
    %c0_17 = arith.constant 0 : index
    %c0_18 = arith.constant 0 : index
    %26 = vector.load %arg7[%c0_17, %c0_18] : memref<4x256xf32, #tpu.memory_space<vmem>>, vector<4x256xf32>
    tpu.vector_store %arg7[%c0_17, %c0_18], %25 {strides = array<i32>} : memref<4x256xf32, #tpu.memory_space<vmem>>, vector<4x256xf32>,
    return
  }
  func.func @transform_0(%arg0: i32) -> (i32, i32) {
    %c0_i32 = arith.constant 0 : i32
    %c0_i32_0 = arith.constant 0 : i32
    return %c0_i32, %arg0 : i32, i32
  }
  func.func @transform_1(%arg0: i32) -> (i32, i32, i32) {
    %c0_i32 = arith.constant 0 : i32
    %c0_i32_0 = arith.constant 0 : i32
    %c0_i32_1 = arith.constant 0 : i32
    %c0_i32_2 = arith.constant 0 : i32
    return %c0_i32, %c0_i32_0, %c0_i32_1 : i32, i32, i32
  }
  func.func @transform_2(%arg0: i32) -> (i32, i32, i32) {
    %c0_i32 = arith.constant 0 : i32
    %c0_i32_0 = arith.constant 0 : i32
    %c0_i32_1 = arith.constant 0 : i32
    %c0_i32_2 = arith.constant 0 : i32
    return %c0_i32, %c0_i32_0, %c0_i32_1 : i32, i32, i32
  }
  func.func @transform_3(%arg0: i32) -> (i32, i32) {
    %c0_i32 = arith.constant 0 : i32
    %c0_i32_0 = arith.constant 0 : i32
    %c0_i32_1 = arith.constant 0 : i32
    return %c0_i32, %c0_i32_0 : i32, i32
  }
  func.func @transform_4(%arg0: i32) -> (i32, i32) {
    %c0_i32 = arith.constant 0 : i32
    %c0_i32_0 = arith.constant 0 : i32
    %c0_i32_1 = arith.constant 0 : i32
    return %c0_i32, %c0_i32_0 : i32, i32
  }
  func.func @transform_5(%arg0: i32) -> (i32, i32) {
    %c0_i32 = arith.constant 0 : i32
    %c0_i32_0 = arith.constant 0 : i32
    return %c0_i32, %arg0 : i32, i32
  }
  func.func @transform_6(%arg0: i32) -> (i32, i32) {
    %c0_i32 = arith.constant 0 : i32
    %c0_i32_0 = arith.constant 0 : i32
    return %c0_i32, %arg0 : i32, i32
  }
}

module attributes {stable_mosaic.version = 11 : i64} {
  func.func @_mask_mul_kernel(%arg0: i32, %arg1: memref<4x256xf32, #tpu.memory_space<vmem>>, %arg2: memref<4x256xf32, #tpu.memory_space<vmem>>, %arg3: memref<4x256xf32, #tpu.memory_space<vmem>>) attributes {dimension_semantics = [#tpu.dimension_semantics<parallel>], iteration_bounds = array<i64: 2>, scalar_prefetch = 0 : i64, scratch_operands = 0 : i64, tpu.core_type = #tpu.core_type<tc>, window_params = [{transform_indices = @transform_0, window_bounds = array<i64: 4, 256>}, {transform_indices = @transform_1, window_bounds = array<i64: 4, 256>}, {transform_indices = @transform_2, window_bounds = array<i64: 4, 256>}]} {
    %c0 = arith.constant 0 : index
    %c0_0 = arith.constant 0 : index
    %0 = vector.load %arg1[%c0, %c0_0] : memref<4x256xf32, #tpu.memory_space<vmem>>, vector<4x256xf32>
    %cst = arith.constant 0.000000e+00 : f32
    %1 = vector.broadcast %cst : f32 to vector<4x256xf32>
    %2 = arith.maximumf %0, %1 : vector<4x256xf32>
    %c0_1 = arith.constant 0 : index
    %c0_2 = arith.constant 0 : index
    %3 = vector.load %arg2[%c0_1, %c0_2] : memref<4x256xf32, #tpu.memory_space<vmem>>, vector<4x256xf32>
    %4 = arith.mulf %2, %3 : vector<4x256xf32>
    %c0_3 = arith.constant 0 : index
    %c0_4 = arith.constant 0 : index
    %5 = vector.load %arg3[%c0_3, %c0_4] : memref<4x256xf32, #tpu.memory_space<vmem>>, vector<4x256xf32>
    tpu.vector_store %arg3[%c0_3, %c0_4], %4 {strides = array<i32>} : memref<4x256xf32, #tpu.memory_space<vmem>>, vector<4x256xf32>,
    return
  }
  func.func @transform_0(%arg0: i32) -> (i32, i32) {
    %c0_i32 = arith.constant 0 : i32
    %c0_i32_0 = arith.constant 0 : i32
    return %c0_i32, %arg0 : i32, i32
  }
  func.func @transform_1(%arg0: i32) -> (i32, i32) {
    %c0_i32 = arith.constant 0 : i32
    %c0_i32_0 = arith.constant 0 : i32
    return %c0_i32, %arg0 : i32, i32
  }
  func.func @transform_2(%arg0: i32) -> (i32, i32) {
    %c0_i32 = arith.constant 0 : i32
    %c0_i32_0 = arith.constant 0 : i32
    return %c0_i32, %arg0 : i32, i32
  }
}

</mosaic_0001>

<bundles_post_ra>
// kernel: _lambda_.57
= control target key start
LH: loop header
LB: loop body
LE: loop exit
PB: predicated region body
PF: predicated region fallthrough
CT: control target
= control target key end

     0   :  { %s456_s15 = smov 0   ;;  %s487_s0 = inlined_call_operand.vmem [shape: bf16[5,4], index: 0, kind: input, shape index: {}]   ;;  %s488_s1 = inlined_call_operand.vmem [shape: bf16[4,512], index: 1, kind: input, shape index: {}]   ;;  %s489_s2 = inlined_call_operand.vmem [shape: f32[5,512], index: 2, kind: output, shape index: {0}]   ;;  %s490_s3 = inlined_call_operand.vmem [shape: f32[2,5,1], index: 3, kind: output, shape index: {1}]   ;;  %s491_s4 = inlined_call_operand.vmem [shape: f32[2,5,1], index: 4, kind: output, shape index: {2}]  }
   0x1 LB: > { %s462_s16 = sadd.s32 4294967295, %s429_s15   ;;  %p404_p0 = scmp.ge.s32.totalorder %s429_s15, 1  ;;  %s429_s15 = sphi %s456_s15, %s15_s15  }
   0x2   : > { %p168_p1 = scmp.lt.s32.totalorder %s429_s15, 3 }
   0x4   : > { %p169_p2 = pnand %p404_p0, %p168_p1 }
   0x5   : > { %s405_s17 = sshll.u32 (!%p169_p2), %s462_s16, 1  ;;  %p214_p4 = scmp.lt.s32.totalorder (!%p169_p2), %s462_s16, 1 }
   0x6   : > { %172 = sbr.rel (%p169_p2) target bundleno = 281 (0x119), region = 28  ;;  %p203_p3 = scmp.lt.s32.totalorder (!%p169_p2), %s405_s17, 3 }
   0xb   : > { %s493_s17 = smov (!%p203_p3, %s405_s17), 3  ;;  %vm233_vm0 = vcmask 1041408   ;;  %v223_v5 = vld [vmem:[%s487_s0] sm:$0x7]  ;;  %vm229_vm1 = vcmask 31744   ;;  %vm266_vm2 = vcmask 1044480  }
   0xc   : > { %s406_s18 = sshll.u32 %s493_s17, 1  ;;  %s408_s24 = sshll.u32 %s493_s17, 3  ;;  %vm272_vm3 = vcmask 4096  }
   0xd   : > { %s206_s21 = scalar_lea.vmem %s488_s1, %s406_s18  ;;  %s212_s27 = scalar_lea.vmem %s489_s2, %s408_s24 }
   0xe   : > { %v224_v0 = vld [vmem:[%s206_s21] sm:$0xf]  ;;  %s495_s16 = smov (!%p214_p4, %s462_s16), 1 }
   0xf   : > { %226 = vst [vmem:[#allocation1] ss:$4 sm:$0xff] %v224_v0  ;;  %s409_s28 = sshll.u32 %s495_s16, 3 }
  0x10   : > { %s217_s5 = scalar_lea.vmem %s490_s3, %s409_s28  ;;  %s221_s8 = scalar_lea.vmem %s491_s4, %s409_s28 }
  0x16   : > { %v227_v1 = vld.sshfl [vmem:[#allocation1] sm:$0xff pattern:$0x73625140]  ;;  %v228_v2 = vld.sshfl [vmem:[#allocation1 + $0x8] sm:$0xff pattern:$0x73625140] }
  0x17   : > { %v234_v3 = vsel %vm233_vm0, %v227_v1, 0  ;;  %v236_v4 = vsel %vm233_vm0, %v228_v2, 0 }
  0x18   : > { %245 = vmatpush.bf16.msra.mxu0 %v234_v3  ;;  %258 = vmatpush.bf16.msra.mxu1 %v236_v4 }
  0x1b   : > { %411 = vmatmul.msk.bf16.vlgmr.msra.gmra.mxu0 %vm229_vm1, %v223_v5  ;;  %412 = vmatmul.msk.bf16.vlgmr.msra.gmra.mxu1 %vm229_vm1, %v223_v5 }
  0x98   : > { %v247_v6 = vpop.f32.mrf.mxu0  ;;  %v260_v7 = vpop.f32.mrf.mxu1 }
  0x99   : > { %264 = vst [vmem:[%s212_s27] sm:$0x1f] %v247_v6  ;;  %v267_v8 = vsel %vm266_vm2, %v247_v6, 0.0  ;;  %v268_v9 = vsel %vm266_vm2, %v260_v7, 0.0  ;;  %v274_v11 = vmul.f32 %v247_v6, %v247_v6  ;;  %v275_v12 = vmul.f32 %v260_v7, %v260_v7 }
  0x9a   : > { %265 = vst [vmem:[%s212_s27 + $0x8] sm:$0x1f] %v260_v7  ;;  %v269_v10 = vadd.f32 %v268_v9, %v267_v8 }
  0x9b   : > { %v276_v13 = vsel %vm266_vm2, %v274_v11, 0.0  ;;  %v277_v14 = vsel %vm266_vm2, %v275_v12, 0.0 }
  0x9c   : > { %270 = vadd.xlane.f32.xlu0 %v269_v10  ;;  %v278_v17 = vadd.f32 %v277_v14, %v276_v13 }
  0xa0   : > { %v249_v15 = vpop.f32.mrf.mxu0  ;;  %v262_v16 = vpop.f32.mrf.mxu1 }
  0xa4   : > { %279 = vadd.xlane.f32.xlu0 %v278_v17 }
 0x10f   : > { %v271_v18 = vpop.xlane.xlu0 %270 }
 0x110   : > { %273 = vst.msk [vmem:[%s217_s5] sm:$0x1f] %vm272_vm3, %v271_v18 }
 0x117   : > { %v280_v19 = vpop.xlane.xlu0 %279 }
 0x118   : > { %281 = vst.msk [vmem:[%s221_s8] sm:$0x1f] %vm272_vm3, %v280_v19 }
 0x119 PF: > { %s15_s15 = sadd.s32 1, %s429_s15  }
 0x11a   : > { %p12_p5 = scmp.ge.s32.totalorder %s15_s15, 4  }
 0x11c   :  { %14 = sbr.rel (!%p12_p5) target bundleno = 1 (0x1), region = 82 }

// kernel: _lambda_.58
= control target key start
LH: loop header
LB: loop body
LE: loop exit
PB: predicated region body
PF: predicated region fallthrough
CT: control target
= control target key end

     0   :  { %s409_s18 = smov 0   ;;  %s446_s0 = inlined_call_operand.vmem [shape: f32[5,512], index: 0, kind: input, shape index: {}]   ;;  %s447_s1 = inlined_call_operand.vmem [shape: f32[2,5,1], index: 1, kind: input, shape index: {}]   ;;  %s448_s2 = inlined_call_operand.vmem [shape: f32[2,5,1], index: 2, kind: input, shape index: {}]   ;;  %s449_s3 = inlined_call_operand.vmem [shape: f32[5,1], index: 3, kind: input, shape index: {}]   ;;  %s450_s4 = inlined_call_operand.vmem [shape: f32[5,1], index: 4, kind: input, shape index: {}]   ;;  %s451_s5 = inlined_call_operand.vmem [shape: f32[5,512], index: 5, kind: output, shape index: {}]  }
   0x1 LB: > { %s346_s19 = sadd.s32 4294967295, %s376_s18   ;;  %p350_p0 = scmp.ge.s32.totalorder %s376_s18, 1  ;;  %s376_s18 = sphi %s409_s18, %s15_s18  }
   0x2   : > { %p188_p1 = scmp.lt.s32.totalorder %s376_s18, 3 }
   0x4   : > { %p189_p2 = pnand %p350_p0, %p188_p1 }
   0x5   : > { %s351_s7 = sshll.u32 (!%p189_p2), %s346_s19, 1 }
   0x6   : > { %192 = sbr.rel (%p189_p2) target bundleno = 167 (0xa7), region = 40  ;;  %p217_p3 = scmp.lt.s32.totalorder (!%p189_p2), %s351_s7, 3 }
   0xb   : > { %v270_v0 = vld [vmem:[%s449_s3] sm:$0x1f]  ;;  %vm230_vm0 = vcmask 4096   ;;  %v378_v2 = vmov 0   ;;  %v229_v3 = vld [vmem:[%s447_s1 + $0x8] sm:$0x1f] }
   0xc   : > { %v228_v1 = vld [vmem:[%s447_s1] sm:$0x1f]  ;;  %367 = vset.pattern.permute.xlu1 %v378_v2  ;;  %366 = vset.pattern.permute.xlu0 %v378_v2  ;;  %v232_v6 = vsel %vm230_vm0, %v229_v3, 0.0  ;;  %v236_v7 = vld [vmem:[%s448_s2 + $0x8] sm:$0x1f]  ;;  %s453_s7 = smov (!%p217_p3, %s351_s7), 3 }
   0xd   : > { %v231_v4 = vsel %vm230_vm0, %v228_v1, 0.0  ;;  %v235_v5 = vld [vmem:[%s448_s2] sm:$0x1f]  ;;  %273 = vperm.xlu1 %367, %v270_v0   ;;  %v238_v10 = vsel %vm230_vm0, %v236_v7, 0.0  ;;  %s352_s8 = sshll.u32 %s453_s7, 3 }
   0xe   : > { %v237_v8 = vsel %vm230_vm0, %v235_v5, 0.0  ;;  %v233_v9 = vadd.f32 %v232_v6, %v231_v4  ;;  %v278_v15 = vld [vmem:[%s450_s4] sm:$0x1f]  ;;  %s220_s11 = scalar_lea.vmem %s446_s0, %s352_s8  ;;  %s226_s14 = scalar_lea.vmem %s451_s5, %s352_s8 }
   0xf   : > { %v239_v11 = vadd.f32 %v238_v10, %v237_v8  ;;  %v243_v27 = vld [vmem:[%s220_s11] sm:$0x1f]  ;;  %v244_v28 = vld [vmem:[%s220_s11 + $0x8] sm:$0x1f] }
  0x10   : > { %v234_v12 = vmul.f32 0.001953125, %v233_v9 }
  0x11   : > { %v240_v13 = vmul.f32 0.001953125, %v239_v11 }
  0x12   : > { %247 = vperm.xlu0 %366, %v234_v12   ;;  %v241_v14 = vmul.f32 %v234_v12, %v234_v12 }
  0x14   : > { %v242_v16 = vsub.f32 %v240_v13, %v241_v14 }
  0x15   : > { %281 = vperm.xlu1 %367, %v278_v15  }
  0x16   : > { %v252_v17 = vadd.f32 1e-12, %v242_v16 }
  0x18   : > { %368 = vrsqrt.f32 %v252_v17  ;;  %vm259_vm1 = vweird.f32 %v252_v17 }
  0x1e   : > { %v369_v18 = vpop.eup %368 }
  0x1f   : > { %v254_v19 = vmul.f32 %v369_v18, %v252_v17  ;;  %vm260_vm2 = vweird.f32 %v369_v18 }
  0x20   : > { %vm261_vm3 = vmor %vm259_vm1, %vm260_vm2 }
  0x21   : > { %v255_v20 = vmul.f32 %v369_v18, %v254_v19 }
  0x23   : > { %v256_v21 = vmul.f32 0.5, %v255_v20 }
  0x25   : > { %v257_v22 = vsub.f32 1.5, %v256_v21 }
  0x27   : > { %v258_v23 = vmul.f32 %v369_v18, %v257_v22 }
  0x29   : > { %v262_v24 = vsel %vm261_vm3, %v369_v18, %v258_v23 }
  0x2a   : > { %265 = vperm.xlu0 %366, %v262_v24  }
  0x7f   : > { %v274_v26 = vpop.permute.xlu1 %273 }
  0x84   : > { %v248_v25 = vpop.permute.xlu0 %247 }
  0x85   : > { %v250_v29 = vsub.f32 %v243_v27, %v248_v25  ;;  %v251_v30 = vsub.f32 %v244_v28, %v248_v25 }
  0x87   : > { %v282_v36 = vpop.permute.xlu1 %281 }
  0x9c   : > { %v266_v31 = vpop.permute.xlu0 %265 }
  0x9d   : > { %v268_v32 = vmul.f32 %v266_v31, %v250_v29  ;;  %v269_v33 = vmul.f32 %v266_v31, %v251_v30 }
  0x9f   : > { %v276_v34 = vmul.f32 %v274_v26, %v268_v32  ;;  %v277_v35 = vmul.f32 %v274_v26, %v269_v33 }
  0xa1   : > { %v284_v37 = vadd.f32 %v282_v36, %v276_v34  ;;  %v285_v38 = vadd.f32 %v282_v36, %v277_v35 }
  0xa3   : > { %v286_v39 = vmax.f32 %v284_v37, 0.0  ;;  %v287_v40 = vmax.f32 %v285_v38, 0.0 }
  0xa5   : > { %288 = vst [vmem:[%s226_s14] sm:$0x1f] %v286_v39 }
  0xa6   : > { %289 = vst [vmem:[%s226_s14 + $0x8] sm:$0x1f] %v287_v40 }
  0xa7 PF: > { %s15_s18 = sadd.s32 1, %s376_s18  }
  0xa8   : > { %p12_p4 = scmp.ge.s32.totalorder %s15_s18, 4  }
  0xaa   :  { %14 = sbr.rel (!%p12_p4) target bundleno = 1 (0x1), region = 70 }

// kernel: _lambda_.61
= control target key start
LH: loop header
LB: loop body
LE: loop exit
PB: predicated region body
PF: predicated region fallthrough
CT: control target
= control target key end

     0   :  { %s332_s12 = smov 0   ;;  %s355_s0 = inlined_call_operand.vmem [shape: bf16[8,4], index: 0, kind: input, shape index: {}]   ;;  %s356_s1 = inlined_call_operand.vmem [shape: bf16[4,512], index: 1, kind: input, shape index: {}]   ;;  %s357_s2 = inlined_call_operand.vmem [shape: f32[8,1], index: 2, kind: input, shape index: {}]   ;;  %s358_s3 = inlined_call_operand.vmem [shape: f32[8,512], index: 3, kind: output, shape index: {}]  }
   0x1 LB: > { %s280_s13 = sadd.s32 4294967295, %s309_s12   ;;  %p284_p0 = scmp.ge.s32.totalorder %s309_s12, 1  ;;  %s309_s12 = sphi %s332_s12, %s13_s12  }
   0x2   : > { %p138_p1 = scmp.lt.s32.totalorder %s309_s12, 3 }
   0x4   : > { %p139_p2 = pnand %p284_p0, %p138_p1 }
   0x5   : > { %s285_s14 = sshll.u32 (!%p139_p2), %s280_s13, 1 }
   0x6   : > { %142 = sbr.rel (%p139_p2) target bundleno = 161 (0xa1), region = 32  ;;  %p163_p3 = scmp.lt.s32.totalorder (!%p139_p2), %s285_s14, 3 }
   0xb   : > { %v311_v0 = vmov 0   ;;  %v177_v1 = vld [vmem:[%s357_s2] sm:$0xff]  ;;  %s360_s14 = smov (!%p163_p3, %s285_s14), 3  ;;  %vm191_vm0 = vcmask 1041408   ;;  %vm187_vm1 = vcmask 31744  }
   0xc   : > { %302 = vset.pattern.permute.xlu0 %v311_v0  ;;  %s286_s17 = sshll.u32 %s360_s14, 1  ;;  %v175_v7 = vld [vmem:[%s355_s0] sm:$0xf]  ;;  %s288_s23 = sshll.u32 %s360_s14, 3 }
   0xd   : > { %180 = vperm.xlu0 %302, %v177_v1   ;;  %s166_s20 = scalar_lea.vmem %s356_s1, %s286_s17  ;;  %s172_s26 = scalar_lea.vmem %s358_s3, %s288_s23 }
   0xe   : > { %v176_v2 = vld [vmem:[%s166_s20] sm:$0xf] }
   0xf   : > { %184 = vst [vmem:[#allocation1] ss:$4 sm:$0xff] %v176_v2 }
  0x16   : > { %v185_v3 = vld.sshfl [vmem:[#allocation1] sm:$0xff pattern:$0x73625140]  ;;  %v186_v4 = vld.sshfl [vmem:[#allocation1 + $0x8] sm:$0xff pattern:$0x73625140] }
  0x17   : > { %v192_v5 = vsel %vm191_vm0, %v185_v3, 0  ;;  %v194_v6 = vsel %vm191_vm0, %v186_v4, 0 }
  0x18   : > { %203 = vmatpush.bf16.msra.mxu0 %v192_v5  ;;  %216 = vmatpush.bf16.msra.mxu1 %v194_v6 }
  0x1b   : > { %289 = vmatmul.msk.bf16.vlgmr.msra.gmra.mxu0 %vm187_vm1, %v175_v7  ;;  %290 = vmatmul.msk.bf16.vlgmr.msra.gmra.mxu1 %vm187_vm1, %v175_v7 }
  0x7f   : > { %v181_v8 = vpop.permute.xlu0 %180 }
  0x98   : > { %v205_v9 = vpop.f32.mrf.mxu0  ;;  %v218_v10 = vpop.f32.mrf.mxu1 }
  0x99   : > { %v206_v11 = vadd.f32 %v205_v9, %v181_v8  ;;  %v219_v12 = vadd.f32 %v218_v10, %v181_v8 }
  0x9b   : > { %222 = vst [vmem:[%s172_s26] sm:$0xff] %v206_v11 }
  0x9c   : > { %223 = vst [vmem:[%s172_s26 + $0x8] sm:$0xff] %v219_v12 }
  0xa0   : > { %v207_v13 = vpop.f32.mrf.mxu0  ;;  %v220_v14 = vpop.f32.mrf.mxu1 }
  0xa1 PF: > { %s13_s12 = sadd.s32 1, %s309_s12  }
  0xa2   : > { %p10_p4 = scmp.ge.s32.totalorder %s13_s12, 4  }
  0xa4   :  { %12 = sbr.rel (!%p10_p4) target bundleno = 1 (0x1), region = 62 }

// kernel: _lambda_.62
= control target key start
LH: loop header
LB: loop body
LE: loop exit
PB: predicated region body
PF: predicated region fallthrough
CT: control target
= control target key end

     0   :  { %s459_s15 = smov 0   ;;  %s490_s0 = inlined_call_operand.vmem [shape: bf16[8,5], index: 0, kind: input, shape index: {}]   ;;  %s491_s1 = inlined_call_operand.vmem [shape: bf16[5,512], index: 1, kind: input, shape index: {}]   ;;  %s492_s2 = inlined_call_operand.vmem [shape: f32[8,512], index: 2, kind: output, shape index: {0}]   ;;  %s493_s3 = inlined_call_operand.vmem [shape: f32[2,8,1], index: 3, kind: output, shape index: {1}]   ;;  %s494_s4 = inlined_call_operand.vmem [shape: f32[2,8,1], index: 4, kind: output, shape index: {2}]  }
   0x1 LB: > { %s465_s16 = sadd.s32 4294967295, %s431_s15   ;;  %p405_p0 = scmp.ge.s32.totalorder %s431_s15, 1  ;;  %s431_s15 = sphi %s459_s15, %s15_s15  }
   0x2   : > { %p168_p1 = scmp.lt.s32.totalorder %s431_s15, 3 }
   0x4   : > { %p169_p2 = pnand %p405_p0, %p168_p1 }
   0x5   : > { %s406_s17 = sshll.u32 (!%p169_p2), %s465_s16, 1  ;;  %p214_p4 = scmp.lt.s32.totalorder (!%p169_p2), %s465_s16, 1 }
   0x6   : > { %172 = sbr.rel (%p169_p2) target bundleno = 277 (0x115), region = 28  ;;  %p203_p3 = scmp.lt.s32.totalorder (!%p169_p2), %s406_s17, 3 }
   0xb   : > { %s496_s17 = smov (!%p203_p3, %s406_s17), 3  ;;  %vm234_vm0 = vcmask 1041408   ;;  %vm235_vm1 = vcmask 1042432   ;;  %v433_v0 = vmov 65535   ;;  %v223_v10 = vld [vmem:[%s490_s0] sm:$0xf] }
   0xc   : > { %s407_s18 = sshll.u32 %s496_s17, 2  ;;  %v236_v1 = vsel %vm234_vm0, 4294967295, %v433_v0  ;;  %vm230_vm2 = vcmask 39936   ;;  %s409_s24 = sshll.u32 %s496_s17, 3  ;;  %vm275_vm3 = vcmask 7168  }
   0xd   : > { %s206_s21 = scalar_lea.vmem %s491_s1, %s407_s18  ;;  %v237_v5 = vsel %vm235_vm1, %v236_v1, 0  ;;  %s212_s27 = scalar_lea.vmem %s492_s2, %s409_s24 }
   0xe   : > { %v224_v2 = vld [vmem:[%s206_s21] sm:$0x77]  ;;  %s498_s16 = smov (!%p214_p4, %s465_s16), 1 }
   0xf   : > { %v226_v3 = vunpack.c.l.b16 %v224_v2  ;;  %v227_v4 = vunpack.c.h.b16 %v224_v2  ;;  %s410_s28 = sshll.u32 %s498_s16, 3 }
  0x10   : > { %s217_s5 = scalar_lea.vmem %s493_s3, %s410_s28  ;;  %s221_s8 = scalar_lea.vmem %s494_s4, %s410_s28 }
  0x11   : > { %v228_v6 = vpack.c.b16 %v226_v3, %v226_v3  ;;  %v229_v7 = vpack.c.b16 %v227_v4, %v227_v4 }
  0x13   : > { %v239_v8 = vand.u32 %v237_v5, %v228_v6  ;;  %v242_v9 = vand.u32 %v237_v5, %v229_v7 }
  0x15   : > { %251 = vmatpush.bf16.msra.mxu0 %v239_v8  ;;  %264 = vmatpush.bf16.msra.mxu1 %v242_v9 }
  0x18   : > { %412 = vmatmul.msk.bf16.vlgmr.msra.gmra.mxu0 %vm230_vm2, %v223_v10  ;;  %413 = vmatmul.msk.bf16.vlgmr.msra.gmra.mxu1 %vm230_vm2, %v223_v10 }
  0x95   : > { %v253_v11 = vpop.f32.mrf.mxu0  ;;  %v266_v12 = vpop.f32.mrf.mxu1 }
  0x96   : > { %270 = vst [vmem:[%s212_s27] sm:$0xff] %v253_v11  ;;  %v272_v13 = vadd.f32 %v266_v12, %v253_v11  ;;  %v277_v14 = vmul.f32 %v253_v11, %v253_v11  ;;  %v278_v15 = vmul.f32 %v266_v12, %v266_v12 }
  0x97   : > { %271 = vst [vmem:[%s212_s27 + $0x8] sm:$0xff] %v266_v12 }
  0x98   : > { %273 = vadd.xlane.f32.xlu0 %v272_v13  ;;  %v279_v18 = vadd.f32 %v278_v15, %v277_v14 }
  0x9d   : > { %v255_v16 = vpop.f32.mrf.mxu0  ;;  %v268_v17 = vpop.f32.mrf.mxu1 }
  0xa0   : > { %280 = vadd.xlane.f32.xlu0 %v279_v18 }
 0x10b   : > { %v274_v19 = vpop.xlane.xlu0 %273 }
 0x10c   : > { %276 = vst.msk [vmem:[%s217_s5] sm:$0xff] %vm275_vm3, %v274_v19 }
 0x113   : > { %v281_v20 = vpop.xlane.xlu0 %280 }
 0x114   : > { %282 = vst.msk [vmem:[%s221_s8] sm:$0xff] %vm275_vm3, %v281_v20 }
 0x115 PF: > { %s15_s15 = sadd.s32 1, %s431_s15  }
 0x116   : > { %p12_p5 = scmp.ge.s32.totalorder %s15_s15, 4  }
 0x118   :  { %14 = sbr.rel (!%p12_p5) target bundleno = 1 (0x1), region = 82 }

// kernel: _lambda_.59
= control target key start
LH: loop header
LB: loop body
LE: loop exit
PB: predicated region body
PF: predicated region fallthrough
CT: control target
= control target key end

     0   :  { %s618_s15 = smov 0   ;;  %s620_s16 = smov 0   ;;  %s682_s0 = inlined_call_operand.vmem [shape: bf16[5,45], index: 0, kind: input, shape index: {}]   ;;  %s683_s1 = inlined_call_operand.vmem [shape: bf16[45,512], index: 1, kind: input, shape index: {}]   ;;  %s684_s2 = inlined_call_operand.vmem [shape: f32[5,512], index: 2, kind: output, shape index: {0}]   ;;  %s685_s3 = inlined_call_operand.vmem [shape: f32[2,5,1], index: 3, kind: output, shape index: {1}]   ;;  %s686_s4 = inlined_call_operand.vmem [shape: f32[2,5,1], index: 4, kind: output, shape index: {2}]  }
   0x1   :  { %s622_s17 = smov 0  }
   0x2 LB: > { %s634_s18 = sadd.s32 4294967295, %s590_s17   ;;  %s637_s19 = sadd.s32 1, %s590_s17   ;;  %s590_s17 = sphi %s622_s17, %s689_s17   ;;  %s586_s16 = sphi %s620_s16, %s688_s16   ;;  %s582_s15 = sphi %s618_s15, %s687_s15  }
   0x3   : > { %s40_s20 = ssub.s32 %s590_s17, %s637_s19  ;;  %s43_s21 = sadd.s32 1, %s586_s16 }
   0x4   : > { %p41_p0 = scmp.eq.s32.totalorder %s40_s20, 0  ;;  %p50_p1 = scmp.ne.s32.totalorder %s586_s16, %s582_s15 }
   0x5   : > { %p51_p2 = scmp.eq.s32.totalorder %s590_s17, 0  ;;  %p498_p4 = scmp.ge.s32.totalorder %s590_s17, 2 }
   0x6   : > { %s646_s22 = scalar_select %p41_p0, %s586_s16, %s43_s21  }
   0x7   : > { %p52_p3 = por %p51_p2, %p50_p1  ;;  %157 = sbr.rel (%p498_p4) target bundleno = 22 (0x16), region = 20 }
   0xc   : > { %160 = sbr.rel (!%p52_p3) target bundleno = 22 (0x16), region = 24  ;;  %s162_s23 = sand.u32 (%p52_p3), 1, %s586_s16  }
   0xd   : > { %s534_s24 = sshll.u32 (%p52_p3), %s590_s17, 3  ;;  %s541_s25 = smul.u32 (%p52_p3), 48, %s162_s23 }
   0xe   : > { %s167_s28 = scalar_lea.vmem (%p52_p3), %s683_s1, %s534_s24 }
   0xf   : > { %v206_v0 = vld [vmem:[%s167_s28] sm:$0xff] (%p52_p3)  ;;  %v208_v1 = vld [vmem:[%s167_s28 + $0x10] sm:$0xff] (%p52_p3)  ;;  %s164_s29 = scalar_lea.vmem (%p52_p3), [#allocation2], %s541_s25 }
  0x10   : > { %v210_v2 = vld [vmem:[%s167_s28 + $0x20] sm:$0xff] (%p52_p3)  ;;  %207 = vst [vmem:[%s164_s29] sm:$0xff] (%p52_p3), %v206_v0  ;;  %v212_v3 = vld [vmem:[%s167_s28 + $0x30] sm:$0xff] (%p52_p3) }
  0x11   : > { %209 = vst [vmem:[%s164_s29 + $0x8] sm:$0xff] %v208_v1  ;;  %v214_v4 = vld [vmem:[%s167_s28 + $0x40] sm:$0xff]  ;;  %v216_v5 = vld [vmem:[%s167_s28 + $0x50] sm:$0xff] }
  0x12   : > { %211 = vst [vmem:[%s164_s29 + $0x10] sm:$0xff] %v210_v2 }
  0x13   : > { %213 = vst [vmem:[%s164_s29 + $0x18] sm:$0xff] %v212_v3 }
  0x14   : > { %215 = vst [vmem:[%s164_s29 + $0x20] sm:$0xff] %v214_v4 }
  0x15   : > { %217 = vst [vmem:[%s164_s29 + $0x28] sm:$0xff] %v216_v5 }
  0x16 PF: > { %p501_p5 = scmp.ge.s32.totalorder %s590_s17, 1  ;;  %p222_p6 = scmp.lt.s32.totalorder %s590_s17, 3 }
  0x18   : > { %p223_p7 = pnand %p501_p5, %p222_p6 }
  0x19   : > { %s229_s30 = sand.u32 (!%p223_p7), 1, %s582_s15   ;;  %s502_s9 = sshll.u32 (!%p223_p7), %s634_s18, 1 }
  0x1a   : > { %226 = sbr.rel (%p223_p7) target bundleno = 303 (0x12f), region = 62  ;;  %p264_p8 = scmp.lt.s32.totalorder (!%p223_p7), %s502_s9, 3 }
  0x1b   : > { %s542_s5 = smul.u32 (!%p223_p7), 48, %s229_s30  ;;  %p269_p9 = scmp.lt.s32.totalorder (!%p223_p7), %s634_s18, 1 }
  0x1d   : > { %s231_s6 = scalar_lea.vmem (!%p223_p7), [#allocation2], %s542_s5 }
  0x1f   : > { %vm317_vm0 = vcmask 1045504   ;;  %vm318_vm1 = vcmask 1046528   ;;  %v592_v6 = vmov 65535   ;;  %v524_v9 = vld [vmem:[%s231_s6 + $0x20] sm:$0xf]  ;;  %vm313_vm2 = vcmask 367616  }
  0x20   : > { %v319_v7 = vsel %vm317_vm0, 4294967295, %v592_v6  ;;  %v540_v10 = vld [vmem:[%s231_s6 + $0x24] sm:$0x70]  ;;  %v539_v11 = vld [vmem:[%s231_s6 + $0x24] sm:$0xf]  ;;  %s691_s9 = smov (!%p264_p8, %s502_s9), 3 }
  0x21   : > { %v320_v8 = vsel %vm318_vm1, %v319_v7, 0  ;;  %v525_v12 = vor.u32 %v540_v10, %v524_v9  ;;  %v526_v13 = vld [vmem:[%s231_s6 + $0x28] sm:$0x70]  ;;  %v516_v15 = vld [vmem:[%s231_s6 + $0x10] sm:$0xf]  ;;  %s503_s10 = sshll.u32 %s691_s9, 3 }
  0x22   : > { %v529_v14 = vor.u32 %v539_v11, %v526_v13  ;;  %v538_v16 = vld [vmem:[%s231_s6 + $0x14] sm:$0xf0]  ;;  %v537_v18 = vld [vmem:[%s231_s6 + $0x14] sm:$0xf]  ;;  %v518_v19 = vld [vmem:[%s231_s6 + $0x18] sm:$0xf0]  ;;  %s267_s13 = scalar_lea.vmem %s684_s2, %s503_s10 }
  0x23   : > { %v322_v17 = vand.u32 %v525_v12, %v320_v8  ;;  %v517_v21 = vor.u32 %v538_v16, %v516_v15  ;;  %v521_v22 = vor.u32 %v537_v18, %v518_v19  ;;  %v508_v23 = vld [vmem:[%s231_s6] sm:$0xf]  ;;  %v536_v24 = vld [vmem:[%s231_s6 + $0x4] sm:$0xf0]  ;;  %v535_v25 = vld [vmem:[%s231_s6 + $0x4] sm:$0xf] }
  0x24   : > { %v325_v20 = vand.u32 %v529_v14, %v320_v8  ;;  %v510_v26 = vld [vmem:[%s231_s6 + $0x8] sm:$0xf0]  ;;  %v509_v27 = vor.u32 %v536_v24, %v508_v23  ;;  %v278_v29 = vld [vmem:[%s682_s0] sm:$0x7]  ;;  %vm355_vm3 = vcmask 1044480   ;;  %s693_s18 = smov (!%p269_p9, %s634_s18), 1 }
  0x25   : > { %332 = vmatpush.bf16.msra.mxu0 %v322_v17  ;;  %v513_v28 = vor.u32 %v535_v25, %v510_v26  ;;  %s504_s14 = sshll.u32 %s693_s18, 3  ;;  %vm361_vm4 = vcmask 4096  }
  0x26   : > { %345 = vmatpush.bf16.msra.mxu1 %v325_v20  ;;  %s272_s20 = scalar_lea.vmem %s685_s3, %s504_s14  ;;  %s276_s24 = scalar_lea.vmem %s686_s4, %s504_s14 }
  0x29   : > { %333 = vmatpush.bf16.msra.mxu0 %v517_v21 }
  0x2a   : > { %346 = vmatpush.bf16.msra.mxu1 %v521_v22 }
  0x2d   : > { %334 = vmatpush.bf16.msra.mxu0 %v509_v27 }
  0x2e   : > { %347 = vmatpush.bf16.msra.mxu1 %v513_v28 }
  0x30   : > { %530 = vmatmul.msk.bf16.vlgmr.msra.gmra.mxu0 %vm313_vm2, %v278_v29 }
  0x31   : > { %531 = vmatmul.msk.bf16.vlgmr.msra.gmra.mxu1 %vm313_vm2, %v278_v29 }
  0xad   : > { %v336_v30 = vpop.f32.mrf.mxu0 }
  0xae   : > { %353 = vst [vmem:[%s267_s13] sm:$0x1f] %v336_v30  ;;  %v349_v31 = vpop.f32.mrf.mxu1  ;;  %v356_v32 = vsel %vm355_vm3, %v336_v30, 0.0  ;;  %v363_v35 = vmul.f32 %v336_v30, %v336_v30 }
  0xaf   : > { %354 = vst [vmem:[%s267_s13 + $0x8] sm:$0x1f] %v349_v31  ;;  %v357_v33 = vsel %vm355_vm3, %v349_v31, 0.0  ;;  %v364_v36 = vmul.f32 %v349_v31, %v349_v31 }
  0xb0   : > { %v358_v34 = vadd.f32 %v357_v33, %v356_v32  ;;  %v365_v38 = vsel %vm355_vm3, %v363_v35, 0.0 }
  0xb1   : > { %v366_v39 = vsel %vm355_vm3, %v364_v36, 0.0 }
  0xb2   : > { %359 = vadd.xlane.f32.xlu0 %v358_v34  ;;  %v367_v41 = vadd.f32 %v366_v39, %v365_v38 }
  0xb5   : > { %v338_v37 = vpop.f32.mrf.mxu0 }
  0xb6   : > { %v351_v40 = vpop.f32.mrf.mxu1 }
  0xba   : > { %368 = vadd.xlane.f32.xlu0 %v367_v41 }
 0x125   : > { %v360_v42 = vpop.xlane.xlu0 %359 }
 0x126   : > { %362 = vst.msk [vmem:[%s272_s20] sm:$0x1f] %vm361_vm4, %v360_v42 }
 0x12d   : > { %v369_v43 = vpop.xlane.xlu0 %368 }
 0x12e   : > { %370 = vst.msk [vmem:[%s276_s24] sm:$0x1f] %vm361_vm4, %v369_v43 }
 0x12f PF: > { %p12_p10 = scmp.ge.s32.totalorder %s637_s19, 4   ;;  %s687_s15 = smov %s586_s16 }
 0x130   : > { %s688_s16 = smov %s646_s22  ;;  %s689_s17 = smov %s637_s19 }
 0x131   :  { %14 = sbr.rel (!%p12_p10) target bundleno = 2 (0x2), region = 125 }

// kernel: _lambda_.63
= control target key start
LH: loop header
LB: loop body
LE: loop exit
PB: predicated region body
PF: predicated region fallthrough
CT: control target
= control target key end

     0   :  { %s479_s21 = smov 0   ;;  %s519_s0 = inlined_call_operand.vmem [shape: f32[8,512], index: 0, kind: input, shape index: {}]   ;;  %s520_s1 = inlined_call_operand.vmem [shape: f32[2,8,1], index: 1, kind: input, shape index: {}]   ;;  %s521_s2 = inlined_call_operand.vmem [shape: f32[2,8,1], index: 2, kind: input, shape index: {}]   ;;  %s522_s3 = inlined_call_operand.vmem [shape: f32[8,1], index: 3, kind: input, shape index: {}]   ;;  %s523_s4 = inlined_call_operand.vmem [shape: f32[8,1], index: 4, kind: input, shape index: {}]   ;;  %s524_s5 = inlined_call_operand.vmem [shape: f32[8,512], index: 5, kind: input, shape index: {}]   ;;  %s525_s6 = inlined_call_operand.vmem [shape: f32[8,512], index: 6, kind: output, shape index: {}]  }
   0x1 LB: > { %s409_s22 = sadd.s32 4294967295, %s441_s21   ;;  %p413_p0 = scmp.ge.s32.totalorder %s441_s21, 1  ;;  %s441_s21 = sphi %s479_s21, %s16_s21  }
   0x2   : > { %p224_p1 = scmp.lt.s32.totalorder %s441_s21, 3 }
   0x4   : > { %p225_p2 = pnand %p413_p0, %p224_p1 }
   0x5   : > { %s414_s11 = sshll.u32 (!%p225_p2), %s409_s22, 1 }
   0x6   : > { %228 = sbr.rel (%p225_p2) target bundleno = 167 (0xa7), region = 44  ;;  %p260_p3 = scmp.lt.s32.totalorder (!%p225_p2), %s414_s11, 3 }
   0xb   : > { %v319_v0 = vld [vmem:[%s522_s3] sm:$0xff]  ;;  %v278_v2 = vld [vmem:[%s520_s1 + $0x8] sm:$0xff]  ;;  %vm279_vm0 = vcmask 7168   ;;  %v443_v3 = vmov 0   ;;  %s527_s11 = smov (!%p260_p3, %s414_s11), 3 }
   0xc   : > { %v277_v1 = vld [vmem:[%s520_s1] sm:$0xff]  ;;  %432 = vset.pattern.permute.xlu1 %v443_v3  ;;  %431 = vset.pattern.permute.xlu0 %v443_v3  ;;  %v281_v5 = vsel %vm279_vm0, %v278_v2, 0.0  ;;  %v285_v7 = vld [vmem:[%s521_s2 + $0x8] sm:$0xff]  ;;  %s415_s12 = sshll.u32 %s527_s11, 3 }
   0xd   : > { %v280_v4 = vsel %vm279_vm0, %v277_v1, 0.0  ;;  %v284_v6 = vld [vmem:[%s521_s2] sm:$0xff]  ;;  %322 = vperm.xlu1 %432, %v319_v0   ;;  %v287_v10 = vsel %vm279_vm0, %v285_v7, 0.0  ;;  %s263_s15 = scalar_lea.vmem %s519_s0, %s415_s12  ;;  %s269_s18 = scalar_lea.vmem %s524_s5, %s415_s12 }
   0xe   : > { %v282_v8 = vadd.f32 %v281_v5, %v280_v4  ;;  %v286_v9 = vsel %vm279_vm0, %v284_v6, 0.0  ;;  %v327_v15 = vld [vmem:[%s523_s4] sm:$0xff]  ;;  %v293_v28 = vld [vmem:[%s263_s15 + $0x8] sm:$0xff]  ;;  %s275_s22 = scalar_lea.vmem %s525_s6, %s415_s12 }
   0xf   : > { %v288_v11 = vadd.f32 %v287_v10, %v286_v9  ;;  %v292_v27 = vld [vmem:[%s263_s15] sm:$0xff]  ;;  %v336_v38 = vld [vmem:[%s269_s18 + $0x8] sm:$0xff] }
  0x10   : > { %v283_v12 = vmul.f32 0.001953125, %v282_v8  ;;  %v335_v37 = vld [vmem:[%s269_s18] sm:$0xff] }
  0x11   : > { %v289_v13 = vmul.f32 0.001953125, %v288_v11 }
  0x12   : > { %296 = vperm.xlu0 %431, %v283_v12   ;;  %v290_v14 = vmul.f32 %v283_v12, %v283_v12 }
  0x14   : > { %v291_v16 = vsub.f32 %v289_v13, %v290_v14 }
  0x15   : > { %330 = vperm.xlu1 %432, %v327_v15  }
  0x16   : > { %v301_v17 = vadd.f32 1e-12, %v291_v16 }
  0x18   : > { %433 = vrsqrt.f32 %v301_v17  ;;  %vm308_vm1 = vweird.f32 %v301_v17 }
  0x1e   : > { %v434_v18 = vpop.eup %433 }
  0x1f   : > { %v303_v19 = vmul.f32 %v434_v18, %v301_v17  ;;  %vm309_vm2 = vweird.f32 %v434_v18 }
  0x20   : > { %vm310_vm3 = vmor %vm308_vm1, %vm309_vm2 }
  0x21   : > { %v304_v20 = vmul.f32 %v434_v18, %v303_v19 }
  0x23   : > { %v305_v21 = vmul.f32 0.5, %v304_v20 }
  0x25   : > { %v306_v22 = vsub.f32 1.5, %v305_v21 }
  0x27   : > { %v307_v23 = vmul.f32 %v434_v18, %v306_v22 }
  0x29   : > { %v311_v24 = vsel %vm310_vm3, %v434_v18, %v307_v23 }
  0x2a   : > { %314 = vperm.xlu0 %431, %v311_v24  }
  0x7f   : > { %v323_v26 = vpop.permute.xlu1 %322 }
  0x84   : > { %v297_v25 = vpop.permute.xlu0 %296 }
  0x85   : > { %v299_v29 = vsub.f32 %v292_v27, %v297_v25  ;;  %v300_v30 = vsub.f32 %v293_v28, %v297_v25 }
  0x87   : > { %v331_v36 = vpop.permute.xlu1 %330 }
  0x9c   : > { %v315_v31 = vpop.permute.xlu0 %314 }
  0x9d   : > { %v317_v32 = vmul.f32 %v315_v31, %v299_v29  ;;  %v318_v33 = vmul.f32 %v315_v31, %v300_v30 }
  0x9f   : > { %v325_v34 = vmul.f32 %v323_v26, %v317_v32  ;;  %v326_v35 = vmul.f32 %v323_v26, %v318_v33 }
  0xa1   : > { %v333_v39 = vadd.f32 %v331_v36, %v325_v34  ;;  %v334_v40 = vadd.f32 %v331_v36, %v326_v35 }
  0xa3   : > { %v337_v41 = vadd.f32 %v335_v37, %v333_v39  ;;  %v338_v42 = vadd.f32 %v336_v38, %v334_v40 }
  0xa5   : > { %339 = vst [vmem:[%s275_s22] sm:$0xff] %v337_v41 }
  0xa6   : > { %340 = vst [vmem:[%s275_s22 + $0x8] sm:$0xff] %v338_v42 }
  0xa7 PF: > { %s16_s21 = sadd.s32 1, %s441_s21  }
  0xa8   : > { %p13_p4 = scmp.ge.s32.totalorder %s16_s21, 4  }
  0xaa   :  { %15 = sbr.rel (!%p13_p4) target bundleno = 1 (0x1), region = 77 }

// kernel: _lambda_.64
= control target key start
LH: loop header
LB: loop body
LE: loop exit
PB: predicated region body
PF: predicated region fallthrough
CT: control target
= control target key end

     0   :  { %s459_s15 = smov 0   ;;  %s490_s0 = inlined_call_operand.vmem [shape: bf16[5,8], index: 0, kind: input, shape index: {}]   ;;  %s491_s1 = inlined_call_operand.vmem [shape: bf16[8,512], index: 1, kind: input, shape index: {}]   ;;  %s492_s2 = inlined_call_operand.vmem [shape: f32[5,512], index: 2, kind: output, shape index: {0}]   ;;  %s493_s3 = inlined_call_operand.vmem [shape: f32[2,5,1], index: 3, kind: output, shape index: {1}]   ;;  %s494_s4 = inlined_call_operand.vmem [shape: f32[2,5,1], index: 4, kind: output, shape index: {2}]  }
   0x1 LB: > { %s465_s16 = sadd.s32 4294967295, %s432_s15   ;;  %p407_p0 = scmp.ge.s32.totalorder %s432_s15, 1  ;;  %s432_s15 = sphi %s459_s15, %s15_s15  }
   0x2   : > { %p168_p1 = scmp.lt.s32.totalorder %s432_s15, 3 }
   0x4   : > { %p169_p2 = pnand %p407_p0, %p168_p1 }
   0x5   : > { %s408_s17 = sshll.u32 (!%p169_p2), %s465_s16, 1  ;;  %p214_p4 = scmp.lt.s32.totalorder (!%p169_p2), %s465_s16, 1 }
   0x6   : > { %172 = sbr.rel (%p169_p2) target bundleno = 277 (0x115), region = 28  ;;  %p203_p3 = scmp.lt.s32.totalorder (!%p169_p2), %s408_s17, 3 }
   0xb   : > { %s496_s17 = smov (!%p203_p3, %s408_s17), 3  ;;  %vm234_vm0 = vcmask 1043456   ;;  %v223_v7 = vld [vmem:[%s490_s0] sm:$0x7]  ;;  %vm230_vm1 = vcmask 64512   ;;  %vm269_vm2 = vcmask 1044480  }
   0xc   : > { %s409_s18 = sshll.u32 %s496_s17, 2  ;;  %s411_s24 = sshll.u32 %s496_s17, 3  ;;  %vm275_vm3 = vcmask 4096  }
   0xd   : > { %s206_s21 = scalar_lea.vmem %s491_s1, %s409_s18  ;;  %s212_s27 = scalar_lea.vmem %s492_s2, %s411_s24 }
   0xe   : > { %v224_v0 = vld [vmem:[%s206_s21] sm:$0xff]  ;;  %s498_s16 = smov (!%p214_p4, %s465_s16), 1 }
   0xf   : > { %v226_v1 = vunpack.c.l.b16 %v224_v0  ;;  %v227_v2 = vunpack.c.h.b16 %v224_v0  ;;  %s412_s28 = sshll.u32 %s498_s16, 3 }
  0x10   : > { %s217_s5 = scalar_lea.vmem %s493_s3, %s412_s28  ;;  %s221_s8 = scalar_lea.vmem %s494_s4, %s412_s28 }
  0x11   : > { %v228_v3 = vpack.c.b16 %v226_v1, %v226_v1  ;;  %v229_v4 = vpack.c.b16 %v227_v2, %v227_v2 }
  0x13   : > { %v236_v5 = vsel %vm234_vm0, %v228_v3, 0  ;;  %v239_v6 = vsel %vm234_vm0, %v229_v4, 0 }
  0x14   : > { %248 = vmatpush.bf16.msra.mxu0 %v236_v5  ;;  %261 = vmatpush.bf16.msra.mxu1 %v239_v6 }
  0x17   : > { %414 = vmatmul.msk.bf16.vlgmr.msra.gmra.mxu0 %vm230_vm1, %v223_v7  ;;  %415 = vmatmul.msk.bf16.vlgmr.msra.gmra.mxu1 %vm230_vm1, %v223_v7 }
  0x94   : > { %v250_v8 = vpop.f32.mrf.mxu0  ;;  %v263_v9 = vpop.f32.mrf.mxu1 }
  0x95   : > { %267 = vst [vmem:[%s212_s27] sm:$0x1f] %v250_v8  ;;  %v270_v10 = vsel %vm269_vm2, %v250_v8, 0.0  ;;  %v271_v11 = vsel %vm269_vm2, %v263_v9, 0.0  ;;  %v277_v13 = vmul.f32 %v250_v8, %v250_v8  ;;  %v278_v14 = vmul.f32 %v263_v9, %v263_v9 }
  0x96   : > { %268 = vst [vmem:[%s212_s27 + $0x8] sm:$0x1f] %v263_v9  ;;  %v272_v12 = vadd.f32 %v271_v11, %v270_v10 }
  0x97   : > { %v279_v15 = vsel %vm269_vm2, %v277_v13, 0.0  ;;  %v280_v16 = vsel %vm269_vm2, %v278_v14, 0.0 }
  0x98   : > { %273 = vadd.xlane.f32.xlu0 %v272_v12  ;;  %v281_v19 = vadd.f32 %v280_v16, %v279_v15 }
  0x9c   : > { %v252_v17 = vpop.f32.mrf.mxu0  ;;  %v265_v18 = vpop.f32.mrf.mxu1 }
  0xa0   : > { %282 = vadd.xlane.f32.xlu0 %v281_v19 }
 0x10b   : > { %v274_v20 = vpop.xlane.xlu0 %273 }
 0x10c   : > { %276 = vst.msk [vmem:[%s217_s5] sm:$0x1f] %vm275_vm3, %v274_v20 }
 0x113   : > { %v283_v21 = vpop.xlane.xlu0 %282 }
 0x114   : > { %284 = vst.msk [vmem:[%s221_s8] sm:$0x1f] %vm275_vm3, %v283_v21 }
 0x115 PF: > { %s15_s15 = sadd.s32 1, %s432_s15  }
 0x116   : > { %p12_p5 = scmp.ge.s32.totalorder %s15_s15, 4  }
 0x118   :  { %14 = sbr.rel (!%p12_p5) target bundleno = 1 (0x1), region = 82 }

// kernel: _lambda_.94
= control target key start
LH: loop header
LB: loop body
LE: loop exit
PB: predicated region body
PF: predicated region fallthrough
CT: control target
= control target key end

     0   :  { %s459_s15 = smov 0   ;;  %s490_s0 = inlined_call_operand.vmem [shape: bf16[6,8], index: 0, kind: input, shape index: {}]   ;;  %s491_s1 = inlined_call_operand.vmem [shape: bf16[8,512], index: 1, kind: input, shape index: {}]   ;;  %s492_s2 = inlined_call_operand.vmem [shape: f32[6,512], index: 2, kind: output, shape index: {0}]   ;;  %s493_s3 = inlined_call_operand.vmem [shape: f32[2,6,1], index: 3, kind: output, shape index: {1}]   ;;  %s494_s4 = inlined_call_operand.vmem [shape: f32[2,6,1], index: 4, kind: output, shape index: {2}]  }
   0x1 LB: > { %s465_s16 = sadd.s32 4294967295, %s432_s15   ;;  %p407_p0 = scmp.ge.s32.totalorder %s432_s15, 1  ;;  %s432_s15 = sphi %s459_s15, %s15_s15  }
   0x2   : > { %p168_p1 = scmp.lt.s32.totalorder %s432_s15, 3 }
   0x4   : > { %p169_p2 = pnand %p407_p0, %p168_p1 }
   0x5   : > { %s408_s17 = sshll.u32 (!%p169_p2), %s465_s16, 1  ;;  %p214_p4 = scmp.lt.s32.totalorder (!%p169_p2), %s465_s16, 1 }
   0x6   : > { %172 = sbr.rel (%p169_p2) target bundleno = 277 (0x115), region = 28  ;;  %p203_p3 = scmp.lt.s32.totalorder (!%p169_p2), %s408_s17, 3 }
   0xb   : > { %s496_s17 = smov (!%p203_p3, %s408_s17), 3  ;;  %vm234_vm0 = vcmask 1043456   ;;  %v223_v7 = vld [vmem:[%s490_s0] sm:$0x7]  ;;  %vm230_vm1 = vcmask 64512   ;;  %vm269_vm2 = vcmask 1045504  }
   0xc   : > { %s409_s18 = sshll.u32 %s496_s17, 2  ;;  %s411_s24 = sshll.u32 %s496_s17, 3  ;;  %vm275_vm3 = vcmask 5120  }
   0xd   : > { %s206_s21 = scalar_lea.vmem %s491_s1, %s409_s18  ;;  %s212_s27 = scalar_lea.vmem %s492_s2, %s411_s24 }
   0xe   : > { %v224_v0 = vld [vmem:[%s206_s21] sm:$0xff]  ;;  %s498_s16 = smov (!%p214_p4, %s465_s16), 1 }
   0xf   : > { %v226_v1 = vunpack.c.l.b16 %v224_v0  ;;  %v227_v2 = vunpack.c.h.b16 %v224_v0  ;;  %s412_s28 = sshll.u32 %s498_s16, 3 }
  0x10   : > { %s217_s5 = scalar_lea.vmem %s493_s3, %s412_s28  ;;  %s221_s8 = scalar_lea.vmem %s494_s4, %s412_s28 }
  0x11   : > { %v228_v3 = vpack.c.b16 %v226_v1, %v226_v1  ;;  %v229_v4 = vpack.c.b16 %v227_v2, %v227_v2 }
  0x13   : > { %v236_v5 = vsel %vm234_vm0, %v228_v3, 0  ;;  %v239_v6 = vsel %vm234_vm0, %v229_v4, 0 }
  0x14   : > { %248 = vmatpush.bf16.msra.mxu0 %v236_v5  ;;  %261 = vmatpush.bf16.msra.mxu1 %v239_v6 }
  0x17   : > { %414 = vmatmul.msk.bf16.vlgmr.msra.gmra.mxu0 %vm230_vm1, %v223_v7  ;;  %415 = vmatmul.msk.bf16.vlgmr.msra.gmra.mxu1 %vm230_vm1, %v223_v7 }
  0x94   : > { %v250_v8 = vpop.f32.mrf.mxu0  ;;  %v263_v9 = vpop.f32.mrf.mxu1 }
  0x95   : > { %267 = vst [vmem:[%s212_s27] sm:$0x3f] %v250_v8  ;;  %v270_v10 = vsel %vm269_vm2, %v250_v8, 0.0  ;;  %v271_v11 = vsel %vm269_vm2, %v263_v9, 0.0  ;;  %v277_v13 = vmul.f32 %v250_v8, %v250_v8  ;;  %v278_v14 = vmul.f32 %v263_v9, %v263_v9 }
  0x96   : > { %268 = vst [vmem:[%s212_s27 + $0x8] sm:$0x3f] %v263_v9  ;;  %v272_v12 = vadd.f32 %v271_v11, %v270_v10 }
  0x97   : > { %v279_v15 = vsel %vm269_vm2, %v277_v13, 0.0  ;;  %v280_v16 = vsel %vm269_vm2, %v278_v14, 0.0 }
  0x98   : > { %273 = vadd.xlane.f32.xlu0 %v272_v12  ;;  %v281_v19 = vadd.f32 %v280_v16, %v279_v15 }
  0x9c   : > { %v252_v17 = vpop.f32.mrf.mxu0  ;;  %v265_v18 = vpop.f32.mrf.mxu1 }
  0xa0   : > { %282 = vadd.xlane.f32.xlu0 %v281_v19 }
 0x10b   : > { %v274_v20 = vpop.xlane.xlu0 %273 }
 0x10c   : > { %276 = vst.msk [vmem:[%s217_s5] sm:$0x3f] %vm275_vm3, %v274_v20 }
 0x113   : > { %v283_v21 = vpop.xlane.xlu0 %282 }
 0x114   : > { %284 = vst.msk [vmem:[%s221_s8] sm:$0x3f] %vm275_vm3, %v283_v21 }
 0x115 PF: > { %s15_s15 = sadd.s32 1, %s432_s15  }
 0x116   : > { %p12_p5 = scmp.ge.s32.totalorder %s15_s15, 4  }
 0x118   :  { %14 = sbr.rel (!%p12_p5) target bundleno = 1 (0x1), region = 82 }

// kernel: _lambda_.95
= control target key start
LH: loop header
LB: loop body
LE: loop exit
PB: predicated region body
PF: predicated region fallthrough
CT: control target
= control target key end

     0   :  { %s407_s18 = smov 0   ;;  %s444_s0 = inlined_call_operand.vmem [shape: f32[6,512], index: 0, kind: input, shape index: {}]   ;;  %s445_s1 = inlined_call_operand.vmem [shape: f32[2,6,1], index: 1, kind: input, shape index: {}]   ;;  %s446_s2 = inlined_call_operand.vmem [shape: f32[2,6,1], index: 2, kind: input, shape index: {}]   ;;  %s447_s3 = inlined_call_operand.vmem [shape: f32[6,1], index: 3, kind: input, shape index: {}]   ;;  %s448_s4 = inlined_call_operand.vmem [shape: f32[6,1], index: 4, kind: input, shape index: {}]   ;;  %s449_s5 = inlined_call_operand.vmem [shape: f32[6,512], index: 5, kind: output, shape index: {}]  }
   0x1 LB: > { %s344_s19 = sadd.s32 4294967295, %s374_s18   ;;  %p348_p0 = scmp.ge.s32.totalorder %s374_s18, 1  ;;  %s374_s18 = sphi %s407_s18, %s15_s18  }
   0x2   : > { %p188_p1 = scmp.lt.s32.totalorder %s374_s18, 3 }
   0x4   : > { %p189_p2 = pnand %p348_p0, %p188_p1 }
   0x5   : > { %s349_s7 = sshll.u32 (!%p189_p2), %s344_s19, 1 }
   0x6   : > { %192 = sbr.rel (%p189_p2) target bundleno = 165 (0xa5), region = 40  ;;  %p217_p3 = scmp.lt.s32.totalorder (!%p189_p2), %s349_s7, 3 }
   0xb   : > { %v270_v0 = vld [vmem:[%s447_s3] sm:$0x3f]  ;;  %vm230_vm0 = vcmask 5120   ;;  %v376_v2 = vmov 0   ;;  %v229_v3 = vld [vmem:[%s445_s1 + $0x8] sm:$0x3f] }
   0xc   : > { %v228_v1 = vld [vmem:[%s445_s1] sm:$0x3f]  ;;  %365 = vset.pattern.permute.xlu1 %v376_v2  ;;  %364 = vset.pattern.permute.xlu0 %v376_v2  ;;  %v232_v6 = vsel %vm230_vm0, %v229_v3, 0.0  ;;  %v236_v7 = vld [vmem:[%s446_s2 + $0x8] sm:$0x3f]  ;;  %s451_s7 = smov (!%p217_p3, %s349_s7), 3 }
   0xd   : > { %v231_v4 = vsel %vm230_vm0, %v228_v1, 0.0  ;;  %v235_v5 = vld [vmem:[%s446_s2] sm:$0x3f]  ;;  %273 = vperm.xlu1 %365, %v270_v0   ;;  %v238_v10 = vsel %vm230_vm0, %v236_v7, 0.0  ;;  %s350_s8 = sshll.u32 %s451_s7, 3 }
   0xe   : > { %v237_v8 = vsel %vm230_vm0, %v235_v5, 0.0  ;;  %v233_v9 = vadd.f32 %v232_v6, %v231_v4  ;;  %v278_v15 = vld [vmem:[%s448_s4] sm:$0x3f]  ;;  %s220_s11 = scalar_lea.vmem %s444_s0, %s350_s8  ;;  %s226_s14 = scalar_lea.vmem %s449_s5, %s350_s8 }
   0xf   : > { %v239_v11 = vadd.f32 %v238_v10, %v237_v8  ;;  %v243_v27 = vld [vmem:[%s220_s11] sm:$0x3f]  ;;  %v244_v28 = vld [vmem:[%s220_s11 + $0x8] sm:$0x3f] }
  0x10   : > { %v234_v12 = vmul.f32 0.001953125, %v233_v9 }
  0x11   : > { %v240_v13 = vmul.f32 0.001953125, %v239_v11 }
  0x12   : > { %247 = vperm.xlu0 %364, %v234_v12   ;;  %v241_v14 = vmul.f32 %v234_v12, %v234_v12 }
  0x14   : > { %v242_v16 = vsub.f32 %v240_v13, %v241_v14 }
  0x15   : > { %281 = vperm.xlu1 %365, %v278_v15  }
  0x16   : > { %v252_v17 = vadd.f32 1e-12, %v242_v16 }
  0x18   : > { %366 = vrsqrt.f32 %v252_v17  ;;  %vm259_vm1 = vweird.f32 %v252_v17 }
  0x1e   : > { %v367_v18 = vpop.eup %366 }
  0x1f   : > { %v254_v19 = vmul.f32 %v367_v18, %v252_v17  ;;  %vm260_vm2 = vweird.f32 %v367_v18 }
  0x20   : > { %vm261_vm3 = vmor %vm259_vm1, %vm260_vm2 }
  0x21   : > { %v255_v20 = vmul.f32 %v367_v18, %v254_v19 }
  0x23   : > { %v256_v21 = vmul.f32 0.5, %v255_v20 }
  0x25   : > { %v257_v22 = vsub.f32 1.5, %v256_v21 }
  0x27   : > { %v258_v23 = vmul.f32 %v367_v18, %v257_v22 }
  0x29   : > { %v262_v24 = vsel %vm261_vm3, %v367_v18, %v258_v23 }
  0x2a   : > { %265 = vperm.xlu0 %364, %v262_v24  }
  0x7f   : > { %v274_v26 = vpop.permute.xlu1 %273 }
  0x84   : > { %v248_v25 = vpop.permute.xlu0 %247 }
  0x85   : > { %v250_v29 = vsub.f32 %v243_v27, %v248_v25  ;;  %v251_v30 = vsub.f32 %v244_v28, %v248_v25 }
  0x87   : > { %v282_v36 = vpop.permute.xlu1 %281 }
  0x9c   : > { %v266_v31 = vpop.permute.xlu0 %265 }
  0x9d   : > { %v268_v32 = vmul.f32 %v266_v31, %v250_v29  ;;  %v269_v33 = vmul.f32 %v266_v31, %v251_v30 }
  0x9f   : > { %v276_v34 = vmul.f32 %v274_v26, %v268_v32  ;;  %v277_v35 = vmul.f32 %v274_v26, %v269_v33 }
  0xa1   : > { %v284_v37 = vadd.f32 %v282_v36, %v276_v34  ;;  %v285_v38 = vadd.f32 %v282_v36, %v277_v35 }
  0xa3   : > { %286 = vst [vmem:[%s226_s14] sm:$0x3f] %v284_v37 }
  0xa4   : > { %287 = vst [vmem:[%s226_s14 + $0x8] sm:$0x3f] %v285_v38 }
  0xa5 PF: > { %s15_s18 = sadd.s32 1, %s374_s18  }
  0xa6   : > { %p12_p4 = scmp.ge.s32.totalorder %s15_s18, 4  }
  0xa8   :  { %14 = sbr.rel (!%p12_p4) target bundleno = 1 (0x1), region = 70 }

// kernel: _lambda_.96
= control target key start
LH: loop header
LB: loop body
LE: loop exit
PB: predicated region body
PF: predicated region fallthrough
CT: control target
= control target key end

     0   :  { %v95_v1 = vmov 0   ;;  %vm54_vm0 = vcmask 1042432   ;;  %vm50_vm1 = vcmask 441344   ;;  %s137_s1 = inlined_call_operand.vmem [shape: bf16[54,128], index: 1, kind: input, shape index: {}]   ;;  %s138_s2 = inlined_call_operand.vmem [shape: f32[6,1], index: 2, kind: input, shape index: {}]   ;;  %s139_s0 = inlined_call_operand.vmem [shape: bf16[6,54], index: 0, kind: input, shape index: {}]   ;;  %s140_s3 = inlined_call_operand.vmem [shape: f32[6,128], index: 3, kind: output, shape index: {}]  }
   0x1   :  { %v22_v0 = vld [vmem:[%s137_s1 + $0x18] sm:$0x7]  ;;  %94 = vset.pattern.permute.xlu0 %v95_v1  ;;  %v23_v3 = vld [vmem:[%s138_s2] sm:$0x3f]  ;;  %v92_v6 = vld [vmem:[%s137_s1 + $0x10] sm:$0xff] }
   0x2   :  { %v42_v2 = vunpack.c.l.b16 %v22_v0  ;;  %26 = vperm.xlu0 %94, %v23_v3   ;;  %v91_v7 = vld [vmem:[%s137_s1 + $0x8] sm:$0xff]  ;;  %v90_v8 = vld [vmem:[%s137_s1] sm:$0xff] }
   0x3   :  { %v15_v9 = vld [vmem:[%s139_s0] sm:$0x7] }
   0x4   :  { %v46_v4 = vpack.c.b16 %v42_v2, %v42_v2 }
   0x6   :  { %v56_v5 = vsel %vm54_vm0, %v46_v4, 0 }
   0x7   :  { %62 = vmatpush.bf16.msra.mxu0 %v56_v5 }
   0xb   :  { %63 = vmatpush.bf16.msra.mxu0 %v92_v6 }
   0xf   :  { %64 = vmatpush.bf16.msra.mxu0 %v91_v7 }
  0x13   :  { %65 = vmatpush.bf16.msra.mxu0 %v90_v8 }
  0x16   :  { %89 = vmatmul.msk.bf16.vlgmr.msra.gmra.mxu0 %vm50_vm1, %v15_v9 }
  0x74   :  { %v27_v10 = vpop.permute.xlu0 %26 }
  0x93   :  { %v67_v11 = vpop.f32.mrf.mxu0 }
  0x94   :  { %v68_v12 = vadd.f32 %v67_v11, %v27_v10 }
  0x96   :  { %v71_v13 = vmax.f32 %v68_v12, 0.0 }
  0x98   :  { %72 = vst [vmem:[%s140_s3] sm:$0x3f] %v71_v13 }
  0x9b   :  { %v69_v14 = vpop.f32.mrf.mxu0 }

// kernel: _lambda_.85
= control target key start
LH: loop header
LB: loop body
LE: loop exit
PB: predicated region body
PF: predicated region fallthrough
CT: control target
= control target key end

     0   :  { %vm21_vm0 = vcmask 1042432   ;;  %vm17_vm1 = vcmask 48128   ;;  %vm39_vm2 = vcmask 1044480   ;;  %vm43_vm3 = vcmask 4096   ;;  %s103_s1 = inlined_call_operand.vmem [shape: bf16[6,128], index: 1, kind: input, shape index: {}]   ;;  %s104_s0 = inlined_call_operand.vmem [shape: bf16[5,6], index: 0, kind: input, shape index: {}]   ;;  %s105_s2 = inlined_call_operand.vmem [shape: f32[5,128], index: 2, kind: output, shape index: {0}]   ;;  %s106_s3 = inlined_call_operand.vmem [shape: f32[1,5,1], index: 3, kind: output, shape index: {1}]   ;;  %s107_s4 = inlined_call_operand.vmem [shape: f32[1,5,1], index: 4, kind: output, shape index: {2}]  }
   0x1   :  { %v16_v0 = vld [vmem:[%s103_s1] sm:$0x7] }
   0x2   :  { %v23_v1 = vsel %vm21_vm0, %v16_v0, 0  ;;  %v15_v2 = vld [vmem:[%s104_s0] sm:$0x7] }
   0x3   :  { %32 = vmatpush.bf16.msra.mxu0 %v23_v1 }
   0x6   :  { %62 = vmatmul.msk.bf16.vlgmr.msra.gmra.mxu0 %vm17_vm1, %v15_v2 }
  0x83   :  { %v34_v3 = vpop.f32.mrf.mxu0 }
  0x84   :  { %38 = vst [vmem:[%s105_s2] sm:$0x1f] %v34_v3  ;;  %v40_v4 = vsel %vm39_vm2, %v34_v3, 0.0  ;;  %v45_v5 = vmul.f32 %v34_v3, %v34_v3 }
  0x85   :  { %41 = vadd.xlane.f32.xlu0 %v40_v4 }
  0x86   :  { %v46_v7 = vsel %vm39_vm2, %v45_v5, 0.0 }
  0x8b   :  { %v36_v6 = vpop.f32.mrf.mxu0 }
  0x8d   :  { %47 = vadd.xlane.f32.xlu0 %v46_v7 }
  0xf8   :  { %v42_v8 = vpop.xlane.xlu0 %41 }
  0xf9   :  { %44 = vst.msk [vmem:[%s106_s3] sm:$0x1f] %vm43_vm3, %v42_v8 }
 0x100   :  { %v48_v9 = vpop.xlane.xlu0 %47 }
 0x101   :  { %49 = vst.msk [vmem:[%s107_s4] sm:$0x1f] %vm43_vm3, %v48_v9 }

// kernel: _lambda_.86
= control target key start
LH: loop header
LB: loop body
LE: loop exit
PB: predicated region body
PF: predicated region fallthrough
CT: control target
= control target key end

     0   :  { %v77_v0 = vmov 0   ;;  %s126_s3 = inlined_call_operand.vmem [shape: f32[5,1], index: 3, kind: input, shape index: {}]   ;;  %s127_s1 = inlined_call_operand.vmem [shape: f32[1,5,1], index: 1, kind: input, shape index: {}]   ;;  %s128_s2 = inlined_call_operand.vmem [shape: f32[1,5,1], index: 2, kind: input, shape index: {}]   ;;  %s129_s4 = inlined_call_operand.vmem [shape: f32[5,1], index: 4, kind: input, shape index: {}]   ;;  %s130_s0 = inlined_call_operand.vmem [shape: f32[5,128], index: 0, kind: input, shape index: {}]   ;;  %s131_s5 = inlined_call_operand.vmem [shape: f32[5,128], index: 5, kind: output, shape index: {}]  }
   0x1   :  { %74 = vset.pattern.permute.xlu1 %v77_v0  ;;  %v52_v1 = vld [vmem:[%s126_s3] sm:$0x1f]  ;;  %73 = vset.pattern.permute.xlu0 %v77_v0 }
   0x2   :  { %v20_v2 = vld [vmem:[%s127_s1] sm:$0x1f]  ;;  %55 = vperm.xlu1 %74, %v52_v1  }
   0x3   :  { %v23_v3 = vld [vmem:[%s128_s2] sm:$0x1f]  ;;  %v22_v4 = vmul.f32 0.0078125, %v20_v2 }
   0x4   :  { %v25_v5 = vmul.f32 0.0078125, %v23_v3  ;;  %v59_v8 = vld [vmem:[%s129_s4] sm:$0x1f] }
   0x5   :  { %31 = vperm.xlu0 %73, %v22_v4   ;;  %v26_v6 = vmul.f32 %v22_v4, %v22_v4  ;;  %v28_v19 = vld [vmem:[%s130_s0] sm:$0x1f] }
   0x7   :  { %v27_v7 = vsub.f32 %v25_v5, %v26_v6 }
   0x9   :  { %v35_v9 = vadd.f32 1e-12, %v27_v7 }
   0xa   :  { %62 = vperm.xlu1 %74, %v59_v8  }
   0xb   :  { %75 = vrsqrt.f32 %v35_v9  ;;  %vm42_vm0 = vweird.f32 %v35_v9 }
  0x11   :  { %v76_v10 = vpop.eup %75 }
  0x12   :  { %v37_v11 = vmul.f32 %v76_v10, %v35_v9  ;;  %vm43_vm1 = vweird.f32 %v76_v10 }
  0x13   :  { %vm44_vm2 = vmor %vm42_vm0, %vm43_vm1 }
  0x14   :  { %v38_v12 = vmul.f32 %v76_v10, %v37_v11 }
  0x16   :  { %v39_v13 = vmul.f32 0.5, %v38_v12 }
  0x18   :  { %v40_v14 = vsub.f32 1.5, %v39_v13 }
  0x1a   :  { %v41_v15 = vmul.f32 %v76_v10, %v40_v14 }
  0x1c   :  { %v45_v16 = vsel %vm44_vm2, %v76_v10, %v41_v15 }
  0x1d   :  { %48 = vperm.xlu0 %73, %v45_v16  }
  0x74   :  { %v56_v18 = vpop.permute.xlu1 %55 }
  0x77   :  { %v32_v17 = vpop.permute.xlu0 %31 }
  0x78   :  { %v34_v20 = vsub.f32 %v28_v19, %v32_v17 }
  0x7c   :  { %v63_v24 = vpop.permute.xlu1 %62 }
  0x8f   :  { %v49_v21 = vpop.permute.xlu0 %48 }
  0x90   :  { %v51_v22 = vmul.f32 %v49_v21, %v34_v20 }
  0x92   :  { %v58_v23 = vmul.f32 %v56_v18, %v51_v22 }
  0x94   :  { %v65_v25 = vadd.f32 %v63_v24, %v58_v23 }
  0x96   :  { %v66_v26 = vmax.f32 %v65_v25, 0.0 }
  0x98   :  { %67 = vst [vmem:[%s131_s5] sm:$0x1f] %v66_v26 }

// kernel: _lambda_.87
= control target key start
LH: loop header
LB: loop body
LE: loop exit
PB: predicated region body
PF: predicated region fallthrough
CT: control target
= control target key end

     0   :  { %vm43_vm0 = vcmask 1045504   ;;  %vm44_vm1 = vcmask 1046528   ;;  %v104_v2 = vmov 65535   ;;  %vm39_vm2 = vcmask 367616   ;;  %s154_s1 = inlined_call_operand.vmem [shape: bf16[45,128], index: 1, kind: input, shape index: {}]   ;;  %s155_s0 = inlined_call_operand.vmem [shape: bf16[5,45], index: 0, kind: input, shape index: {}]   ;;  %s156_s2 = inlined_call_operand.vmem [shape: f32[5,128], index: 2, kind: output, shape index: {0}]   ;;  %s157_s3 = inlined_call_operand.vmem [shape: f32[1,5,1], index: 3, kind: output, shape index: {1}]   ;;  %s158_s4 = inlined_call_operand.vmem [shape: f32[1,5,1], index: 4, kind: output, shape index: {2}]  }
   0x1   :  { %v97_v0 = vld [vmem:[%s154_s1 + $0x10] sm:$0xf]  ;;  %v102_v1 = vld [vmem:[%s154_s1 + $0x10] sm:$0x70]  ;;  %v45_v3 = vsel %vm43_vm0, 4294967295, %v104_v2  ;;  %v101_v7 = vld [vmem:[%s154_s1 + $0x8] sm:$0xff] }
   0x2   :  { %v98_v4 = vor.u32 %v102_v1, %v97_v0  ;;  %v46_v5 = vsel %vm44_vm1, %v45_v3, 0  ;;  %v100_v8 = vld [vmem:[%s154_s1] sm:$0xff]  ;;  %vm64_vm3 = vcmask 1044480   ;;  %vm68_vm4 = vcmask 4096  }
   0x3   :  { %v15_v9 = vld [vmem:[%s155_s0] sm:$0x7] }
   0x4   :  { %v48_v6 = vand.u32 %v98_v4, %v46_v5 }
   0x6   :  { %55 = vmatpush.bf16.msra.mxu0 %v48_v6 }
   0xa   :  { %56 = vmatpush.bf16.msra.mxu0 %v101_v7 }
   0xe   :  { %57 = vmatpush.bf16.msra.mxu0 %v100_v8 }
  0x11   :  { %99 = vmatmul.msk.bf16.vlgmr.msra.gmra.mxu0 %vm39_vm2, %v15_v9 }
  0x8e   :  { %v59_v10 = vpop.f32.mrf.mxu0 }
  0x8f   :  { %63 = vst [vmem:[%s156_s2] sm:$0x1f] %v59_v10  ;;  %v65_v11 = vsel %vm64_vm3, %v59_v10, 0.0  ;;  %v70_v12 = vmul.f32 %v59_v10, %v59_v10 }
  0x90   :  { %66 = vadd.xlane.f32.xlu0 %v65_v11 }
  0x91   :  { %v71_v14 = vsel %vm64_vm3, %v70_v12, 0.0 }
  0x96   :  { %v61_v13 = vpop.f32.mrf.mxu0 }
  0x98   :  { %72 = vadd.xlane.f32.xlu0 %v71_v14 }
 0x103   :  { %v67_v15 = vpop.xlane.xlu0 %66 }
 0x104   :  { %69 = vst.msk [vmem:[%s157_s3] sm:$0x1f] %vm68_vm4, %v67_v15 }
 0x10b   :  { %v73_v16 = vpop.xlane.xlu0 %72 }
 0x10c   :  { %74 = vst.msk [vmem:[%s158_s4] sm:$0x1f] %vm68_vm4, %v73_v16 }

// kernel: _lambda_.90
= control target key start
LH: loop header
LB: loop body
LE: loop exit
PB: predicated region body
PF: predicated region fallthrough
CT: control target
= control target key end

     0   :  { %v81_v0 = vmov 0   ;;  %s138_s3 = inlined_call_operand.vmem [shape: f32[6,1], index: 3, kind: input, shape index: {}]   ;;  %s139_s1 = inlined_call_operand.vmem [shape: f32[1,6,1], index: 1, kind: input, shape index: {}]   ;;  %s140_s2 = inlined_call_operand.vmem [shape: f32[1,6,1], index: 2, kind: input, shape index: {}]   ;;  %s141_s4 = inlined_call_operand.vmem [shape: f32[6,1], index: 4, kind: input, shape index: {}]   ;;  %s142_s0 = inlined_call_operand.vmem [shape: f32[6,128], index: 0, kind: input, shape index: {}]   ;;  %s143_s5 = inlined_call_operand.vmem [shape: f32[6,128], index: 5, kind: input, shape index: {}]   ;;  %s144_s6 = inlined_call_operand.vmem [shape: f32[6,128], index: 6, kind: output, shape index: {}]  }
   0x1   :  { %78 = vset.pattern.permute.xlu1 %v81_v0  ;;  %v55_v1 = vld [vmem:[%s138_s3] sm:$0x3f]  ;;  %77 = vset.pattern.permute.xlu0 %v81_v0 }
   0x2   :  { %v23_v2 = vld [vmem:[%s139_s1] sm:$0x3f]  ;;  %58 = vperm.xlu1 %78, %v55_v1  }
   0x3   :  { %v26_v3 = vld [vmem:[%s140_s2] sm:$0x3f]  ;;  %v25_v4 = vmul.f32 0.0078125, %v23_v2 }
   0x4   :  { %v28_v5 = vmul.f32 0.0078125, %v26_v3  ;;  %v62_v8 = vld [vmem:[%s141_s4] sm:$0x3f] }
   0x5   :  { %34 = vperm.xlu0 %77, %v25_v4   ;;  %v29_v6 = vmul.f32 %v25_v4, %v25_v4  ;;  %v31_v19 = vld [vmem:[%s142_s0] sm:$0x3f] }
   0x6   :  { %v69_v25 = vld [vmem:[%s143_s5] sm:$0x3f] }
   0x7   :  { %v30_v7 = vsub.f32 %v28_v5, %v29_v6 }
   0x9   :  { %v38_v9 = vadd.f32 1e-12, %v30_v7 }
   0xa   :  { %65 = vperm.xlu1 %78, %v62_v8  }
   0xb   :  { %79 = vrsqrt.f32 %v38_v9  ;;  %vm45_vm0 = vweird.f32 %v38_v9 }
  0x11   :  { %v80_v10 = vpop.eup %79 }
  0x12   :  { %v40_v11 = vmul.f32 %v80_v10, %v38_v9  ;;  %vm46_vm1 = vweird.f32 %v80_v10 }
  0x13   :  { %vm47_vm2 = vmor %vm45_vm0, %vm46_vm1 }
  0x14   :  { %v41_v12 = vmul.f32 %v80_v10, %v40_v11 }
  0x16   :  { %v42_v13 = vmul.f32 0.5, %v41_v12 }
  0x18   :  { %v43_v14 = vsub.f32 1.5, %v42_v13 }
  0x1a   :  { %v44_v15 = vmul.f32 %v80_v10, %v43_v14 }
  0x1c   :  { %v48_v16 = vsel %vm47_vm2, %v80_v10, %v44_v15 }
  0x1d   :  { %51 = vperm.xlu0 %77, %v48_v16  }
  0x74   :  { %v59_v18 = vpop.permute.xlu1 %58 }
  0x77   :  { %v35_v17 = vpop.permute.xlu0 %34 }
  0x78   :  { %v37_v20 = vsub.f32 %v31_v19, %v35_v17 }
  0x7c   :  { %v66_v24 = vpop.permute.xlu1 %65 }
  0x8f   :  { %v52_v21 = vpop.permute.xlu0 %51 }
  0x90   :  { %v54_v22 = vmul.f32 %v52_v21, %v37_v20 }
  0x92   :  { %v61_v23 = vmul.f32 %v59_v18, %v54_v22 }
  0x94   :  { %v68_v26 = vadd.f32 %v66_v24, %v61_v23 }
  0x96   :  { %v70_v27 = vadd.f32 %v69_v25, %v68_v26 }
  0x98   :  { %71 = vst [vmem:[%s144_s6] sm:$0x3f] %v70_v27 }

// kernel: _lambda_.89
= control target key start
LH: loop header
LB: loop body
LE: loop exit
PB: predicated region body
PF: predicated region fallthrough
CT: control target
= control target key end

     0   :  { %vm21_vm0 = vcmask 1041408   ;;  %vm22_vm1 = vcmask 1042432   ;;  %v67_v1 = vmov 65535   ;;  %vm17_vm2 = vcmask 39936   ;;  %s108_s1 = inlined_call_operand.vmem [shape: bf16[5,128], index: 1, kind: input, shape index: {}]   ;;  %s109_s0 = inlined_call_operand.vmem [shape: bf16[6,5], index: 0, kind: input, shape index: {}]   ;;  %s110_s2 = inlined_call_operand.vmem [shape: f32[6,128], index: 2, kind: output, shape index: {0}]   ;;  %s111_s3 = inlined_call_operand.vmem [shape: f32[1,6,1], index: 3, kind: output, shape index: {1}]   ;;  %s112_s4 = inlined_call_operand.vmem [shape: f32[1,6,1], index: 4, kind: output, shape index: {2}]  }
   0x1   :  { %v16_v0 = vld [vmem:[%s108_s1] sm:$0x7]  ;;  %v23_v2 = vsel %vm21_vm0, 4294967295, %v67_v1  ;;  %vm42_vm3 = vcmask 1045504   ;;  %vm46_vm4 = vcmask 5120  }
   0x2   :  { %v24_v3 = vsel %vm22_vm1, %v23_v2, 0  ;;  %v15_v5 = vld [vmem:[%s109_s0] sm:$0x7] }
   0x3   :  { %v26_v4 = vand.u32 %v24_v3, %v16_v0 }
   0x5   :  { %35 = vmatpush.bf16.msra.mxu0 %v26_v4 }
   0x8   :  { %65 = vmatmul.msk.bf16.vlgmr.msra.gmra.mxu0 %vm17_vm2, %v15_v5 }
  0x85   :  { %v37_v6 = vpop.f32.mrf.mxu0 }
  0x86   :  { %41 = vst [vmem:[%s110_s2] sm:$0x3f] %v37_v6  ;;  %v43_v7 = vsel %vm42_vm3, %v37_v6, 0.0  ;;  %v48_v8 = vmul.f32 %v37_v6, %v37_v6 }
  0x87   :  { %44 = vadd.xlane.f32.xlu0 %v43_v7 }
  0x88   :  { %v49_v10 = vsel %vm42_vm3, %v48_v8, 0.0 }
  0x8d   :  { %v39_v9 = vpop.f32.mrf.mxu0 }
  0x8f   :  { %50 = vadd.xlane.f32.xlu0 %v49_v10 }
  0xfa   :  { %v45_v11 = vpop.xlane.xlu0 %44 }
  0xfb   :  { %47 = vst.msk [vmem:[%s111_s3] sm:$0x3f] %vm46_vm4, %v45_v11 }
 0x102   :  { %v51_v12 = vpop.xlane.xlu0 %50 }
 0x103   :  { %52 = vst.msk [vmem:[%s112_s4] sm:$0x3f] %vm46_vm4, %v51_v12 }

// kernel: _lambda_.97
= control target key start
LH: loop header
LB: loop body
LE: loop exit
PB: predicated region body
PF: predicated region fallthrough
CT: control target
= control target key end

     0   :  { %s43_s0 = inlined_call_operand.vmem [shape: f32[6,128], index: 0, kind: input, shape index: {}]   ;;  %s44_s1 = inlined_call_operand.vmem [shape: f32[6,128], index: 1, kind: input, shape index: {}]   ;;  %s45_s2 = inlined_call_operand.vmem [shape: f32[6,128], index: 2, kind: output, shape index: {}]  }
   0x1   :  { %v11_v0 = vld [vmem:[%s43_s0] sm:$0x3f] }
   0x2   :  { %v12_v1 = vld [vmem:[%s44_s1] sm:$0x3f] }
   0x3   :  { %v13_v2 = vadd.f32 %v12_v1, %v11_v0 }
   0x5   :  { %14 = vst [vmem:[%s45_s2] sm:$0x3f] %v13_v2 }

// kernel: _lambda_.98
= control target key start
LH: loop header
LB: loop body
LE: loop exit
PB: predicated region body
PF: predicated region fallthrough
CT: control target
= control target key end

     0   :  { %vm21_vm0 = vcmask 1042432   ;;  %vm17_vm1 = vcmask 48128   ;;  %vm39_vm2 = vcmask 1045504   ;;  %vm43_vm3 = vcmask 5120   ;;  %s103_s1 = inlined_call_operand.vmem [shape: bf16[6,128], index: 1, kind: input, shape index: {}]   ;;  %s104_s0 = inlined_call_operand.vmem [shape: bf16[6,6], index: 0, kind: input, shape index: {}]   ;;  %s105_s2 = inlined_call_operand.vmem [shape: f32[6,128], index: 2, kind: output, shape index: {0}]   ;;  %s106_s3 = inlined_call_operand.vmem [shape: f32[1,6,1], index: 3, kind: output, shape index: {1}]   ;;  %s107_s4 = inlined_call_operand.vmem [shape: f32[1,6,1], index: 4, kind: output, shape index: {2}]  }
   0x1   :  { %v16_v0 = vld [vmem:[%s103_s1] sm:$0x7] }
   0x2   :  { %v23_v1 = vsel %vm21_vm0, %v16_v0, 0  ;;  %v15_v2 = vld [vmem:[%s104_s0] sm:$0x7] }
   0x3   :  { %32 = vmatpush.bf16.msra.mxu0 %v23_v1 }
   0x6   :  { %62 = vmatmul.msk.bf16.vlgmr.msra.gmra.mxu0 %vm17_vm1, %v15_v2 }
  0x83   :  { %v34_v3 = vpop.f32.mrf.mxu0 }
  0x84   :  { %38 = vst [vmem:[%s105_s2] sm:$0x3f] %v34_v3  ;;  %v40_v4 = vsel %vm39_vm2, %v34_v3, 0.0  ;;  %v45_v5 = vmul.f32 %v34_v3, %v34_v3 }
  0x85   :  { %41 = vadd.xlane.f32.xlu0 %v40_v4 }
  0x86   :  { %v46_v7 = vsel %vm39_vm2, %v45_v5, 0.0 }
  0x8b   :  { %v36_v6 = vpop.f32.mrf.mxu0 }
  0x8d   :  { %47 = vadd.xlane.f32.xlu0 %v46_v7 }
  0xf8   :  { %v42_v8 = vpop.xlane.xlu0 %41 }
  0xf9   :  { %44 = vst.msk [vmem:[%s106_s3] sm:$0x3f] %vm43_vm3, %v42_v8 }
 0x100   :  { %v48_v9 = vpop.xlane.xlu0 %47 }
 0x101   :  { %49 = vst.msk [vmem:[%s107_s4] sm:$0x3f] %vm43_vm3, %v48_v9 }

// kernel: _lambda_.99
= control target key start
LH: loop header
LB: loop body
LE: loop exit
PB: predicated region body
PF: predicated region fallthrough
CT: control target
= control target key end

     0   :  { %v76_v0 = vmov 0   ;;  %s125_s3 = inlined_call_operand.vmem [shape: f32[6,1], index: 3, kind: input, shape index: {}]   ;;  %s126_s1 = inlined_call_operand.vmem [shape: f32[1,6,1], index: 1, kind: input, shape index: {}]   ;;  %s127_s2 = inlined_call_operand.vmem [shape: f32[1,6,1], index: 2, kind: input, shape index: {}]   ;;  %s128_s4 = inlined_call_operand.vmem [shape: f32[6,1], index: 4, kind: input, shape index: {}]   ;;  %s129_s0 = inlined_call_operand.vmem [shape: f32[6,128], index: 0, kind: input, shape index: {}]   ;;  %s130_s5 = inlined_call_operand.vmem [shape: f32[6,128], index: 5, kind: output, shape index: {}]  }
   0x1   :  { %73 = vset.pattern.permute.xlu1 %v76_v0  ;;  %v52_v1 = vld [vmem:[%s125_s3] sm:$0x3f]  ;;  %72 = vset.pattern.permute.xlu0 %v76_v0 }
   0x2   :  { %v20_v2 = vld [vmem:[%s126_s1] sm:$0x3f]  ;;  %55 = vperm.xlu1 %73, %v52_v1  }
   0x3   :  { %v23_v3 = vld [vmem:[%s127_s2] sm:$0x3f]  ;;  %v22_v4 = vmul.f32 0.0078125, %v20_v2 }
   0x4   :  { %v25_v5 = vmul.f32 0.0078125, %v23_v3  ;;  %v59_v8 = vld [vmem:[%s128_s4] sm:$0x3f] }
   0x5   :  { %31 = vperm.xlu0 %72, %v22_v4   ;;  %v26_v6 = vmul.f32 %v22_v4, %v22_v4  ;;  %v28_v19 = vld [vmem:[%s129_s0] sm:$0x3f] }
   0x7   :  { %v27_v7 = vsub.f32 %v25_v5, %v26_v6 }
   0x9   :  { %v35_v9 = vadd.f32 1e-12, %v27_v7 }
   0xa   :  { %62 = vperm.xlu1 %73, %v59_v8  }
   0xb   :  { %74 = vrsqrt.f32 %v35_v9  ;;  %vm42_vm0 = vweird.f32 %v35_v9 }
  0x11   :  { %v75_v10 = vpop.eup %74 }
  0x12   :  { %v37_v11 = vmul.f32 %v75_v10, %v35_v9  ;;  %vm43_vm1 = vweird.f32 %v75_v10 }
  0x13   :  { %vm44_vm2 = vmor %vm42_vm0, %vm43_vm1 }
  0x14   :  { %v38_v12 = vmul.f32 %v75_v10, %v37_v11 }
  0x16   :  { %v39_v13 = vmul.f32 0.5, %v38_v12 }
  0x18   :  { %v40_v14 = vsub.f32 1.5, %v39_v13 }
  0x1a   :  { %v41_v15 = vmul.f32 %v75_v10, %v40_v14 }
  0x1c   :  { %v45_v16 = vsel %vm44_vm2, %v75_v10, %v41_v15 }
  0x1d   :  { %48 = vperm.xlu0 %72, %v45_v16  }
  0x74   :  { %v56_v18 = vpop.permute.xlu1 %55 }
  0x77   :  { %v32_v17 = vpop.permute.xlu0 %31 }
  0x78   :  { %v34_v20 = vsub.f32 %v28_v19, %v32_v17 }
  0x7c   :  { %v63_v24 = vpop.permute.xlu1 %62 }
  0x8f   :  { %v49_v21 = vpop.permute.xlu0 %48 }
  0x90   :  { %v51_v22 = vmul.f32 %v49_v21, %v34_v20 }
  0x92   :  { %v58_v23 = vmul.f32 %v56_v18, %v51_v22 }
  0x94   :  { %v65_v25 = vadd.f32 %v63_v24, %v58_v23 }
  0x96   :  { %66 = vst [vmem:[%s130_s5] sm:$0x3f] %v65_v25 }

// kernel: _lambda_.91
= control target key start
LH: loop header
LB: loop body
LE: loop exit
PB: predicated region body
PF: predicated region fallthrough
CT: control target
= control target key end

     0   :  { %vm21_vm0 = vcmask 1042432   ;;  %vm17_vm1 = vcmask 48128   ;;  %vm41_vm2 = vcmask 7168   ;;  %s100_s1 = inlined_call_operand.vmem [shape: bf16[6,128], index: 1, kind: input, shape index: {}]   ;;  %s101_s0 = inlined_call_operand.vmem [shape: bf16[8,6], index: 0, kind: input, shape index: {}]   ;;  %s102_s2 = inlined_call_operand.vmem [shape: f32[8,128], index: 2, kind: output, shape index: {0}]   ;;  %s103_s3 = inlined_call_operand.vmem [shape: f32[1,8,1], index: 3, kind: output, shape index: {1}]   ;;  %s104_s4 = inlined_call_operand.vmem [shape: f32[1,8,1], index: 4, kind: output, shape index: {2}]  }
   0x1   :  { %v16_v0 = vld [vmem:[%s100_s1] sm:$0x7] }
   0x2   :  { %v23_v1 = vsel %vm21_vm0, %v16_v0, 0  ;;  %v15_v2 = vld [vmem:[%s101_s0] sm:$0xf] }
   0x3   :  { %32 = vmatpush.bf16.msra.mxu0 %v23_v1 }
   0x6   :  { %59 = vmatmul.msk.bf16.vlgmr.msra.gmra.mxu0 %vm17_vm1, %v15_v2 }
  0x83   :  { %v34_v3 = vpop.f32.mrf.mxu0 }
  0x84   :  { %38 = vst [vmem:[%s102_s2] sm:$0xff] %v34_v3  ;;  %39 = vadd.xlane.f32.xlu0 %v34_v3  ;;  %v43_v4 = vmul.f32 %v34_v3, %v34_v3 }
  0x8b   :  { %v36_v5 = vpop.f32.mrf.mxu0 }
  0x8c   :  { %44 = vadd.xlane.f32.xlu0 %v43_v4 }
  0xf7   :  { %v40_v6 = vpop.xlane.xlu0 %39 }
  0xf8   :  { %42 = vst.msk [vmem:[%s103_s3] sm:$0xff] %vm41_vm2, %v40_v6 }
  0xff   :  { %v45_v7 = vpop.xlane.xlu0 %44 }
 0x100   :  { %46 = vst.msk [vmem:[%s104_s4] sm:$0xff] %vm41_vm2, %v45_v7 }

// kernel: _lambda_.92
= control target key start
LH: loop header
LB: loop body
LE: loop exit
PB: predicated region body
PF: predicated region fallthrough
CT: control target
= control target key end

     0   :  { %v76_v0 = vmov 0   ;;  %s125_s3 = inlined_call_operand.vmem [shape: f32[8,1], index: 3, kind: input, shape index: {}]   ;;  %s126_s1 = inlined_call_operand.vmem [shape: f32[1,8,1], index: 1, kind: input, shape index: {}]   ;;  %s127_s2 = inlined_call_operand.vmem [shape: f32[1,8,1], index: 2, kind: input, shape index: {}]   ;;  %s128_s4 = inlined_call_operand.vmem [shape: f32[8,1], index: 4, kind: input, shape index: {}]   ;;  %s129_s0 = inlined_call_operand.vmem [shape: f32[8,128], index: 0, kind: input, shape index: {}]   ;;  %s130_s5 = inlined_call_operand.vmem [shape: f32[8,128], index: 5, kind: output, shape index: {}]  }
   0x1   :  { %73 = vset.pattern.permute.xlu1 %v76_v0  ;;  %v52_v1 = vld [vmem:[%s125_s3] sm:$0xff]  ;;  %72 = vset.pattern.permute.xlu0 %v76_v0 }
   0x2   :  { %v20_v2 = vld [vmem:[%s126_s1] sm:$0xff]  ;;  %55 = vperm.xlu1 %73, %v52_v1  }
   0x3   :  { %v23_v3 = vld [vmem:[%s127_s2] sm:$0xff]  ;;  %v22_v4 = vmul.f32 0.0078125, %v20_v2 }
   0x4   :  { %v25_v5 = vmul.f32 0.0078125, %v23_v3  ;;  %v59_v8 = vld [vmem:[%s128_s4] sm:$0xff] }
   0x5   :  { %31 = vperm.xlu0 %72, %v22_v4   ;;  %v26_v6 = vmul.f32 %v22_v4, %v22_v4  ;;  %v28_v19 = vld [vmem:[%s129_s0] sm:$0xff] }
   0x7   :  { %v27_v7 = vsub.f32 %v25_v5, %v26_v6 }
   0x9   :  { %v35_v9 = vadd.f32 1e-12, %v27_v7 }
   0xa   :  { %62 = vperm.xlu1 %73, %v59_v8  }
   0xb   :  { %74 = vrsqrt.f32 %v35_v9  ;;  %vm42_vm0 = vweird.f32 %v35_v9 }
  0x11   :  { %v75_v10 = vpop.eup %74 }
  0x12   :  { %v37_v11 = vmul.f32 %v75_v10, %v35_v9  ;;  %vm43_vm1 = vweird.f32 %v75_v10 }
  0x13   :  { %vm44_vm2 = vmor %vm42_vm0, %vm43_vm1 }
  0x14   :  { %v38_v12 = vmul.f32 %v75_v10, %v37_v11 }
  0x16   :  { %v39_v13 = vmul.f32 0.5, %v38_v12 }
  0x18   :  { %v40_v14 = vsub.f32 1.5, %v39_v13 }
  0x1a   :  { %v41_v15 = vmul.f32 %v75_v10, %v40_v14 }
  0x1c   :  { %v45_v16 = vsel %vm44_vm2, %v75_v10, %v41_v15 }
  0x1d   :  { %48 = vperm.xlu0 %72, %v45_v16  }
  0x74   :  { %v56_v18 = vpop.permute.xlu1 %55 }
  0x77   :  { %v32_v17 = vpop.permute.xlu0 %31 }
  0x78   :  { %v34_v20 = vsub.f32 %v28_v19, %v32_v17 }
  0x7c   :  { %v63_v24 = vpop.permute.xlu1 %62 }
  0x8f   :  { %v49_v21 = vpop.permute.xlu0 %48 }
  0x90   :  { %v51_v22 = vmul.f32 %v49_v21, %v34_v20 }
  0x92   :  { %v58_v23 = vmul.f32 %v56_v18, %v51_v22 }
  0x94   :  { %v65_v25 = vadd.f32 %v63_v24, %v58_v23 }
  0x96   :  { %66 = vst [vmem:[%s130_s5] sm:$0xff] %v65_v25 }

// kernel: _lambda_.93
= control target key start
LH: loop header
LB: loop body
LE: loop exit
PB: predicated region body
PF: predicated region fallthrough
CT: control target
= control target key end

     0   :  { %s270_s9 = smov 0   ;;  %s298_s0 = inlined_call_operand.vmem [shape: f32[8,512], index: 0, kind: input, shape index: {}]   ;;  %s299_s1 = inlined_call_operand.vmem [shape: f32[8,512], index: 1, kind: input, shape index: {}]   ;;  %s300_s2 = inlined_call_operand.vmem [shape: f32[8,512], index: 2, kind: output, shape index: {}]  }
   0x1 LB: > { %s245_s10 = sadd.s32 4294967295, %s272_s9   ;;  %p249_p0 = scmp.ge.s32.totalorder %s272_s9, 1  ;;  %s272_s9 = sphi %s270_s9, %s12_s9  }
   0x2   : > { %p124_p1 = scmp.lt.s32.totalorder %s272_s9, 3 }
   0x4   : > { %p125_p2 = pnand %p249_p0, %p124_p1 }
   0x5   : > { %s250_s11 = sshll.u32 (!%p125_p2), %s245_s10, 1 }
   0x6   : > { %128 = sbr.rel (%p125_p2) target bundleno = 20 (0x14), region = 28  ;;  %p152_p3 = scmp.lt.s32.totalorder (!%p125_p2), %s250_s11, 3 }
   0xb   : > { %s302_s11 = smov (!%p152_p3, %s250_s11), 3 }
   0xc   : > { %s251_s12 = sshll.u32 %s302_s11, 3 }
   0xd   : > { %s155_s15 = scalar_lea.vmem %s298_s0, %s251_s12  ;;  %s161_s18 = scalar_lea.vmem %s299_s1, %s251_s12 }
   0xe   : > { %s167_s21 = scalar_lea.vmem %s300_s2, %s251_s12  ;;  %v169_v0 = vld [vmem:[%s155_s15] sm:$0xff]  ;;  %v170_v1 = vld [vmem:[%s155_s15 + $0x8] sm:$0xff] }
   0xf   : > { %v171_v2 = vld [vmem:[%s161_s18] sm:$0xff]  ;;  %v172_v3 = vld [vmem:[%s161_s18 + $0x8] sm:$0xff] }
  0x10   : > { %v173_v4 = vadd.f32 %v171_v2, %v169_v0  ;;  %v174_v5 = vadd.f32 %v172_v3, %v170_v1 }
  0x12   : > { %175 = vst [vmem:[%s167_s21] sm:$0xff] %v173_v4 }
  0x13   : > { %176 = vst [vmem:[%s167_s21 + $0x8] sm:$0xff] %v174_v5 }
  0x14 PF: > { %s12_s9 = sadd.s32 1, %s272_s9  }
  0x15   : > { %p9_p4 = scmp.ge.s32.totalorder %s12_s9, 4  }
  0x17   :  { %11 = sbr.rel (!%p9_p4) target bundleno = 1 (0x1), region = 61 }

// kernel: _lambda_.100
= control target key start
LH: loop header
LB: loop body
LE: loop exit
PB: predicated region body
PF: predicated region fallthrough
CT: control target
= control target key end

     0   :  { %s553_s15 = smov 0   ;;  %s555_s16 = smov 0   ;;  %s607_s0 = inlined_call_operand.vmem [shape: bf16[5,14], index: 0, kind: input, shape index: {}]   ;;  %s608_s1 = inlined_call_operand.vmem [shape: bf16[14,512], index: 1, kind: input, shape index: {}]   ;;  %s609_s2 = inlined_call_operand.vmem [shape: f32[5,512], index: 2, kind: output, shape index: {0}]   ;;  %s610_s3 = inlined_call_operand.vmem [shape: f32[2,5,1], index: 3, kind: output, shape index: {1}]   ;;  %s611_s4 = inlined_call_operand.vmem [shape: f32[2,5,1], index: 4, kind: output, shape index: {2}]  }
   0x1   :  { %s557_s17 = smov 0  }
   0x2 LB: > { %s566_s18 = sadd.s32 4294967295, %s526_s17   ;;  %s568_s19 = sadd.s32 1, %s526_s17   ;;  %s526_s17 = sphi %s557_s17, %s614_s17   ;;  %s522_s16 = sphi %s555_s16, %s613_s16   ;;  %s518_s15 = sphi %s553_s15, %s612_s15  }
   0x3   : > { %s40_s20 = ssub.s32 %s526_s17, %s568_s19  ;;  %s43_s21 = sadd.s32 1, %s522_s16 }
   0x4   : > { %p41_p0 = scmp.eq.s32.totalorder %s40_s20, 0  ;;  %p50_p1 = scmp.ne.s32.totalorder %s522_s16, %s518_s15 }
   0x5   : > { %p51_p2 = scmp.eq.s32.totalorder %s526_s17, 0  ;;  %p455_p4 = scmp.ge.s32.totalorder %s526_s17, 2 }
   0x6   : > { %s575_s22 = scalar_select %p41_p0, %s522_s16, %s43_s21  }
   0x7   : > { %p52_p3 = por %p51_p2, %p50_p1  ;;  %157 = sbr.rel (%p455_p4) target bundleno = 18 (0x12), region = 20 }
   0xc   : > { %160 = sbr.rel (!%p52_p3) target bundleno = 18 (0x12), region = 24  ;;  %s162_s23 = sand.u32 (%p52_p3), 1, %s522_s16  }
   0xd   : > { %s477_s24 = sshll.u32 (%p52_p3), %s526_s17, 3  ;;  %s456_s25 = sshll.u32 (%p52_p3), %s162_s23, 4 }
   0xe   : > { %s167_s28 = scalar_lea.vmem (%p52_p3), %s608_s1, %s477_s24  ;;  %s164_s29 = scalar_lea.vmem (%p52_p3), [#allocation2], %s456_s25 }
   0xf   : > { %v198_v0 = vld [vmem:[%s167_s28] sm:$0xff] (%p52_p3)  ;;  %v200_v1 = vld [vmem:[%s167_s28 + $0x10] sm:$0xff] (%p52_p3) }
  0x10   : > { %199 = vst [vmem:[%s164_s29] sm:$0xff] (%p52_p3), %v198_v0 }
  0x11   : > { %201 = vst [vmem:[%s164_s29 + $0x8] sm:$0xff] %v200_v1 }
  0x12 PF: > { %p459_p5 = scmp.ge.s32.totalorder %s526_s17, 1  ;;  %p206_p6 = scmp.lt.s32.totalorder %s526_s17, 3 }
  0x14   : > { %p207_p7 = pnand %p459_p5, %p206_p6 }
  0x15   : > { %s213_s30 = sand.u32 (!%p207_p7), 1, %s518_s15   ;;  %s461_s9 = sshll.u32 (!%p207_p7), %s566_s18, 1 }
  0x16   : > { %210 = sbr.rel (%p207_p7) target bundleno = 289 (0x121), region = 62  ;;  %s460_s5 = sshll.u32 (!%p207_p7), %s213_s30, 4 }
  0x17   : > { %s215_s6 = scalar_lea.vmem (!%p207_p7), [#allocation2], %s460_s5  ;;  %p248_p8 = scmp.lt.s32.totalorder (!%p207_p7), %s461_s9, 3 }
  0x18   : > { %p253_p9 = scmp.lt.s32.totalorder (!%p207_p7), %s566_s18, 1 }
  0x1b   : > { %vm277_vm0 = vcmask 1046528   ;;  %v467_v2 = vld [vmem:[%s215_s6] sm:$0xf]  ;;  %v479_v3 = vld [vmem:[%s215_s6 + $0x4] sm:$0x70]  ;;  %vm273_vm1 = vcmask 113664  }
  0x1c   : > { %v478_v4 = vld [vmem:[%s215_s6 + $0x4] sm:$0xf]  ;;  %v468_v5 = vor.u32 %v479_v3, %v467_v2  ;;  %v469_v6 = vld [vmem:[%s215_s6 + $0x8] sm:$0x70]  ;;  %v262_v10 = vld [vmem:[%s607_s0] sm:$0x7] }
  0x1d   : > { %v472_v7 = vor.u32 %v478_v4, %v469_v6  ;;  %s616_s9 = smov (!%p248_p8, %s461_s9), 3  ;;  %vm312_vm2 = vcmask 1044480   ;;  %s618_s18 = smov (!%p253_p9, %s566_s18), 1  ;;  %vm318_vm3 = vcmask 4096  }
  0x1e   : > { %v279_v8 = vsel %vm277_vm0, %v468_v5, 0  ;;  %s462_s10 = sshll.u32 %s616_s9, 3  ;;  %s463_s14 = sshll.u32 %s618_s18, 3 }
  0x1f   : > { %291 = vmatpush.bf16.msra.mxu0 %v279_v8  ;;  %v282_v9 = vsel %vm277_vm0, %v472_v7, 0  ;;  %s251_s13 = scalar_lea.vmem %s609_s2, %s462_s10  ;;  %s256_s20 = scalar_lea.vmem %s610_s3, %s463_s14 }
  0x20   : > { %304 = vmatpush.bf16.msra.mxu1 %v282_v9  ;;  %s260_s24 = scalar_lea.vmem %s611_s4, %s463_s14 }
  0x22   : > { %473 = vmatmul.msk.bf16.vlgmr.msra.gmra.mxu0 %vm273_vm1, %v262_v10 }
  0x23   : > { %474 = vmatmul.msk.bf16.vlgmr.msra.gmra.mxu1 %vm273_vm1, %v262_v10 }
  0x9f   : > { %v293_v11 = vpop.f32.mrf.mxu0 }
  0xa0   : > { %310 = vst [vmem:[%s251_s13] sm:$0x1f] %v293_v11  ;;  %v306_v12 = vpop.f32.mrf.mxu1  ;;  %v313_v13 = vsel %vm312_vm2, %v293_v11, 0.0  ;;  %v320_v16 = vmul.f32 %v293_v11, %v293_v11 }
  0xa1   : > { %311 = vst [vmem:[%s251_s13 + $0x8] sm:$0x1f] %v306_v12  ;;  %v314_v14 = vsel %vm312_vm2, %v306_v12, 0.0  ;;  %v321_v17 = vmul.f32 %v306_v12, %v306_v12 }
  0xa2   : > { %v315_v15 = vadd.f32 %v314_v14, %v313_v13  ;;  %v322_v19 = vsel %vm312_vm2, %v320_v16, 0.0 }
  0xa3   : > { %v323_v20 = vsel %vm312_vm2, %v321_v17, 0.0 }
  0xa4   : > { %316 = vadd.xlane.f32.xlu0 %v315_v15  ;;  %v324_v22 = vadd.f32 %v323_v20, %v322_v19 }
  0xa7   : > { %v295_v18 = vpop.f32.mrf.mxu0 }
  0xa8   : > { %v308_v21 = vpop.f32.mrf.mxu1 }
  0xac   : > { %325 = vadd.xlane.f32.xlu0 %v324_v22 }
 0x117   : > { %v317_v23 = vpop.xlane.xlu0 %316 }
 0x118   : > { %319 = vst.msk [vmem:[%s256_s20] sm:$0x1f] %vm318_vm3, %v317_v23 }
 0x11f   : > { %v326_v24 = vpop.xlane.xlu0 %325 }
 0x120   : > { %327 = vst.msk [vmem:[%s260_s24] sm:$0x1f] %vm318_vm3, %v326_v24 }
 0x121 PF: > { %p12_p10 = scmp.ge.s32.totalorder %s568_s19, 4   ;;  %s612_s15 = smov %s522_s16 }
 0x122   : > { %s613_s16 = smov %s575_s22  ;;  %s614_s17 = smov %s568_s19 }
 0x123   :  { %14 = sbr.rel (!%p12_p10) target bundleno = 2 (0x2), region = 125 }

// kernel: _lambda_.105
= control target key start
LH: loop header
LB: loop body
LE: loop exit
PB: predicated region body
PF: predicated region fallthrough
CT: control target
= control target key end

     0   :  { %s468_s15 = smov 0   ;;  %s504_s0 = inlined_call_operand.vmem [shape: bf16[4,5], index: 0, kind: input, shape index: {}]   ;;  %s505_s1 = inlined_call_operand.vmem [shape: bf16[5,512], index: 1, kind: input, shape index: {}]   ;;  %s506_s2 = inlined_call_operand.vmem [shape: f32[4,512], index: 2, kind: output, shape index: {0}]   ;;  %s507_s3 = inlined_call_operand.vmem [shape: f32[2,4,1], index: 3, kind: output, shape index: {1}]   ;;  %s508_s4 = inlined_call_operand.vmem [shape: f32[2,4,1], index: 4, kind: output, shape index: {2}]  }
   0x1 LB: > { %s474_s16 = sadd.s32 4294967295, %s440_s15   ;;  %p414_p0 = scmp.ge.s32.totalorder %s440_s15, 1  ;;  %s440_s15 = sphi %s468_s15, %s15_s15  }
   0x2   : > { %p168_p1 = scmp.lt.s32.totalorder %s440_s15, 3 }
   0x4   : > { %p169_p2 = pnand %p414_p0, %p168_p1 }
   0x5   : > { %s415_s17 = sshll.u32 (!%p169_p2), %s474_s16, 1  ;;  %p214_p4 = scmp.lt.s32.totalorder (!%p169_p2), %s474_s16, 1 }
   0x6   : > { %172 = sbr.rel (%p169_p2) target bundleno = 278 (0x116), region = 28  ;;  %p203_p3 = scmp.lt.s32.totalorder (!%p169_p2), %s415_s17, 3 }
   0xb   : > { %s510_s17 = smov (!%p203_p3, %s415_s17), 3  ;;  %vm234_vm0 = vcmask 1041408   ;;  %vm235_vm1 = vcmask 1042432   ;;  %v442_v0 = vmov 65535   ;;  %v223_v10 = vld [vmem:[%s504_s0] sm:$0x3] }
   0xc   : > { %s416_s18 = sshll.u32 %s510_s17, 2  ;;  %v236_v1 = vsel %vm234_vm0, 4294967295, %v442_v0  ;;  %vm230_vm2 = vcmask 39936   ;;  %vm273_vm3 = vcmask 1043456   ;;  %s512_s16 = smov (!%p214_p4, %s474_s16), 1  ;;  %vm282_vm4 = vcmask 3072  }
   0xd   : > { %s206_s21 = scalar_lea.vmem %s505_s1, %s416_s18  ;;  %v237_v5 = vsel %vm235_vm1, %v236_v1, 0  ;;  %s212_s26 = scalar_lea.vmem %s506_s2, %s416_s18 }
   0xe   : > { %v224_v2 = vld [vmem:[%s206_s21] sm:$0x77]  ;;  %s419_s27 = sshll.u32 %s512_s16, 2 }
   0xf   : > { %v226_v3 = vunpack.c.l.b16 %v224_v2  ;;  %v227_v4 = vunpack.c.h.b16 %v224_v2  ;;  %s217_s30 = scalar_lea.vmem %s507_s3, %s419_s27  ;;  %s221_s7 = scalar_lea.vmem %s508_s4, %s419_s27 }
  0x11   : > { %v228_v6 = vpack.c.b16 %v226_v3, %v226_v3  ;;  %v229_v7 = vpack.c.b16 %v227_v4, %v227_v4 }
  0x13   : > { %v239_v8 = vand.u32 %v237_v5, %v228_v6  ;;  %v242_v9 = vand.u32 %v237_v5, %v229_v7 }
  0x15   : > { %251 = vmatpush.bf16.msra.mxu0 %v239_v8  ;;  %264 = vmatpush.bf16.msra.mxu1 %v242_v9 }
  0x18   : > { %421 = vmatmul.msk.bf16.vlgmr.msra.gmra.mxu0 %vm230_vm2, %v223_v10  ;;  %422 = vmatmul.msk.bf16.vlgmr.msra.gmra.mxu1 %vm230_vm2, %v223_v10 }
  0x95   : > { %v253_v11 = vpop.f32.mrf.mxu0  ;;  %v266_v12 = vpop.f32.mrf.mxu1 }
  0x96   : > { %v272_v13 = vrot.slane %v266_v12, 4  ;;  %v277_v14 = vsel %vm273_vm3, %v253_v11, 0.0  ;;  %v278_v15 = vsel %vm273_vm3, %v266_v12, 0.0  ;;  %v284_v18 = vmul.f32 %v253_v11, %v253_v11 }
  0x97   : > { %v279_v16 = vadd.f32 %v278_v15, %v277_v14  ;;  %v285_v19 = vmul.f32 %v266_v12, %v266_v12 }
  0x98   : > { %v274_v17 = vsel %vm273_vm3, %v253_v11, %v272_v13  ;;  %v286_v22 = vsel %vm273_vm3, %v284_v18, 0.0 }
  0x99   : > { %276 = vst [vmem:[%s212_s26] sm:$0xff] %v274_v17  ;;  %280 = vadd.xlane.f32.xlu0 %v279_v16  ;;  %v287_v23 = vsel %vm273_vm3, %v285_v19, 0.0 }
  0x9a   : > { %v288_v24 = vadd.f32 %v287_v23, %v286_v22 }
  0x9d   : > { %v255_v20 = vpop.f32.mrf.mxu0  ;;  %v268_v21 = vpop.f32.mrf.mxu1 }
  0xa1   : > { %289 = vadd.xlane.f32.xlu0 %v288_v24 }
 0x10c   : > { %v281_v25 = vpop.xlane.xlu0 %280 }
 0x10d   : > { %283 = vst.msk [vmem:[%s217_s30] sm:$0xf] %vm282_vm4, %v281_v25 }
 0x114   : > { %v290_v26 = vpop.xlane.xlu0 %289 }
 0x115   : > { %291 = vst.msk [vmem:[%s221_s7] sm:$0xf] %vm282_vm4, %v290_v26 }
 0x116 PF: > { %s15_s15 = sadd.s32 1, %s440_s15  }
 0x117   : > { %p12_p5 = scmp.ge.s32.totalorder %s15_s15, 4  }
 0x119   :  { %14 = sbr.rel (!%p12_p5) target bundleno = 1 (0x1), region = 82 }

// kernel: _lambda_.104
= control target key start
LH: loop header
LB: loop body
LE: loop exit
PB: predicated region body
PF: predicated region fallthrough
CT: control target
= control target key end

     0   :  { %s434_s12 = smov 0   ;;  %s436_s13 = smov 0   ;;  %s492_s0 = inlined_call_operand.vmem [shape: bf16[4,14], index: 0, kind: input, shape index: {}]   ;;  %s493_s1 = inlined_call_operand.vmem [shape: bf16[14,512], index: 1, kind: input, shape index: {}]   ;;  %s494_s2 = inlined_call_operand.vmem [shape: f32[4,1], index: 2, kind: input, shape index: {}]   ;;  %s495_s3 = inlined_call_operand.vmem [shape: f32[4,512], index: 3, kind: output, shape index: {}]  }
   0x1   :  { %s438_s14 = smov 0  }
   0x2 LB: > { %s337_s15 = sadd.s32 4294967295, %s411_s14   ;;  %s451_s16 = sadd.s32 1, %s411_s14   ;;  %s411_s14 = sphi %s438_s14, %s498_s14   ;;  %s407_s13 = sphi %s436_s13, %s497_s13   ;;  %s403_s12 = sphi %s434_s12, %s496_s12  }
   0x3   : > { %s38_s17 = ssub.s32 %s411_s14, %s451_s16  ;;  %s41_s18 = sadd.s32 1, %s407_s13 }
   0x4   : > { %p39_p0 = scmp.eq.s32.totalorder %s38_s17, 0  ;;  %p48_p1 = scmp.ne.s32.totalorder %s407_s13, %s403_s12 }
   0x5   : > { %p49_p2 = scmp.eq.s32.totalorder %s411_s14, 0  ;;  %p340_p4 = scmp.ge.s32.totalorder %s411_s14, 2 }
   0x6   : > { %s460_s19 = scalar_select %p39_p0, %s407_s13, %s41_s18  }
   0x7   : > { %p50_p3 = por %p49_p2, %p48_p1  ;;  %127 = sbr.rel (%p340_p4) target bundleno = 18 (0x12), region = 24 }
   0xc   : > { %130 = sbr.rel (!%p50_p3) target bundleno = 18 (0x12), region = 28  ;;  %s132_s20 = sand.u32 (%p50_p3), 1, %s407_s13  }
   0xd   : > { %s360_s21 = sshll.u32 (%p50_p3), %s411_s14, 3  ;;  %s341_s22 = sshll.u32 (%p50_p3), %s132_s20, 4 }
   0xe   : > { %s137_s25 = scalar_lea.vmem (%p50_p3), %s493_s1, %s360_s21  ;;  %s134_s26 = scalar_lea.vmem (%p50_p3), [#allocation2], %s341_s22 }
   0xf   : > { %v168_v0 = vld [vmem:[%s137_s25] sm:$0xff] (%p50_p3)  ;;  %v170_v1 = vld [vmem:[%s137_s25 + $0x10] sm:$0xff] (%p50_p3) }
  0x10   : > { %169 = vst [vmem:[%s134_s26] sm:$0xff] (%p50_p3), %v168_v0 }
  0x11   : > { %171 = vst [vmem:[%s134_s26 + $0x8] sm:$0xff] %v170_v1 }
  0x12 PF: > { %p344_p5 = scmp.ge.s32.totalorder %s411_s14, 1  ;;  %p176_p6 = scmp.lt.s32.totalorder %s411_s14, 3 }
  0x14   : > { %p177_p7 = pnand %p344_p5, %p176_p6 }
  0x15   : > { %s183_s27 = sand.u32 (!%p177_p7), 1, %s403_s12   ;;  %s346_s7 = sshll.u32 (!%p177_p7), %s337_s15, 1 }
  0x16   : > { %180 = sbr.rel (%p177_p7) target bundleno = 169 (0xa9), region = 66  ;;  %s345_s28 = sshll.u32 (!%p177_p7), %s183_s27, 4 }
  0x17   : > { %s185_s4 = scalar_lea.vmem (!%p177_p7), [#allocation2], %s345_s28  ;;  %p208_p8 = scmp.lt.s32.totalorder (!%p177_p7), %s346_s7, 3 }
  0x1b   : > { %v413_v2 = vmov 0   ;;  %v217_v3 = vld [vmem:[%s494_s2] sm:$0xf]  ;;  %vm235_vm0 = vcmask 1046528   ;;  %v362_v5 = vld [vmem:[%s185_s4 + $0x4] sm:$0x70] }
  0x1c   : > { %388 = vset.pattern.permute.xlu0 %v413_v2  ;;  %v350_v4 = vld [vmem:[%s185_s4] sm:$0xf]  ;;  %v361_v6 = vld [vmem:[%s185_s4 + $0x4] sm:$0xf]  ;;  %v352_v8 = vld [vmem:[%s185_s4 + $0x8] sm:$0x70] }
  0x1d   : > { %220 = vperm.xlu0 %388, %v217_v3   ;;  %v351_v7 = vor.u32 %v362_v5, %v350_v4  ;;  %v355_v9 = vor.u32 %v361_v6, %v352_v8  ;;  %v214_v12 = vld [vmem:[%s492_s0] sm:$0x3]  ;;  %vm231_vm1 = vcmask 113664   ;;  %s500_s7 = smov (!%p208_p8, %s346_s7), 3  ;;  %vm271_vm2 = vcmask 1043456  }
  0x1e   : > { %s347_s8 = sshll.u32 %s500_s7, 2 }
  0x1f   : > { %v237_v10 = vsel %vm235_vm0, %v351_v7, 0  ;;  %v240_v11 = vsel %vm235_vm0, %v355_v9, 0  ;;  %s211_s11 = scalar_lea.vmem %s495_s3, %s347_s8 }
  0x20   : > { %249 = vmatpush.bf16.msra.mxu0 %v237_v10  ;;  %262 = vmatpush.bf16.msra.mxu1 %v240_v11 }
  0x23   : > { %356 = vmatmul.msk.bf16.vlgmr.msra.gmra.mxu0 %vm231_vm1, %v214_v12  ;;  %357 = vmatmul.msk.bf16.vlgmr.msra.gmra.mxu1 %vm231_vm1, %v214_v12 }
  0x8f   : > { %v221_v13 = vpop.permute.xlu0 %220 }
  0xa0   : > { %v251_v14 = vpop.f32.mrf.mxu0  ;;  %v264_v15 = vpop.f32.mrf.mxu1 }
  0xa1   : > { %v265_v16 = vadd.f32 %v264_v15, %v221_v13  ;;  %v252_v17 = vadd.f32 %v251_v14, %v221_v13 }
  0xa3   : > { %v270_v18 = vrot.slane %v265_v16, 4 }
  0xa5   : > { %v272_v19 = vsel %vm271_vm2, %v252_v17, %v270_v18 }
  0xa6   : > { %274 = vst [vmem:[%s211_s11] sm:$0xff] %v272_v19 }
  0xa8   : > { %v253_v20 = vpop.f32.mrf.mxu0  ;;  %v266_v21 = vpop.f32.mrf.mxu1 }
  0xa9 PF: > { %p10_p9 = scmp.ge.s32.totalorder %s451_s16, 4   ;;  %s496_s12 = smov %s407_s13 }
  0xaa   : > { %s497_s13 = smov %s460_s19  ;;  %s498_s14 = smov %s451_s16 }
  0xab   :  { %12 = sbr.rel (!%p10_p9) target bundleno = 2 (0x2), region = 105 }

// kernel: _lambda_.106
= control target key start
LH: loop header
LB: loop body
LE: loop exit
PB: predicated region body
PF: predicated region fallthrough
CT: control target
= control target key end

     0   :  { %s489_s21 = smov 0   ;;  %s529_s0 = inlined_call_operand.vmem [shape: f32[4,512], index: 0, kind: input, shape index: {}]   ;;  %s530_s1 = inlined_call_operand.vmem [shape: f32[2,4,1], index: 1, kind: input, shape index: {}]   ;;  %s531_s2 = inlined_call_operand.vmem [shape: f32[2,4,1], index: 2, kind: input, shape index: {}]   ;;  %s532_s3 = inlined_call_operand.vmem [shape: f32[4,1], index: 3, kind: input, shape index: {}]   ;;  %s533_s4 = inlined_call_operand.vmem [shape: f32[4,1], index: 4, kind: input, shape index: {}]   ;;  %s534_s5 = inlined_call_operand.vmem [shape: f32[4,512], index: 5, kind: input, shape index: {}]   ;;  %s535_s6 = inlined_call_operand.vmem [shape: f32[4,512], index: 6, kind: output, shape index: {}]  }
   0x1 LB: > { %s417_s22 = sadd.s32 4294967295, %s450_s21   ;;  %p421_p0 = scmp.ge.s32.totalorder %s450_s21, 1  ;;  %s450_s21 = sphi %s489_s21, %s16_s21  }
   0x2   : > { %p224_p1 = scmp.lt.s32.totalorder %s450_s21, 3 }
   0x4   : > { %p225_p2 = pnand %p421_p0, %p224_p1 }
   0x5   : > { %s422_s11 = sshll.u32 (!%p225_p2), %s417_s22, 1 }
   0x6   : > { %228 = sbr.rel (%p225_p2) target bundleno = 168 (0xa8), region = 44  ;;  %p260_p3 = scmp.lt.s32.totalorder (!%p225_p2), %s422_s11, 3 }
   0xb   : > { %v324_v0 = vld [vmem:[%s532_s3] sm:$0xf]  ;;  %vm279_vm0 = vcmask 3072   ;;  %v452_v2 = vmov 0   ;;  %v278_v3 = vld [vmem:[%s530_s1 + $0x4] sm:$0xf] }
   0xc   : > { %v277_v1 = vld [vmem:[%s530_s1] sm:$0xf]  ;;  %441 = vset.pattern.permute.xlu1 %v452_v2  ;;  %440 = vset.pattern.permute.xlu0 %v452_v2  ;;  %v281_v6 = vsel %vm279_vm0, %v278_v3, 0.0  ;;  %v285_v7 = vld [vmem:[%s531_s2 + $0x4] sm:$0xf]  ;;  %s537_s11 = smov (!%p260_p3, %s422_s11), 3 }
   0xd   : > { %v280_v4 = vsel %vm279_vm0, %v277_v1, 0.0  ;;  %v284_v5 = vld [vmem:[%s531_s2] sm:$0xf]  ;;  %327 = vperm.xlu1 %441, %v324_v0   ;;  %v287_v10 = vsel %vm279_vm0, %v285_v7, 0.0  ;;  %v453_v25 = vmov 839922192  }
   0xe   : > { %v286_v8 = vsel %vm279_vm0, %v284_v5, 0.0  ;;  %v282_v9 = vadd.f32 %v281_v6, %v280_v4  ;;  %v335_v15 = vld [vmem:[%s533_s4] sm:$0xf]  ;;  %v298_v26 = vunpack.c.l.s4 %v453_v25  ;;  %s423_s12 = sshll.u32 %s537_s11, 2 }
   0xf   : > { %v288_v11 = vadd.f32 %v287_v10, %v286_v8  ;;  %s263_s15 = scalar_lea.vmem %s529_s0, %s423_s12  ;;  %s269_s18 = scalar_lea.vmem %s534_s5, %s423_s12 }
  0x10   : > { %v283_v12 = vmul.f32 0.001953125, %v282_v9  ;;  %v299_v29 = vunpack.c.0.s8 %v298_v26  ;;  %v292_v31 = vld [vmem:[%s263_s15] sm:$0xff]  ;;  %s275_s22 = scalar_lea.vmem %s535_s6, %s423_s12 }
  0x11   : > { %v289_v13 = vmul.f32 0.001953125, %v288_v11  ;;  %v346_v40 = vld [vmem:[%s269_s18] sm:$0xff] }
  0x12   : > { %295 = vperm.xlu0 %440, %v283_v12   ;;  %v290_v14 = vmul.f32 %v283_v12, %v283_v12 }
  0x14   : > { %v291_v16 = vsub.f32 %v289_v13, %v290_v14 }
  0x15   : > { %338 = vperm.xlu1 %441, %v335_v15  }
  0x16   : > { %v303_v17 = vadd.f32 1e-12, %v291_v16 }
  0x18   : > { %442 = vrsqrt.f32 %v303_v17  ;;  %vm310_vm1 = vweird.f32 %v303_v17 }
  0x1e   : > { %v443_v18 = vpop.eup %442 }
  0x1f   : > { %v305_v19 = vmul.f32 %v443_v18, %v303_v17  ;;  %vm311_vm2 = vweird.f32 %v443_v18 }
  0x20   : > { %vm312_vm3 = vmor %vm310_vm1, %vm311_vm2 }
  0x21   : > { %v306_v20 = vmul.f32 %v443_v18, %v305_v19 }
  0x23   : > { %v307_v21 = vmul.f32 0.5, %v306_v20 }
  0x25   : > { %v308_v22 = vsub.f32 1.5, %v307_v21 }
  0x27   : > { %v309_v23 = vmul.f32 %v443_v18, %v308_v22 }
  0x29   : > { %v313_v24 = vsel %vm312_vm3, %v443_v18, %v309_v23 }
  0x2a   : > { %316 = vperm.xlu0 %440, %v313_v24  }
  0x7f   : > { %v328_v28 = vpop.permute.xlu1 %327 }
  0x80   : > { %v332_v36 = vperm.slane %v328_v28, %v299_v29 }
  0x84   : > { %v296_v27 = vpop.permute.xlu0 %295 }
  0x85   : > { %v300_v30 = vperm.slane %v296_v27, %v299_v29 }
  0x87   : > { %v302_v33 = vsub.f32 %v292_v31, %v300_v30  ;;  %v339_v35 = vpop.permute.xlu1 %338 }
  0x88   : > { %v343_v38 = vperm.slane %v339_v35, %v299_v29 }
  0x9c   : > { %v317_v32 = vpop.permute.xlu0 %316 }
  0x9d   : > { %v321_v34 = vperm.slane %v317_v32, %v299_v29 }
  0x9f   : > { %v323_v37 = vmul.f32 %v321_v34, %v302_v33 }
  0xa1   : > { %v334_v39 = vmul.f32 %v332_v36, %v323_v37 }
  0xa3   : > { %v345_v41 = vadd.f32 %v343_v38, %v334_v39 }
  0xa5   : > { %v347_v42 = vadd.f32 %v346_v40, %v345_v41 }
  0xa7   : > { %348 = vst [vmem:[%s275_s22] sm:$0xff] %v347_v42 }
  0xa8 PF: > { %s16_s21 = sadd.s32 1, %s450_s21  }
  0xa9   : > { %p13_p4 = scmp.ge.s32.totalorder %s16_s21, 4  }
  0xab   :  { %15 = sbr.rel (!%p13_p4) target bundleno = 1 (0x1), region = 77 }

// kernel: _lambda_.113
= control target key start
LH: loop header
LB: loop body
LE: loop exit
PB: predicated region body
PF: predicated region fallthrough
CT: control target
= control target key end

     0   :  { %s267_s9 = smov 0   ;;  %s295_s0 = inlined_call_operand.vmem [shape: f32[4,512], index: 0, kind: input, shape index: {}]   ;;  %s296_s1 = inlined_call_operand.vmem [shape: f32[4,512], index: 1, kind: input, shape index: {}]   ;;  %s297_s2 = inlined_call_operand.vmem [shape: f32[4,512], index: 2, kind: output, shape index: {}]  }
   0x1 LB: > { %s242_s10 = sadd.s32 4294967295, %s269_s9   ;;  %p246_p0 = scmp.ge.s32.totalorder %s269_s9, 1  ;;  %s269_s9 = sphi %s267_s9, %s12_s9  }
   0x2   : > { %p124_p1 = scmp.lt.s32.totalorder %s269_s9, 3 }
   0x4   : > { %p125_p2 = pnand %p246_p0, %p124_p1 }
   0x5   : > { %s247_s11 = sshll.u32 (!%p125_p2), %s242_s10, 1 }
   0x6   : > { %128 = sbr.rel (%p125_p2) target bundleno = 20 (0x14), region = 28  ;;  %p152_p3 = scmp.lt.s32.totalorder (!%p125_p2), %s247_s11, 3 }
   0xb   : > { %s299_s11 = smov (!%p152_p3, %s247_s11), 3 }
   0xc   : > { %s248_s12 = sshll.u32 %s299_s11, 2 }
   0xd   : > { %s155_s15 = scalar_lea.vmem %s295_s0, %s248_s12  ;;  %s161_s18 = scalar_lea.vmem %s296_s1, %s248_s12 }
   0xe   : > { %v169_v0 = vld [vmem:[%s155_s15] sm:$0xff]  ;;  %s167_s21 = scalar_lea.vmem %s297_s2, %s248_s12 }
   0xf   : > { %v171_v1 = vld [vmem:[%s161_s18] sm:$0xff]  ;;  %v170_v2 = vmax.f32 %v169_v0, 0.0 }
  0x11   : > { %v172_v3 = vmul.f32 %v171_v1, %v170_v2 }
  0x13   : > { %173 = vst [vmem:[%s167_s21] sm:$0xff] %v172_v3 }
  0x14 PF: > { %s12_s9 = sadd.s32 1, %s269_s9  }
  0x15   : > { %p9_p4 = scmp.ge.s32.totalorder %s12_s9, 4  }
  0x17   :  { %11 = sbr.rel (!%p9_p4) target bundleno = 1 (0x1), region = 61 }

</bundles_post_ra>
